<compile_context>
chip_gen: v6e
topology: v6e:2x2x1
jax: 0.10.0
libtpu: 0.0.40
codegen_flags: <defaults>
</compile_context>

<pallas_src>
import functools

import jax
import jax.numpy as jnp
from jax.experimental import pallas as pl
from jax.experimental.pallas import tpu as pltpu


def _round_up(x, m):
    return ((x + m - 1) // m) * m


# ----------------------------------------------------------------------------
# Fused kernel: encoder -> masked LSTM (unrolled over T) -> policy/value heads
# One grid step == one chunk of envs, fully independent -> "parallel".
# ----------------------------------------------------------------------------
def _fused_forward_kernel(
        x_ref, ar_ref, keep_ref, h0_ref, c0_ref,
        wenc_ref, benc_ref, wih_enc_ref, wih_ar_ref, whh_ref, blstm_ref,
        whead_ref, bhead_ref,
        out_ref, hN_ref, cN_ref,
        pre_scr, lstm_scr,
        *, n_steps, n_chunk_envs, cell_pad, action_size):
    cp = cell_pad
    ne = n_chunk_envs

    x = x_ref[0]          # (T*NE, IN)   bf16
    ar = ar_ref[0]        # (T*NE, ARP)  bf16
    keep = keep_ref[0]    # (T*NE, 1)    f32, == 1 - done, broadcast over lanes

    # ---- encoder ("policy_model"): ReLU(flatten(state) @ Wenc + b) ----------
    enc = jnp.dot(x, wenc_ref[...], preferred_element_type=jnp.float32)
    enc = jnp.maximum(enc + benc_ref[...], 0.0)                 # (T*NE, DENSEP) f32

    # ---- precompute input contribution of the LSTM gates for ALL timesteps.
    #      Splitting the matmul over [enc | action_reward] replaces the concat.
    pre_scr[...] = (
        jnp.dot(enc.astype(jnp.bfloat16), wih_enc_ref[...],
                preferred_element_type=jnp.float32)
        + jnp.dot(ar, wih_ar_ref[...], preferred_element_type=jnp.float32)
        + blstm_ref[...])                                        # (T*NE, 4*CP) f32

    # ---- masked LSTM recurrence (MaskedLSTMBlock, time-major), unrolled -----
    whh = whh_ref[...]                                           # (CP, 4*CP) bf16
    h = h0_ref[0]                                                # (NE, CP) f32
    c = c0_ref[0]
    for t in range(n_steps):        # T static & small -> full unroll, static slices
        r0 = t * ne
        k = keep[r0:r0 + ne, :]     # (NE, 1) lane-broadcast
        h = h * k
        c = c * k
        gates = pre_scr[r0:r0 + ne, :] + jnp.dot(
            h.astype(jnp.bfloat16), whh, preferred_element_type=jnp.float32)
        # gates packed [i, f, o, g]: one sigmoid over 3*CP, one tanh over CP
        ifo = jax.nn.sigmoid(gates[:, 0:3 * cp])
        g_g = jnp.tanh(gates[:, 3 * cp:4 * cp])
        i_g = ifo[:, 0 * cp:1 * cp]
        f_g = ifo[:, 1 * cp:2 * cp]
        o_g = ifo[:, 2 * cp:3 * cp]
        c = f_g * c + i_g * g_g
        h = o_g * jnp.tanh(c)
        lstm_scr[r0:r0 + ne, :] = h
    hN_ref[0] = h
    cN_ref[0] = c

    # ---- fused heads: one (CP, HEADP) matmul covers policy + value ----------
    lo = lstm_scr[...].astype(jnp.bfloat16)                      # (T*NE, CP)
    logits = (jnp.dot(lo, whead_ref[...], preferred_element_type=jnp.float32)
              + bhead_ref[...])                                  # (T*NE, HEADP)
    col = jax.lax.broadcasted_iota(jnp.int32, logits.shape, 1)
    masked = jnp.where(col < action_size, logits, -1e30)         # softmax over policy cols
    m = jnp.max(masked, axis=-1, keepdims=True)
    e = jnp.exp(masked - m)
    s = jnp.sum(e, axis=-1, keepdims=True)
    probs = e / s                                                # exact normalisation
    # columns 0..A-1 = policy probs, column A = raw value, rest = ~0
    out_ref[0] = jnp.where(col == action_size, logits, probs)


def _fused_forward(x, ar, keep, h0, c0, params, *, n_steps, n_chunk_envs,
                   cell_pad, action_size):
    n_chunks, rows, in_dim = x.shape
    arp = ar.shape[-1]
    densep = params["enc_w"].shape[1]
    headp = params["w_head"].shape[1]
    cp = cell_pad
    ne = n_chunk_envs
    kernel = functools.partial(
        _fused_forward_kernel, n_steps=n_steps, n_chunk_envs=ne,
        cell_pad=cp, action_size=action_size)
    return pl.pallas_call(
        kernel,
        out_shape=(
            jax.ShapeDtypeStruct((n_chunks, rows, headp), jnp.float32),  # [policy | value]
            jax.ShapeDtypeStruct((n_chunks, ne, cp), jnp.float32),       # final h
            jax.ShapeDtypeStruct((n_chunks, ne, cp), jnp.float32),       # final c
        ),
        grid=(n_chunks,),
        in_specs=[
            pl.BlockSpec((1, rows, in_dim), lambda i: (i, 0, 0)),
            pl.BlockSpec((1, rows, arp), lambda i: (i, 0, 0)),
            pl.BlockSpec((1, rows, 1), lambda i: (i, 0, 0)),
            pl.BlockSpec((1, ne, cp), lambda i: (i, 0, 0)),
            pl.BlockSpec((1, ne, cp), lambda i: (i, 0, 0)),
            pl.BlockSpec((in_dim, densep), lambda i: (0, 0)),
            pl.BlockSpec((1, densep), lambda i: (0, 0)),
            pl.BlockSpec((densep, 4 * cp), lambda i: (0, 0)),
            pl.BlockSpec((arp, 4 * cp), lambda i: (0, 0)),
            pl.BlockSpec((cp, 4 * cp), lambda i: (0, 0)),
            pl.BlockSpec((1, 4 * cp), lambda i: (0, 0)),
            pl.BlockSpec((cp, headp), lambda i: (0, 0)),
            pl.BlockSpec((1, headp), lambda i: (0, 0)),
        ],
        out_specs=(
            pl.BlockSpec((1, rows, headp), lambda i: (i, 0, 0)),
            pl.BlockSpec((1, ne, cp), lambda i: (i, 0, 0)),
            pl.BlockSpec((1, ne, cp), lambda i: (i, 0, 0)),
        ),
        scratch_shapes=[
            pltpu.VMEM((rows, 4 * cp), jnp.float32),   # precomputed gate inputs
            pltpu.VMEM((rows, cp), jnp.float32),       # lstm outputs for the heads
        ],
        compiler_params=pltpu.CompilerParams(
            dimension_semantics=("parallel",)),
    )(x, ar, keep, h0, c0,
      params["enc_w"], params["enc_b"],
      params["wih_enc"], params["wih_ar"], params["whh"], params["b_lstm"],
      params["w_head"], params["b_head"])


# ----------------------------------------------------------------------------
# Parameter init: logical weights are generated at their true sizes, then
# padded into lane-dense TPU layouts. Matmul weights are stored in bf16;
# biases stay f32. LSTM gates are packed [i, f, o, g], one 128-lane block each.
# ----------------------------------------------------------------------------
def init_params(key, in_dim, dense_size, action_size, cell_size):
    assert cell_size <= 128 and dense_size <= 128 and action_size + 1 <= 128
    ks = jax.random.split(key, 6)
    f32, bf16 = jnp.float32, jnp.bfloat16
    DENSEP = _round_up(dense_size, 128)
    CP = _round_up(cell_size, 128)
    ARP = _round_up(action_size + 1, 128)
    HEADP = _round_up(action_size + 1, 128)

    enc_w = jax.random.normal(ks[0], (in_dim, dense_size), f32) / jnp.sqrt(in_dim)
    enc_b = jnp.zeros((dense_size,), f32)

    D = dense_size + action_size + 1
    # gate axis index meaning: 0=i, 1=f, 2=o, 3=g  (packed order)
    wih = jax.random.normal(ks[1], (D, 4, cell_size), f32) / jnp.sqrt(D)
    whh = jax.random.normal(ks[2], (cell_size, 4, cell_size), f32) / jnp.sqrt(cell_size)
    b_lstm = 0.01 * jax.random.normal(ks[3], (4, cell_size), f32)   # b_ih + b_hh combined

    wp = jax.random.normal(ks[4], (cell_size, action_size), f32) / jnp.sqrt(cell_size)
    bp = jnp.zeros((action_size,), f32)
    wv = jax.random.normal(ks[5], (cell_size, 1), f32) / jnp.sqrt(cell_size)
    bv = jnp.zeros((1,), f32)

    def pad2(a, r, c):
        return jnp.zeros((r, c), f32).at[:a.shape[0], :a.shape[1]].set(a)

    def pad_gate(w, rows_pad):          # w: (rows, 4, cell) -> (rows_pad, 4*CP)
        out = jnp.zeros((rows_pad, 4 * CP), f32)
        for g in range(4):
            out = out.at[:w.shape[0], g * CP:g * CP + cell_size].set(w[:, g, :])
        return out

    b_lstm_p = jnp.zeros((1, 4 * CP), f32)
    for g in range(4):
        b_lstm_p = b_lstm_p.at[0, g * CP:g * CP + cell_size].set(b_lstm[g])

    # value head folded in as column `action_size` of the head weight
    w_head = jnp.zeros((CP, HEADP), f32)
    w_head = w_head.at[:cell_size, :action_size].set(wp)
    w_head = w_head.at[:cell_size, action_size].set(wv[:, 0])
    b_head = jnp.zeros((1, HEADP), f32)
    b_head = b_head.at[0, :action_size].set(bp)
    b_head = b_head.at[0, action_size].set(bv[0])

    return {
        "enc_w": pad2(enc_w, in_dim, DENSEP).astype(bf16),
        "enc_b": pad2(enc_b.reshape(1, -1), 1, DENSEP),
        "wih_enc": pad_gate(wih[:dense_size], DENSEP).astype(bf16),
        "wih_ar": pad_gate(wih[dense_size:], ARP).astype(bf16),
        "whh": pad_gate(whh, CP).astype(bf16),
        "b_lstm": b_lstm_p,
        "w_head": w_head.astype(bf16),
        "b_head": b_head,
    }


# ----------------------------------------------------------------------------
# Forward wrapper (padding / chunking is thin XLA glue around ONE pallas_call)
# ----------------------------------------------------------------------------
def unreal_a2c_forward(params, state, action_reward, hidden, done, *,
                       action_size, cell_size, env_chunk=8):
    """Equivalent of UnrealA2C.forward -> (policy, value, hidden)."""
    T, N = state.shape[:2]
    NPC = env_chunk
    NP = _round_up(max(N, NPC), NPC)              # pad num_envs to full chunks
    n_chunks = NP // NPC
    CP = params["whh"].shape[0]                   # padded cell (128)
    ARP = params["wih_ar"].shape[0]
    HEADP = params["w_head"].shape[1]

    x = state.reshape(T, N, -1).astype(jnp.bfloat16)
    in_dim = x.shape[-1]
    if NP != N:                                   # skip the pad-copy when not needed
        x = jnp.zeros((T, NP, in_dim), jnp.bfloat16).at[:, :N, :].set(x)
    # chunk-major layout (n_chunks, T*NPC, in_dim); free when n_chunks == 1
    x = x.reshape(T, n_chunks, NPC, in_dim).transpose(1, 0, 2, 3)
    x = x.reshape(n_chunks, T * NPC, in_dim)

    a1 = action_reward.shape[-1]                  # action_size + 1
    ar = action_reward.reshape(T, N, a1).astype(jnp.float32)
    ar_p = jnp.zeros((T, NP, ARP), jnp.float32).at[:, :N, :a1].set(ar)
    ar_p = ar_p.astype(jnp.bfloat16)
    ar_p = ar_p.reshape(T, n_chunks, NPC, ARP).transpose(1, 0, 2, 3)
    ar_p = ar_p.reshape(n_chunks, T * NPC, ARP)

    if done is None:
        done = jnp.zeros((T, N), jnp.float32)
    keep = jnp.ones((T, NP), jnp.float32).at[:, :N].set(1.0 - done.astype(jnp.float32))
    keep = keep.reshape(T, n_chunks, NPC).transpose(1, 0, 2)
    keep = keep.reshape(n_chunks, T * NPC, 1)     # lane-broadcast happens in-kernel

    if hidden is None:
        h0 = jnp.zeros((N, cell_size), jnp.float32)
        c0 = jnp.zeros((N, cell_size), jnp.float32)
    else:
        h0, c0 = hidden
        h0 = jnp.asarray(h0).reshape(N, cell_size).astype(jnp.float32)
        c0 = jnp.asarray(c0).reshape(N, cell_size).astype(jnp.float32)
    h0_p = jnp.zeros((NP, CP), jnp.float32).at[:N, :cell_size].set(h0)
    c0_p = jnp.zeros((NP, CP), jnp.float32).at[:N, :cell_size].set(c0)
    h0_p = h0_p.reshape(n_chunks, NPC, CP)
    c0_p = c0_p.reshape(n_chunks, NPC, CP)

    out, hN_p, cN_p = _fused_forward(
        x, ar_p, keep, h0_p, c0_p, params,
        n_steps=T, n_chunk_envs=NPC, cell_pad=CP, action_size=action_size)

    out = out.reshape(n_chunks, T, NPC, HEADP).transpose(1, 0, 2, 3)
    out = out.reshape(T, NP, HEADP)[:, :N, :].reshape(T * N, HEADP)
    policy = out[:, :action_size]
    value = out[:, action_size]
    hN = hN_p.reshape(NP, CP)[:N, :cell_size]
    cN = cN_p.reshape(NP, CP)[:N, :cell_size]
    return policy, value, (hN, cN)


# ----------------------------------------------------------------------------
# Pure-JAX reference (same padded weights, same bf16-operand / f32-accumulate
# matmul discipline, same gate packing order) for correctness checks.
# ----------------------------------------------------------------------------
def _reference_forward(params, state, action_reward, hidden, done, *,
                       action_size, cell_size):
    T, N = state.shape[:2]
    CP = params["whh"].shape[0]
    ARP = params["wih_ar"].shape[0]
    bf, f32 = jnp.bfloat16, jnp.float32

    x = state.reshape(T * N, -1).astype(bf)
    enc = jnp.maximum(
        jnp.dot(x, params["enc_w"], preferred_element_type=f32) + params["enc_b"], 0.0)

    a1 = action_reward.shape[-1]
    ar = jnp.zeros((T * N, ARP), f32).at[:, :a1].set(
        action_reward.astype(f32)).astype(bf)

    pre = (jnp.dot(enc.astype(bf), params["wih_enc"], preferred_element_type=f32)
           + jnp.dot(ar, params["wih_ar"], preferred_element_type=f32)
           + params["b_lstm"]).reshape(T, N, 4 * CP)

    h0, c0 = hidden
    h = jnp.zeros((N, CP), f32).at[:, :cell_size].set(
        jnp.asarray(h0).reshape(N, cell_size).astype(f32))
    c = jnp.zeros((N, CP), f32).at[:, :cell_size].set(
        jnp.asarray(c0).reshape(N, cell_size).astype(f32))
    outs = []
    for t in range(T):
        k = (1.0 - done[t]).reshape(N, 1)
        h = h * k
        c = c * k
        g = pre[t] + jnp.dot(h.astype(bf), params["whh"], preferred_element_type=f32)
        i_g = jax.nn.sigmoid(g[:, 0 * CP:1 * CP])
        f_g = jax.nn.sigmoid(g[:, 1 * CP:2 * CP])
        o_g = jax.nn.sigmoid(g[:, 2 * CP:3 * CP])
        g_g = jnp.tanh(g[:, 3 * CP:4 * CP])
        c = f_g * c + i_g * g_g
        h = o_g * jnp.tanh(c)
        outs.append(h)
    lo = jnp.stack(outs, 0).reshape(T * N, CP)
    logits = (jnp.dot(lo.astype(bf), params["w_head"], preferred_element_type=f32)
              + params["b_head"])
    policy = jax.nn.softmax(logits[:, :action_size], axis=-1)
    value = logits[:, action_size]
    return policy, value, (h[:, :cell_size], c[:, :cell_size])


if __name__ == "__main__":
    T, N = 8, 4                 # time steps, num_envs
    C, H, W = 4, 16, 16         # NCHW image input
    dense_size, action_size, cell_size = 32, 6, 32

    key = jax.random.PRNGKey(0)
    k_state, k_ar, k_param = jax.random.split(key, 3)

    state = jax.random.normal(k_state, (T, N, C, H, W), jnp.float32)
    action_reward = jax.random.normal(k_ar, (T * N, action_size + 1), jnp.float32)
    # a couple of episode terminations to exercise the done-masking path
    done = jnp.zeros((T, N), jnp.float32).at[3, 1].set(1.0).at[5, 2].set(1.0)
    h0 = jnp.zeros((N, cell_size), jnp.float32)
    c0 = jnp.zeros((N, cell_size), jnp.float32)

    params = init_params(k_param, C * H * W, dense_size, action_size, cell_size)

    fwd = jax.jit(functools.partial(unreal_a2c_forward,
                                    action_size=action_size, cell_size=cell_size))
    policy, value, (hN, cN) = fwd(params, state, action_reward, (h0, c0), done)
    jax.block_until_ready((policy, value, hN, cN))

    # ---- correctness checks against a pure-JAX reference ----
    ref_pol, ref_val, (ref_h, ref_c) = _reference_forward(
        params, state, action_reward, (h0, c0), done,
        action_size=action_size, cell_size=cell_size)

    assert policy.shape == (T * N, action_size)
    assert value.shape == (T * N,)
    assert hN.shape == (N, cell_size) and cN.shape == (N, cell_size)
    # exact softmax normalisation -> rows sum to 1
    assert jnp.allclose(jnp.sum(policy, axis=-1), 1.0, atol=1e-4)
    assert jnp.allclose(policy, ref_pol, atol=2e-3, rtol=2e-3)
    assert jnp.allclose(value, ref_val, atol=2e-3, rtol=2e-3)
    assert jnp.allclose(hN, ref_h, atol=2e-3, rtol=2e-3)
    assert jnp.allclose(cN, ref_c, atol=2e-3, rtol=2e-3)

    print("KERNEL_OK")
</pallas_src>

<mosaic_0001>
module attributes {stable_mosaic.version = 11 : i64} {
  func.func @_fused_forward_kernel(%arg0: i32, %arg1: memref<1x64x1024xbf16, #tpu.memory_space<vmem>>, %arg2: memref<1x64x128xbf16, #tpu.memory_space<vmem>>, %arg3: memref<1x64x1xf32, #tpu.memory_space<vmem>>, %arg4: memref<1x8x128xf32, #tpu.memory_space<vmem>>, %arg5: memref<1x8x128xf32, #tpu.memory_space<vmem>>, %arg6: memref<1024x128xbf16, #tpu.memory_space<vmem>>, %arg7: memref<1x128xf32, #tpu.memory_space<vmem>>, %arg8: memref<128x512xbf16, #tpu.memory_space<vmem>>, %arg9: memref<128x512xbf16, #tpu.memory_space<vmem>>, %arg10: memref<128x512xbf16, #tpu.memory_space<vmem>>, %arg11: memref<1x512xf32, #tpu.memory_space<vmem>>, %arg12: memref<128x128xbf16, #tpu.memory_space<vmem>>, %arg13: memref<1x128xf32, #tpu.memory_space<vmem>>, %arg14: memref<1x64x128xf32, #tpu.memory_space<vmem>>, %arg15: memref<1x8x128xf32, #tpu.memory_space<vmem>>, %arg16: memref<1x8x128xf32, #tpu.memory_space<vmem>>, %arg17: memref<64x512xf32, #tpu.memory_space<vmem>>, %arg18: memref<64x128xf32, #tpu.memory_space<vmem>>) attributes {dimension_semantics = [#tpu.dimension_semantics<parallel>], iteration_bounds = array<i64: 1>, scalar_prefetch = 0 : i64, scratch_operands = 2 : i64, tpu.core_type = #tpu.core_type<tc>, window_params = [{transform_indices = @transform_0, window_bounds = array<i64: 1, 64, 1024>}, {transform_indices = @transform_1, window_bounds = array<i64: 1, 64, 128>}, {transform_indices = @transform_2, window_bounds = array<i64: 1, 64, 1>}, {transform_indices = @transform_3, window_bounds = array<i64: 1, 8, 128>}, {transform_indices = @transform_4, window_bounds = array<i64: 1, 8, 128>}, {pipeline_mode = #tpu.pipeline_mode<synchronous>, transform_indices = @transform_5, window_bounds = array<i64: 1024, 128>}, {pipeline_mode = #tpu.pipeline_mode<synchronous>, transform_indices = @transform_6, window_bounds = array<i64: 1, 128>}, {pipeline_mode = #tpu.pipeline_mode<synchronous>, transform_indices = @transform_7, window_bounds = array<i64: 128, 512>}, {pipeline_mode = #tpu.pipeline_mode<synchronous>, transform_indices = @transform_8, window_bounds = array<i64: 128, 512>}, {pipeline_mode = #tpu.pipeline_mode<synchronous>, transform_indices = @transform_9, window_bounds = array<i64: 128, 512>}, {pipeline_mode = #tpu.pipeline_mode<synchronous>, transform_indices = @transform_10, window_bounds = array<i64: 1, 512>}, {pipeline_mode = #tpu.pipeline_mode<synchronous>, transform_indices = @transform_11, window_bounds = array<i64: 128, 128>}, {pipeline_mode = #tpu.pipeline_mode<synchronous>, transform_indices = @transform_12, window_bounds = array<i64: 1, 128>}, {transform_indices = @transform_13, window_bounds = array<i64: 1, 64, 128>}, {transform_indices = @transform_14, window_bounds = array<i64: 1, 8, 128>}, {transform_indices = @transform_15, window_bounds = array<i64: 1, 8, 128>}]} {
    %c0 = arith.constant 0 : index
    %c0_0 = arith.constant 0 : index
    %c0_1 = arith.constant 0 : index
    %0 = vector.load %arg1[%c0, %c0_0, %c0_1] : memref<1x64x1024xbf16, #tpu.memory_space<vmem>>, vector<1x64x1024xbf16>
    %1 = vector.shape_cast %0 : vector<1x64x1024xbf16> to vector<64x1024xbf16>
    %c0_2 = arith.constant 0 : index
    %c0_3 = arith.constant 0 : index
    %c0_4 = arith.constant 0 : index
    %2 = vector.load %arg2[%c0_2, %c0_3, %c0_4] : memref<1x64x128xbf16, #tpu.memory_space<vmem>>, vector<1x64x128xbf16>
    %3 = vector.shape_cast %2 : vector<1x64x128xbf16> to vector<64x128xbf16>
    %c0_5 = arith.constant 0 : index
    %c0_6 = arith.constant 0 : index
    %c0_7 = arith.constant 0 : index
    %4 = vector.load %arg3[%c0_5, %c0_6, %c0_7] : memref<1x64x1xf32, #tpu.memory_space<vmem>>, vector<1x64x1xf32>
    %5 = vector.shape_cast %4 : vector<1x64x1xf32> to vector<64x1xf32>
    %c0_8 = arith.constant 0 : index
    %c0_9 = arith.constant 0 : index
    %6 = vector.load %arg6[%c0_8, %c0_9] : memref<1024x128xbf16, #tpu.memory_space<vmem>>, vector<1024x128xbf16>
    %cst = arith.constant dense<0.000000e+00> : vector<64x128xf32>
    %7 = tpu.matmul %1, %6, %cst {dimension_numbers = #tpu.dot_dimension_numbers<[1], [0], [0], [1], [0, 0, 1, 1], [], []>} : vector<64x1024xbf16>, vector<1024x128xbf16>, vector<64x128xf32> -> vector<64x128xf32>
    %c0_10 = arith.constant 0 : index
    %c0_11 = arith.constant 0 : index
    %8 = vector.load %arg7[%c0_10, %c0_11] : memref<1x128xf32, #tpu.memory_space<vmem>>, vector<1x128xf32>
    %9 = vector.broadcast %8 : vector<1x128xf32> to vector<64x128xf32>
    %10 = arith.addf %7, %9 : vector<64x128xf32>
    %cst_12 = arith.constant 0.000000e+00 : f32
    %11 = vector.broadcast %cst_12 : f32 to vector<64x128xf32>
    %12 = arith.maximumf %10, %11 : vector<64x128xf32>
    %13 = arith.truncf %12 : vector<64x128xf32> to vector<64x128xbf16>
    %c0_13 = arith.constant 0 : index
    %c0_14 = arith.constant 0 : index
    %14 = vector.load %arg8[%c0_13, %c0_14] : memref<128x512xbf16, #tpu.memory_space<vmem>>, vector<128x512xbf16>
    %cst_15 = arith.constant dense<0.000000e+00> : vector<64x512xf32>
    %15 = tpu.matmul %13, %14, %cst_15 {dimension_numbers = #tpu.dot_dimension_numbers<[1], [0], [0], [1], [0, 0, 1, 1], [], []>} : vector<64x128xbf16>, vector<128x512xbf16>, vector<64x512xf32> -> vector<64x512xf32>
    %c0_16 = arith.constant 0 : index
    %c0_17 = arith.constant 0 : index
    %16 = vector.load %arg9[%c0_16, %c0_17] : memref<128x512xbf16, #tpu.memory_space<vmem>>, vector<128x512xbf16>
    %cst_18 = arith.constant dense<0.000000e+00> : vector<64x512xf32>
    %17 = tpu.matmul %3, %16, %cst_18 {dimension_numbers = #tpu.dot_dimension_numbers<[1], [0], [0], [1], [0, 0, 1, 1], [], []>} : vector<64x128xbf16>, vector<128x512xbf16>, vector<64x512xf32> -> vector<64x512xf32>
    %18 = arith.addf %15, %17 : vector<64x512xf32>
    %c0_19 = arith.constant 0 : index
    %c0_20 = arith.constant 0 : index
    %19 = vector.load %arg11[%c0_19, %c0_20] : memref<1x512xf32, #tpu.memory_space<vmem>>, vector<1x512xf32>
    %20 = vector.broadcast %19 : vector<1x512xf32> to vector<64x512xf32>
    %21 = arith.addf %18, %20 : vector<64x512xf32>
    %c0_21 = arith.constant 0 : index
    %c0_22 = arith.constant 0 : index
    %22 = vector.load %arg17[%c0_21, %c0_22] : memref<64x512xf32, #tpu.memory_space<vmem>>, vector<64x512xf32>
    tpu.vector_store %arg17[%c0_21, %c0_22], %21 {strides = array<i32>} : memref<64x512xf32, #tpu.memory_space<vmem>>, vector<64x512xf32>,
    %c0_23 = arith.constant 0 : index
    %c0_24 = arith.constant 0 : index
    %23 = vector.load %arg10[%c0_23, %c0_24] : memref<128x512xbf16, #tpu.memory_space<vmem>>, vector<128x512xbf16>
    %c0_25 = arith.constant 0 : index
    %c0_26 = arith.constant 0 : index
    %c0_27 = arith.constant 0 : index
    %24 = vector.load %arg4[%c0_25, %c0_26, %c0_27] : memref<1x8x128xf32, #tpu.memory_space<vmem>>, vector<1x8x128xf32>
    %25 = vector.shape_cast %24 : vector<1x8x128xf32> to vector<8x128xf32>
    %c0_28 = arith.constant 0 : index
    %c0_29 = arith.constant 0 : index
    %c0_30 = arith.constant 0 : index
    %26 = vector.load %arg5[%c0_28, %c0_29, %c0_30] : memref<1x8x128xf32, #tpu.memory_space<vmem>>, vector<1x8x128xf32>
    %27 = vector.shape_cast %26 : vector<1x8x128xf32> to vector<8x128xf32>
    %28 = vector.extract_strided_slice %5 {offsets = [0, 0], sizes = [8, 1], strides = [1, 1]} : vector<64x1xf32> to vector<8x1xf32>
    %29 = vector.broadcast %28 : vector<8x1xf32> to vector<8x128xf32>
    %30 = arith.mulf %25, %29 : vector<8x128xf32>
    %31 = vector.broadcast %28 : vector<8x1xf32> to vector<8x128xf32>
    %32 = arith.mulf %27, %31 : vector<8x128xf32>
    %c0_31 = arith.constant 0 : index
    %c0_32 = arith.constant 0 : index
    %33 = vector.load %arg17[%c0_31, %c0_32] : memref<64x512xf32, #tpu.memory_space<vmem>>, vector<8x512xf32>
    %34 = arith.truncf %30 : vector<8x128xf32> to vector<8x128xbf16>
    %cst_33 = arith.constant dense<0.000000e+00> : vector<8x512xf32>
    %35 = tpu.matmul %34, %23, %cst_33 {dimension_numbers = #tpu.dot_dimension_numbers<[1], [0], [0], [1], [0, 0, 1, 1], [], []>} : vector<8x128xbf16>, vector<128x512xbf16>, vector<8x512xf32> -> vector<8x512xf32>
    %36 = arith.addf %33, %35 : vector<8x512xf32>
    %37 = vector.extract_strided_slice %36 {offsets = [0, 0], sizes = [8, 384], strides = [1, 1]} : vector<8x512xf32> to vector<8x384xf32>
    %38 = arith.negf %37 : vector<8x384xf32>
    %39 = math.exp %38 : vector<8x384xf32>
    %cst_34 = arith.constant 1.000000e+00 : f32
    %40 = vector.broadcast %cst_34 : f32 to vector<8x384xf32>
    %41 = arith.addf %40, %39 : vector<8x384xf32>
    %42 = arith.divf %40, %41 : vector<8x384xf32>
    %43 = vector.extract_strided_slice %36 {offsets = [0, 384], sizes = [8, 128], strides = [1, 1]} : vector<8x512xf32> to vector<8x128xf32>
    %44 = math.tanh %43 : vector<8x128xf32>
    %45 = vector.extract_strided_slice %42 {offsets = [0, 0], sizes = [8, 128], strides = [1, 1]} : vector<8x384xf32> to vector<8x128xf32>
    %46 = vector.extract_strided_slice %42 {offsets = [0, 128], sizes = [8, 128], strides = [1, 1]} : vector<8x384xf32> to vector<8x128xf32>
    %47 = vector.extract_strided_slice %42 {offsets = [0, 256], sizes = [8, 128], strides = [1, 1]} : vector<8x384xf32> to vector<8x128xf32>
    %48 = arith.mulf %46, %32 : vector<8x128xf32>
    %49 = arith.mulf %45, %44 : vector<8x128xf32>
    %50 = arith.addf %48, %49 : vector<8x128xf32>
    %51 = math.tanh %50 : vector<8x128xf32>
    %52 = arith.mulf %47, %51 : vector<8x128xf32>
    %c0_35 = arith.constant 0 : index
    %c0_36 = arith.constant 0 : index
    %53 = vector.load %arg18[%c0_35, %c0_36] : memref<64x128xf32, #tpu.memory_space<vmem>>, vector<8x128xf32>
    tpu.vector_store %arg18[%c0_35, %c0_36], %52 {strides = array<i32>} : memref<64x128xf32, #tpu.memory_space<vmem>>, vector<8x128xf32>,
    %54 = vector.extract_strided_slice %5 {offsets = [8, 0], sizes = [8, 1], strides = [1, 1]} : vector<64x1xf32> to vector<8x1xf32>
    %55 = vector.broadcast %54 : vector<8x1xf32> to vector<8x128xf32>
    %56 = arith.mulf %52, %55 : vector<8x128xf32>
    %57 = vector.broadcast %54 : vector<8x1xf32> to vector<8x128xf32>
    %58 = arith.mulf %50, %57 : vector<8x128xf32>
    %c8 = arith.constant 8 : index
    %c0_37 = arith.constant 0 : index
    %59 = vector.load %arg17[%c8, %c0_37] : memref<64x512xf32, #tpu.memory_space<vmem>>, vector<8x512xf32>
    %60 = arith.truncf %56 : vector<8x128xf32> to vector<8x128xbf16>
    %cst_38 = arith.constant dense<0.000000e+00> : vector<8x512xf32>
    %61 = tpu.matmul %60, %23, %cst_38 {dimension_numbers = #tpu.dot_dimension_numbers<[1], [0], [0], [1], [0, 0, 1, 1], [], []>} : vector<8x128xbf16>, vector<128x512xbf16>, vector<8x512xf32> -> vector<8x512xf32>
    %62 = arith.addf %59, %61 : vector<8x512xf32>
    %63 = vector.extract_strided_slice %62 {offsets = [0, 0], sizes = [8, 384], strides = [1, 1]} : vector<8x512xf32> to vector<8x384xf32>
    %64 = arith.negf %63 : vector<8x384xf32>
    %65 = math.exp %64 : vector<8x384xf32>
    %cst_39 = arith.constant 1.000000e+00 : f32
    %66 = vector.broadcast %cst_39 : f32 to vector<8x384xf32>
    %67 = arith.addf %66, %65 : vector<8x384xf32>
    %68 = arith.divf %66, %67 : vector<8x384xf32>
    %69 = vector.extract_strided_slice %62 {offsets = [0, 384], sizes = [8, 128], strides = [1, 1]} : vector<8x512xf32> to vector<8x128xf32>
    %70 = math.tanh %69 : vector<8x128xf32>
    %71 = vector.extract_strided_slice %68 {offsets = [0, 0], sizes = [8, 128], strides = [1, 1]} : vector<8x384xf32> to vector<8x128xf32>
    %72 = vector.extract_strided_slice %68 {offsets = [0, 128], sizes = [8, 128], strides = [1, 1]} : vector<8x384xf32> to vector<8x128xf32>
    %73 = vector.extract_strided_slice %68 {offsets = [0, 256], sizes = [8, 128], strides = [1, 1]} : vector<8x384xf32> to vector<8x128xf32>
    %74 = arith.mulf %72, %58 : vector<8x128xf32>
    %75 = arith.mulf %71, %70 : vector<8x128xf32>
    %76 = arith.addf %74, %75 : vector<8x128xf32>
    %77 = math.tanh %76 : vector<8x128xf32>
    %78 = arith.mulf %73, %77 : vector<8x128xf32>
    %c8_40 = arith.constant 8 : index
    %c0_41 = arith.constant 0 : index
    %79 = vector.load %arg18[%c8_40, %c0_41] : memref<64x128xf32, #tpu.memory_space<vmem>>, vector<8x128xf32>
    tpu.vector_store %arg18[%c8_40, %c0_41], %78 {strides = array<i32>} : memref<64x128xf32, #tpu.memory_space<vmem>>, vector<8x128xf32>,
    %80 = vector.extract_strided_slice %5 {offsets = [16, 0], sizes = [8, 1], strides = [1, 1]} : vector<64x1xf32> to vector<8x1xf32>
    %81 = vector.broadcast %80 : vector<8x1xf32> to vector<8x128xf32>
    %82 = arith.mulf %78, %81 : vector<8x128xf32>
    %83 = vector.broadcast %80 : vector<8x1xf32> to vector<8x128xf32>
    %84 = arith.mulf %76, %83 : vector<8x128xf32>
    %c16 = arith.constant 16 : index
    %c0_42 = arith.constant 0 : index
    %85 = vector.load %arg17[%c16, %c0_42] : memref<64x512xf32, #tpu.memory_space<vmem>>, vector<8x512xf32>
    %86 = arith.truncf %82 : vector<8x128xf32> to vector<8x128xbf16>
    %cst_43 = arith.constant dense<0.000000e+00> : vector<8x512xf32>
    %87 = tpu.matmul %86, %23, %cst_43 {dimension_numbers = #tpu.dot_dimension_numbers<[1], [0], [0], [1], [0, 0, 1, 1], [], []>} : vector<8x128xbf16>, vector<128x512xbf16>, vector<8x512xf32> -> vector<8x512xf32>
    %88 = arith.addf %85, %87 : vector<8x512xf32>
    %89 = vector.extract_strided_slice %88 {offsets = [0, 0], sizes = [8, 384], strides = [1, 1]} : vector<8x512xf32> to vector<8x384xf32>
    %90 = arith.negf %89 : vector<8x384xf32>
    %91 = math.exp %90 : vector<8x384xf32>
    %cst_44 = arith.constant 1.000000e+00 : f32
    %92 = vector.broadcast %cst_44 : f32 to vector<8x384xf32>
    %93 = arith.addf %92, %91 : vector<8x384xf32>
    %94 = arith.divf %92, %93 : vector<8x384xf32>
    %95 = vector.extract_strided_slice %88 {offsets = [0, 384], sizes = [8, 128], strides = [1, 1]} : vector<8x512xf32> to vector<8x128xf32>
    %96 = math.tanh %95 : vector<8x128xf32>
    %97 = vector.extract_strided_slice %94 {offsets = [0, 0], sizes = [8, 128], strides = [1, 1]} : vector<8x384xf32> to vector<8x128xf32>
    %98 = vector.extract_strided_slice %94 {offsets = [0, 128], sizes = [8, 128], strides = [1, 1]} : vector<8x384xf32> to vector<8x128xf32>
    %99 = vector.extract_strided_slice %94 {offsets = [0, 256], sizes = [8, 128], strides = [1, 1]} : vector<8x384xf32> to vector<8x128xf32>
    %100 = arith.mulf %98, %84 : vector<8x128xf32>
    %101 = arith.mulf %97, %96 : vector<8x128xf32>
    %102 = arith.addf %100, %101 : vector<8x128xf32>
    %103 = math.tanh %102 : vector<8x128xf32>
    %104 = arith.mulf %99, %103 : vector<8x128xf32>
    %c16_45 = arith.constant 16 : index
    %c0_46 = arith.constant 0 : index
    %105 = vector.load %arg18[%c16_45, %c0_46] : memref<64x128xf32, #tpu.memory_space<vmem>>, vector<8x128xf32>
    tpu.vector_store %arg18[%c16_45, %c0_46], %104 {strides = array<i32>} : memref<64x128xf32, #tpu.memory_space<vmem>>, vector<8x128xf32>,
    %106 = vector.extract_strided_slice %5 {offsets = [24, 0], sizes = [8, 1], strides = [1, 1]} : vector<64x1xf32> to vector<8x1xf32>
    %107 = vector.broadcast %106 : vector<8x1xf32> to vector<8x128xf32>
    %108 = arith.mulf %104, %107 : vector<8x128xf32>
    %109 = vector.broadcast %106 : vector<8x1xf32> to vector<8x128xf32>
    %110 = arith.mulf %102, %109 : vector<8x128xf32>
    %c24 = arith.constant 24 : index
    %c0_47 = arith.constant 0 : index
    %111 = vector.load %arg17[%c24, %c0_47] : memref<64x512xf32, #tpu.memory_space<vmem>>, vector<8x512xf32>
    %112 = arith.truncf %108 : vector<8x128xf32> to vector<8x128xbf16>
    %cst_48 = arith.constant dense<0.000000e+00> : vector<8x512xf32>
    %113 = tpu.matmul %112, %23, %cst_48 {dimension_numbers = #tpu.dot_dimension_numbers<[1], [0], [0], [1], [0, 0, 1, 1], [], []>} : vector<8x128xbf16>, vector<128x512xbf16>, vector<8x512xf32> -> vector<8x512xf32>
    %114 = arith.addf %111, %113 : vector<8x512xf32>
    %115 = vector.extract_strided_slice %114 {offsets = [0, 0], sizes = [8, 384], strides = [1, 1]} : vector<8x512xf32> to vector<8x384xf32>
    %116 = arith.negf %115 : vector<8x384xf32>
    %117 = math.exp %116 : vector<8x384xf32>
    %cst_49 = arith.constant 1.000000e+00 : f32
    %118 = vector.broadcast %cst_49 : f32 to vector<8x384xf32>
    %119 = arith.addf %118, %117 : vector<8x384xf32>
    %120 = arith.divf %118, %119 : vector<8x384xf32>
    %121 = vector.extract_strided_slice %114 {offsets = [0, 384], sizes = [8, 128], strides = [1, 1]} : vector<8x512xf32> to vector<8x128xf32>
    %122 = math.tanh %121 : vector<8x128xf32>
    %123 = vector.extract_strided_slice %120 {offsets = [0, 0], sizes = [8, 128], strides = [1, 1]} : vector<8x384xf32> to vector<8x128xf32>
    %124 = vector.extract_strided_slice %120 {offsets = [0, 128], sizes = [8, 128], strides = [1, 1]} : vector<8x384xf32> to vector<8x128xf32>
    %125 = vector.extract_strided_slice %120 {offsets = [0, 256], sizes = [8, 128], strides = [1, 1]} : vector<8x384xf32> to vector<8x128xf32>
    %126 = arith.mulf %124, %110 : vector<8x128xf32>
    %127 = arith.mulf %123, %122 : vector<8x128xf32>
    %128 = arith.addf %126, %127 : vector<8x128xf32>
    %129 = math.tanh %128 : vector<8x128xf32>
    %130 = arith.mulf %125, %129 : vector<8x128xf32>
    %c24_50 = arith.constant 24 : index
    %c0_51 = arith.constant 0 : index
    %131 = vector.load %arg18[%c24_50, %c0_51] : memref<64x128xf32, #tpu.memory_space<vmem>>, vector<8x128xf32>
    tpu.vector_store %arg18[%c24_50, %c0_51], %130 {strides = array<i32>} : memref<64x128xf32, #tpu.memory_space<vmem>>, vector<8x128xf32>,
    %132 = vector.extract_strided_slice %5 {offsets = [32, 0], sizes = [8, 1], strides = [1, 1]} : vector<64x1xf32> to vector<8x1xf32>
    %133 = vector.broadcast %132 : vector<8x1xf32> to vector<8x128xf32>
    %134 = arith.mulf %130, %133 : vector<8x128xf32>
    %135 = vector.broadcast %132 : vector<8x1xf32> to vector<8x128xf32>
    %136 = arith.mulf %128, %135 : vector<8x128xf32>
    %c32 = arith.constant 32 : index
    %c0_52 = arith.constant 0 : index
    %137 = vector.load %arg17[%c32, %c0_52] : memref<64x512xf32, #tpu.memory_space<vmem>>, vector<8x512xf32>
    %138 = arith.truncf %134 : vector<8x128xf32> to vector<8x128xbf16>
    %cst_53 = arith.constant dense<0.000000e+00> : vector<8x512xf32>
    %139 = tpu.matmul %138, %23, %cst_53 {dimension_numbers = #tpu.dot_dimension_numbers<[1], [0], [0], [1], [0, 0, 1, 1], [], []>} : vector<8x128xbf16>, vector<128x512xbf16>, vector<8x512xf32> -> vector<8x512xf32>
    %140 = arith.addf %137, %139 : vector<8x512xf32>
    %141 = vector.extract_strided_slice %140 {offsets = [0, 0], sizes = [8, 384], strides = [1, 1]} : vector<8x512xf32> to vector<8x384xf32>
    %142 = arith.negf %141 : vector<8x384xf32>
    %143 = math.exp %142 : vector<8x384xf32>
    %cst_54 = arith.constant 1.000000e+00 : f32
    %144 = vector.broadcast %cst_54 : f32 to vector<8x384xf32>
    %145 = arith.addf %144, %143 : vector<8x384xf32>
    %146 = arith.divf %144, %145 : vector<8x384xf32>
    %147 = vector.extract_strided_slice %140 {offsets = [0, 384], sizes = [8, 128], strides = [1, 1]} : vector<8x512xf32> to vector<8x128xf32>
    %148 = math.tanh %147 : vector<8x128xf32>
    %149 = vector.extract_strided_slice %146 {offsets = [0, 0], sizes = [8, 128], strides = [1, 1]} : vector<8x384xf32> to vector<8x128xf32>
    %150 = vector.extract_strided_slice %146 {offsets = [0, 128], sizes = [8, 128], strides = [1, 1]} : vector<8x384xf32> to vector<8x128xf32>
    %151 = vector.extract_strided_slice %146 {offsets = [0, 256], sizes = [8, 128], strides = [1, 1]} : vector<8x384xf32> to vector<8x128xf32>
    %152 = arith.mulf %150, %136 : vector<8x128xf32>
    %153 = arith.mulf %149, %148 : vector<8x128xf32>
    %154 = arith.addf %152, %153 : vector<8x128xf32>
    %155 = math.tanh %154 : vector<8x128xf32>
    %156 = arith.mulf %151, %155 : vector<8x128xf32>
    %c32_55 = arith.constant 32 : index
    %c0_56 = arith.constant 0 : index
    %157 = vector.load %arg18[%c32_55, %c0_56] : memref<64x128xf32, #tpu.memory_space<vmem>>, vector<8x128xf32>
    tpu.vector_store %arg18[%c32_55, %c0_56], %156 {strides = array<i32>} : memref<64x128xf32, #tpu.memory_space<vmem>>, vector<8x128xf32>,
    %158 = vector.extract_strided_slice %5 {offsets = [40, 0], sizes = [8, 1], strides = [1, 1]} : vector<64x1xf32> to vector<8x1xf32>
    %159 = vector.broadcast %158 : vector<8x1xf32> to vector<8x128xf32>
    %160 = arith.mulf %156, %159 : vector<8x128xf32>
    %161 = vector.broadcast %158 : vector<8x1xf32> to vector<8x128xf32>
    %162 = arith.mulf %154, %161 : vector<8x128xf32>
    %c40 = arith.constant 40 : index
    %c0_57 = arith.constant 0 : index
    %163 = vector.load %arg17[%c40, %c0_57] : memref<64x512xf32, #tpu.memory_space<vmem>>, vector<8x512xf32>
    %164 = arith.truncf %160 : vector<8x128xf32> to vector<8x128xbf16>
    %cst_58 = arith.constant dense<0.000000e+00> : vector<8x512xf32>
    %165 = tpu.matmul %164, %23, %cst_58 {dimension_numbers = #tpu.dot_dimension_numbers<[1], [0], [0], [1], [0, 0, 1, 1], [], []>} : vector<8x128xbf16>, vector<128x512xbf16>, vector<8x512xf32> -> vector<8x512xf32>
    %166 = arith.addf %163, %165 : vector<8x512xf32>
    %167 = vector.extract_strided_slice %166 {offsets = [0, 0], sizes = [8, 384], strides = [1, 1]} : vector<8x512xf32> to vector<8x384xf32>
    %168 = arith.negf %167 : vector<8x384xf32>
    %169 = math.exp %168 : vector<8x384xf32>
    %cst_59 = arith.constant 1.000000e+00 : f32
    %170 = vector.broadcast %cst_59 : f32 to vector<8x384xf32>
    %171 = arith.addf %170, %169 : vector<8x384xf32>
    %172 = arith.divf %170, %171 : vector<8x384xf32>
    %173 = vector.extract_strided_slice %166 {offsets = [0, 384], sizes = [8, 128], strides = [1, 1]} : vector<8x512xf32> to vector<8x128xf32>
    %174 = math.tanh %173 : vector<8x128xf32>
    %175 = vector.extract_strided_slice %172 {offsets = [0, 0], sizes = [8, 128], strides = [1, 1]} : vector<8x384xf32> to vector<8x128xf32>
    %176 = vector.extract_strided_slice %172 {offsets = [0, 128], sizes = [8, 128], strides = [1, 1]} : vector<8x384xf32> to vector<8x128xf32>
    %177 = vector.extract_strided_slice %172 {offsets = [0, 256], sizes = [8, 128], strides = [1, 1]} : vector<8x384xf32> to vector<8x128xf32>
    %178 = arith.mulf %176, %162 : vector<8x128xf32>
    %179 = arith.mulf %175, %174 : vector<8x128xf32>
    %180 = arith.addf %178, %179 : vector<8x128xf32>
    %181 = math.tanh %180 : vector<8x128xf32>
    %182 = arith.mulf %177, %181 : vector<8x128xf32>
    %c40_60 = arith.constant 40 : index
    %c0_61 = arith.constant 0 : index
    %183 = vector.load %arg18[%c40_60, %c0_61] : memref<64x128xf32, #tpu.memory_space<vmem>>, vector<8x128xf32>
    tpu.vector_store %arg18[%c40_60, %c0_61], %182 {strides = array<i32>} : memref<64x128xf32, #tpu.memory_space<vmem>>, vector<8x128xf32>,
    %184 = vector.extract_strided_slice %5 {offsets = [48, 0], sizes = [8, 1], strides = [1, 1]} : vector<64x1xf32> to vector<8x1xf32>
    %185 = vector.broadcast %184 : vector<8x1xf32> to vector<8x128xf32>
    %186 = arith.mulf %182, %185 : vector<8x128xf32>
    %187 = vector.broadcast %184 : vector<8x1xf32> to vector<8x128xf32>
    %188 = arith.mulf %180, %187 : vector<8x128xf32>
    %c48 = arith.constant 48 : index
    %c0_62 = arith.constant 0 : index
    %189 = vector.load %arg17[%c48, %c0_62] : memref<64x512xf32, #tpu.memory_space<vmem>>, vector<8x512xf32>
    %190 = arith.truncf %186 : vector<8x128xf32> to vector<8x128xbf16>
    %cst_63 = arith.constant dense<0.000000e+00> : vector<8x512xf32>
    %191 = tpu.matmul %190, %23, %cst_63 {dimension_numbers = #tpu.dot_dimension_numbers<[1], [0], [0], [1], [0, 0, 1, 1], [], []>} : vector<8x128xbf16>, vector<128x512xbf16>, vector<8x512xf32> -> vector<8x512xf32>
    %192 = arith.addf %189, %191 : vector<8x512xf32>
    %193 = vector.extract_strided_slice %192 {offsets = [0, 0], sizes = [8, 384], strides = [1, 1]} : vector<8x512xf32> to vector<8x384xf32>
    %194 = arith.negf %193 : vector<8x384xf32>
    %195 = math.exp %194 : vector<8x384xf32>
    %cst_64 = arith.constant 1.000000e+00 : f32
    %196 = vector.broadcast %cst_64 : f32 to vector<8x384xf32>
    %197 = arith.addf %196, %195 : vector<8x384xf32>
    %198 = arith.divf %196, %197 : vector<8x384xf32>
    %199 = vector.extract_strided_slice %192 {offsets = [0, 384], sizes = [8, 128], strides = [1, 1]} : vector<8x512xf32> to vector<8x128xf32>
    %200 = math.tanh %199 : vector<8x128xf32>
    %201 = vector.extract_strided_slice %198 {offsets = [0, 0], sizes = [8, 128], strides = [1, 1]} : vector<8x384xf32> to vector<8x128xf32>
    %202 = vector.extract_strided_slice %198 {offsets = [0, 128], sizes = [8, 128], strides = [1, 1]} : vector<8x384xf32> to vector<8x128xf32>
    %203 = vector.extract_strided_slice %198 {offsets = [0, 256], sizes = [8, 128], strides = [1, 1]} : vector<8x384xf32> to vector<8x128xf32>
    %204 = arith.mulf %202, %188 : vector<8x128xf32>
    %205 = arith.mulf %201, %200 : vector<8x128xf32>
    %206 = arith.addf %204, %205 : vector<8x128xf32>
    %207 = math.tanh %206 : vector<8x128xf32>
    %208 = arith.mulf %203, %207 : vector<8x128xf32>
    %c48_65 = arith.constant 48 : index
    %c0_66 = arith.constant 0 : index
    %209 = vector.load %arg18[%c48_65, %c0_66] : memref<64x128xf32, #tpu.memory_space<vmem>>, vector<8x128xf32>
    tpu.vector_store %arg18[%c48_65, %c0_66], %208 {strides = array<i32>} : memref<64x128xf32, #tpu.memory_space<vmem>>, vector<8x128xf32>,
    %210 = vector.extract_strided_slice %5 {offsets = [56, 0], sizes = [8, 1], strides = [1, 1]} : vector<64x1xf32> to vector<8x1xf32>
    %211 = vector.broadcast %210 : vector<8x1xf32> to vector<8x128xf32>
    %212 = arith.mulf %208, %211 : vector<8x128xf32>
    %213 = vector.broadcast %210 : vector<8x1xf32> to vector<8x128xf32>
    %214 = arith.mulf %206, %213 : vector<8x128xf32>
    %c56 = arith.constant 56 : index
    %c0_67 = arith.constant 0 : index
    %215 = vector.load %arg17[%c56, %c0_67] : memref<64x512xf32, #tpu.memory_space<vmem>>, vector<8x512xf32>
    %216 = arith.truncf %212 : vector<8x128xf32> to vector<8x128xbf16>
    %cst_68 = arith.constant dense<0.000000e+00> : vector<8x512xf32>
    %217 = tpu.matmul %216, %23, %cst_68 {dimension_numbers = #tpu.dot_dimension_numbers<[1], [0], [0], [1], [0, 0, 1, 1], [], []>} : vector<8x128xbf16>, vector<128x512xbf16>, vector<8x512xf32> -> vector<8x512xf32>
    %218 = arith.addf %215, %217 : vector<8x512xf32>
    %219 = vector.extract_strided_slice %218 {offsets = [0, 0], sizes = [8, 384], strides = [1, 1]} : vector<8x512xf32> to vector<8x384xf32>
    %220 = arith.negf %219 : vector<8x384xf32>
    %221 = math.exp %220 : vector<8x384xf32>
    %cst_69 = arith.constant 1.000000e+00 : f32
    %222 = vector.broadcast %cst_69 : f32 to vector<8x384xf32>
    %223 = arith.addf %222, %221 : vector<8x384xf32>
    %224 = arith.divf %222, %223 : vector<8x384xf32>
    %225 = vector.extract_strided_slice %218 {offsets = [0, 384], sizes = [8, 128], strides = [1, 1]} : vector<8x512xf32> to vector<8x128xf32>
    %226 = math.tanh %225 : vector<8x128xf32>
    %227 = vector.extract_strided_slice %224 {offsets = [0, 0], sizes = [8, 128], strides = [1, 1]} : vector<8x384xf32> to vector<8x128xf32>
    %228 = vector.extract_strided_slice %224 {offsets = [0, 128], sizes = [8, 128], strides = [1, 1]} : vector<8x384xf32> to vector<8x128xf32>
    %229 = vector.extract_strided_slice %224 {offsets = [0, 256], sizes = [8, 128], strides = [1, 1]} : vector<8x384xf32> to vector<8x128xf32>
    %230 = arith.mulf %228, %214 : vector<8x128xf32>
    %231 = arith.mulf %227, %226 : vector<8x128xf32>
    %232 = arith.addf %230, %231 : vector<8x128xf32>
    %233 = math.tanh %232 : vector<8x128xf32>
    %234 = arith.mulf %229, %233 : vector<8x128xf32>
    %c56_70 = arith.constant 56 : index
    %c0_71 = arith.constant 0 : index
    %235 = vector.load %arg18[%c56_70, %c0_71] : memref<64x128xf32, #tpu.memory_space<vmem>>, vector<8x128xf32>
    tpu.vector_store %arg18[%c56_70, %c0_71], %234 {strides = array<i32>} : memref<64x128xf32, #tpu.memory_space<vmem>>, vector<8x128xf32>,
    %c0_72 = arith.constant 0 : index
    %c0_73 = arith.constant 0 : index
    %c0_74 = arith.constant 0 : index
    %236 = vector.load %arg15[%c0_72, %c0_73, %c0_74] : memref<1x8x128xf32, #tpu.memory_space<vmem>>, vector<1x8x128xf32>
    %237 = vector.shape_cast %236 : vector<1x8x128xf32> to vector<8x128xf32>
    %238 = vector.shape_cast %234 : vector<8x128xf32> to vector<1x8x128xf32>
    tpu.vector_store %arg15[%c0_72, %c0_73, %c0_74], %238 {strides = array<i32>} : memref<1x8x128xf32, #tpu.memory_space<vmem>>, vector<1x8x128xf32>,
    %c0_75 = arith.constant 0 : index
    %c0_76 = arith.constant 0 : index
    %c0_77 = arith.constant 0 : index
    %239 = vector.load %arg16[%c0_75, %c0_76, %c0_77] : memref<1x8x128xf32, #tpu.memory_space<vmem>>, vector<1x8x128xf32>
    %240 = vector.shape_cast %239 : vector<1x8x128xf32> to vector<8x128xf32>
    %241 = vector.shape_cast %232 : vector<8x128xf32> to vector<1x8x128xf32>
    tpu.vector_store %arg16[%c0_75, %c0_76, %c0_77], %241 {strides = array<i32>} : memref<1x8x128xf32, #tpu.memory_space<vmem>>, vector<1x8x128xf32>,
    %c0_78 = arith.constant 0 : index
    %c0_79 = arith.constant 0 : index
    %242 = vector.load %arg18[%c0_78, %c0_79] : memref<64x128xf32, #tpu.memory_space<vmem>>, vector<64x128xf32>
    %243 = arith.truncf %242 : vector<64x128xf32> to vector<64x128xbf16>
    %c0_80 = arith.constant 0 : index
    %c0_81 = arith.constant 0 : index
    %244 = vector.load %arg12[%c0_80, %c0_81] : memref<128x128xbf16, #tpu.memory_space<vmem>>, vector<128x128xbf16>
    %cst_82 = arith.constant dense<0.000000e+00> : vector<64x128xf32>
    %245 = tpu.matmul %243, %244, %cst_82 {dimension_numbers = #tpu.dot_dimension_numbers<[1], [0], [0], [1], [0, 0, 1, 1], [], []>} : vector<64x128xbf16>, vector<128x128xbf16>, vector<64x128xf32> -> vector<64x128xf32>
    %c0_83 = arith.constant 0 : index
    %c0_84 = arith.constant 0 : index
    %246 = vector.load %arg13[%c0_83, %c0_84] : memref<1x128xf32, #tpu.memory_space<vmem>>, vector<1x128xf32>
    %247 = vector.broadcast %246 : vector<1x128xf32> to vector<64x128xf32>
    %248 = arith.addf %245, %247 : vector<64x128xf32>
    %249 = tpu.iota {dimensions = array<i32: 1>} : vector<64x128xi32>
    %c6_i32 = arith.constant 6 : i32
    %250 = vector.broadcast %c6_i32 : i32 to vector<64x128xi32>
    %251 = arith.cmpi slt, %249, %250 : vector<64x128xi32>
    %cst_85 = arith.constant -1.000000e+30 : f32
    %252 = vector.broadcast %cst_85 : f32 to vector<64x128xf32>
    %253 = arith.select %251, %248, %252 : vector<64x128xi1>, vector<64x128xf32>
    %cst_86 = arith.constant dense<0xFF800000> : vector<64xf32>
    %254 = vector.multi_reduction <maximumf>, %253, %cst_86 [1] : vector<64x128xf32> to vector<64xf32>
    %255 = vector.shape_cast %254 : vector<64xf32> to vector<64x1xf32>
    %256 = vector.broadcast %255 : vector<64x1xf32> to vector<64x128xf32>
    %257 = arith.subf %253, %256 : vector<64x128xf32>
    %258 = math.exp %257 : vector<64x128xf32>
    %cst_87 = arith.constant dense<0.000000e+00> : vector<64xf32>
    %259 = vector.multi_reduction <add>, %258, %cst_87 [1] : vector<64x128xf32> to vector<64xf32>
    %260 = vector.shape_cast %259 : vector<64xf32> to vector<64x1xf32>
    %261 = vector.broadcast %260 : vector<64x1xf32> to vector<64x128xf32>
    %262 = arith.divf %258, %261 : vector<64x128xf32>
    %c6_i32_88 = arith.constant 6 : i32
    %263 = vector.broadcast %c6_i32_88 : i32 to vector<64x128xi32>
    %264 = arith.cmpi eq, %249, %263 : vector<64x128xi32>
    %265 = arith.select %264, %248, %262 : vector<64x128xi1>, vector<64x128xf32>
    %c0_89 = arith.constant 0 : index
    %c0_90 = arith.constant 0 : index
    %c0_91 = arith.constant 0 : index
    %266 = vector.load %arg14[%c0_89, %c0_90, %c0_91] : memref<1x64x128xf32, #tpu.memory_space<vmem>>, vector<1x64x128xf32>
    %267 = vector.shape_cast %266 : vector<1x64x128xf32> to vector<64x128xf32>
    %268 = vector.shape_cast %265 : vector<64x128xf32> to vector<1x64x128xf32>
    tpu.vector_store %arg14[%c0_89, %c0_90, %c0_91], %268 {strides = array<i32>} : memref<1x64x128xf32, #tpu.memory_space<vmem>>, vector<1x64x128xf32>,
    return
  }
  func.func @transform_0(%arg0: i32) -> (i32, i32, i32) {
    %c0_i32 = arith.constant 0 : i32
    %c0_i32_0 = arith.constant 0 : i32
    %c0_i32_1 = arith.constant 0 : i32
    return %arg0, %c0_i32, %c0_i32_0 : i32, i32, i32
  }
  func.func @transform_1(%arg0: i32) -> (i32, i32, i32) {
    %c0_i32 = arith.constant 0 : i32
    %c0_i32_0 = arith.constant 0 : i32
    %c0_i32_1 = arith.constant 0 : i32
    return %arg0, %c0_i32, %c0_i32_0 : i32, i32, i32
  }
  func.func @transform_2(%arg0: i32) -> (i32, i32, i32) {
    %c0_i32 = arith.constant 0 : i32
    %c0_i32_0 = arith.constant 0 : i32
    %c0_i32_1 = arith.constant 0 : i32
    return %arg0, %c0_i32, %c0_i32_0 : i32, i32, i32
  }
  func.func @transform_3(%arg0: i32) -> (i32, i32, i32) {
    %c0_i32 = arith.constant 0 : i32
    %c0_i32_0 = arith.constant 0 : i32
    %c0_i32_1 = arith.constant 0 : i32
    return %arg0, %c0_i32, %c0_i32_0 : i32, i32, i32
  }
  func.func @transform_4(%arg0: i32) -> (i32, i32, i32) {
    %c0_i32 = arith.constant 0 : i32
    %c0_i32_0 = arith.constant 0 : i32
    %c0_i32_1 = arith.constant 0 : i32
    return %arg0, %c0_i32, %c0_i32_0 : i32, i32, i32
  }
  func.func @transform_5(%arg0: i32) -> (i32, i32) {
    %c0_i32 = arith.constant 0 : i32
    %c0_i32_0 = arith.constant 0 : i32
    %c0_i32_1 = arith.constant 0 : i32
    return %c0_i32, %c0_i32_0 : i32, i32
  }
  func.func @transform_6(%arg0: i32) -> (i32, i32) {
    %c0_i32 = arith.constant 0 : i32
    %c0_i32_0 = arith.constant 0 : i32
    %c0_i32_1 = arith.constant 0 : i32
    return %c0_i32, %c0_i32_0 : i32, i32
  }
  func.func @transform_7(%arg0: i32) -> (i32, i32) {
    %c0_i32 = arith.constant 0 : i32
    %c0_i32_0 = arith.constant 0 : i32
    %c0_i32_1 = arith.constant 0 : i32
    return %c0_i32, %c0_i32_0 : i32, i32
  }
  func.func @transform_8(%arg0: i32) -> (i32, i32) {
    %c0_i32 = arith.constant 0 : i32
    %c0_i32_0 = arith.constant 0 : i32
    %c0_i32_1 = arith.constant 0 : i32
    return %c0_i32, %c0_i32_0 : i32, i32
  }
  func.func @transform_9(%arg0: i32) -> (i32, i32) {
    %c0_i32 = arith.constant 0 : i32
    %c0_i32_0 = arith.constant 0 : i32
    %c0_i32_1 = arith.constant 0 : i32
    return %c0_i32, %c0_i32_0 : i32, i32
  }
  func.func @transform_10(%arg0: i32) -> (i32, i32) {
    %c0_i32 = arith.constant 0 : i32
    %c0_i32_0 = arith.constant 0 : i32
    %c0_i32_1 = arith.constant 0 : i32
    return %c0_i32, %c0_i32_0 : i32, i32
  }
  func.func @transform_11(%arg0: i32) -> (i32, i32) {
    %c0_i32 = arith.constant 0 : i32
    %c0_i32_0 = arith.constant 0 : i32
    %c0_i32_1 = arith.constant 0 : i32
    return %c0_i32, %c0_i32_0 : i32, i32
  }
  func.func @transform_12(%arg0: i32) -> (i32, i32) {
    %c0_i32 = arith.constant 0 : i32
    %c0_i32_0 = arith.constant 0 : i32
    %c0_i32_1 = arith.constant 0 : i32
    return %c0_i32, %c0_i32_0 : i32, i32
  }
  func.func @transform_13(%arg0: i32) -> (i32, i32, i32) {
    %c0_i32 = arith.constant 0 : i32
    %c0_i32_0 = arith.constant 0 : i32
    %c0_i32_1 = arith.constant 0 : i32
    return %arg0, %c0_i32, %c0_i32_0 : i32, i32, i32
  }
  func.func @transform_14(%arg0: i32) -> (i32, i32, i32) {
    %c0_i32 = arith.constant 0 : i32
    %c0_i32_0 = arith.constant 0 : i32
    %c0_i32_1 = arith.constant 0 : i32
    return %arg0, %c0_i32, %c0_i32_0 : i32, i32, i32
  }
  func.func @transform_15(%arg0: i32) -> (i32, i32, i32) {
    %c0_i32 = arith.constant 0 : i32
    %c0_i32_0 = arith.constant 0 : i32
    %c0_i32_1 = arith.constant 0 : i32
    return %arg0, %c0_i32, %c0_i32_0 : i32, i32, i32
  }
}

</mosaic_0001>

<bundles_post_ra>
// kernel: unreal_a2c_forward.1
= control target key start
LH: loop header
LB: loop body
LE: loop exit
PB: predicated region body
PF: predicated region fallthrough
CT: control target
= control target key end

     0   :  { %v5840_v1 = vmov 0   ;;  %s5824_s5 = inlined_call_operand.vmem [shape: bf16[1024,128], index: 5, kind: input, shape index: {}]   ;;  %s5825_s0 = inlined_call_operand.vmem [shape: bf16[1,64,1024], index: 0, kind: input, shape index: {}]   ;;  %s5826_s2 = inlined_call_operand.vmem [shape: f32[1,64,1], index: 2, kind: input, shape index: {}]   ;;  %s5827_s8 = inlined_call_operand.vmem [shape: bf16[128,512], index: 8, kind: input, shape index: {}]   ;;  %s5828_s1 = inlined_call_operand.vmem [shape: bf16[1,64,128], index: 1, kind: input, shape index: {}]   ;;  %s5829_s7 = inlined_call_operand.vmem [shape: bf16[128,512], index: 7, kind: input, shape index: {}]   ;;  %s5830_s9 = inlined_call_operand.vmem [shape: bf16[128,512], index: 9, kind: input, shape index: {}]   ;;  %s5831_s6 = inlined_call_operand.vmem [shape: f32[1,128], index: 6, kind: input, shape index: {}]   ;;  %s5832_s3 = inlined_call_operand.vmem [shape: f32[1,8,128], index: 3, kind: input, shape index: {}]   ;;  %s5833_s10 = inlined_call_operand.vmem [shape: f32[1,512], index: 10, kind: input, shape index: {}]   ;;  %s5834_s4 = inlined_call_operand.vmem [shape: f32[1,8,128], index: 4, kind: input, shape index: {}]   ;;  %s5835_s11 = inlined_call_operand.vmem [shape: bf16[128,128], index: 11, kind: input, shape index: {}]   ;;  %s5836_s12 = inlined_call_operand.vmem [shape: f32[1,128], index: 12, kind: input, shape index: {}]   ;;  %s5837_s15 = inlined_call_operand.vmem [shape: f32[1,8,128], index: 15, kind: output, shape index: {2}]   ;;  %s5838_s14 = inlined_call_operand.vmem [shape: f32[1,8,128], index: 14, kind: output, shape index: {1}]   ;;  %s5839_s13 = inlined_call_operand.vmem [shape: f32[1,64,128], index: 13, kind: output, shape index: {0}]  }
   0x1   :  { %v3702_v0 = vld [vmem:[%s5824_s5 + $0x78] sm:$0xff]   ;;  %3700 = vset.pattern.permute.xlu0 %v5840_v1  ;;  %3701 = vset.pattern.permute.xlu1 %v5840_v1  ;;  %v3704_v3 = vld [vmem:[%s5824_s5 + $0x70] sm:$0xff]   ;;  %v3706_v5 = vld [vmem:[%s5824_s5 + $0x68] sm:$0xff]  }
   0x2   :  { %v3703_v2 = vld [vmem:[%s5824_s5 + $0x38] sm:$0xff]   ;;  %3503 = vmatprep.subr.bf16.mxu1 %v3702_v0  ;;  %v3705_v4 = vld [vmem:[%s5824_s5 + $0x30] sm:$0xff]   ;;  %v3707_v6 = vld [vmem:[%s5824_s5 + $0x28] sm:$0xff]  }
   0x3   :  { %3504 = vmatpush3.bf16.msra.mxu1 %v3703_v2  ;;  %v3708_v7 = vld [vmem:[%s5824_s5 + $0x60] sm:$0xff]   ;;  %v3710_v9 = vld [vmem:[%s5824_s5 + $0x58] sm:$0xff]   ;;  %v3712_v11 = vld [vmem:[%s5824_s5 + $0x50] sm:$0xff]  }
   0x4   :  { %3505 = vmatprep.subr.bf16.mxu1 %v3704_v3  ;;  %v3709_v8 = vld [vmem:[%s5824_s5 + $0x20] sm:$0xff]   ;;  %v3711_v10 = vld [vmem:[%s5824_s5 + $0x18] sm:$0xff]   ;;  %v3713_v14 = vld [vmem:[%s5824_s5 + $0x10] sm:$0xff]  }
   0x5   :  { %v48_v12 = vld [vmem:[%s5825_s0] sm:$0xff]  ;;  %v3714_v16 = vld [vmem:[%s5824_s5 + $0x48] sm:$0xff]   ;;  %v3720_v17 = vld [vmem:[%s5824_s5 + $0x178] sm:$0xff]  }
   0x6   :  { %v52_v13 = vld [vmem:[%s5825_s0 + $0x20] sm:$0xff]  ;;  %v3721_v18 = vld [vmem:[%s5824_s5 + $0x138] sm:$0xff]   ;;  %3583 = vmatprep.subr.bf16.mxu0 %v3720_v17  ;;  %v3715_v19 = vld [vmem:[%s5824_s5 + $0x8] sm:$0xff]  }
   0x7   :  { %3506 = vmatpush3.bf16.msra.mxu1 %v3705_v4  ;;  %v3275_v15 = vcombine.high %v48_v12, %v52_v13  ;;  %3584 = vmatpush3.bf16.msra.mxu0 %v3721_v18  ;;  %v3724_v20 = vld [vmem:[%s5824_s5 + $0x170] sm:$0xff]   ;;  %v3716_v21 = vld [vmem:[%s5824_s5 + $0x40] sm:$0xff]   ;;  %v3718_v24 = vld [vmem:[%s5824_s5 + $0xf8] sm:$0xff]   ;;  %v3274_v29 = vcombine.low %v48_v12, %v52_v13 }
   0x8   :  { %3507 = vmatprep.subr.bf16.mxu1 %v3706_v5  ;;  %v3717_v22 = vld [vmem:[%s5824_s5] sm:$0xff]   ;;  %3585 = vmatprep.subr.bf16.mxu0 %v3724_v20  ;;  %v3725_v23 = vld [vmem:[%s5824_s5 + $0x130] sm:$0xff]   ;;  %v3728_v27 = vld [vmem:[%s5824_s5 + $0x168] sm:$0xff]  }
   0x9   :  { %807 = vmatprep.mubr.bf16.mxu1 %v3275_v15  ;;  %v56_v25 = vld [vmem:[%s5825_s0 + $0x40] sm:$0xff]  ;;  %v3729_v28 = vld [vmem:[%s5824_s5 + $0x128] sm:$0xff]   ;;  %v3719_v30 = vld [vmem:[%s5824_s5 + $0xb8] sm:$0xff]  }
   0xa   :  { %v60_v26 = vld [vmem:[%s5825_s0 + $0x60] sm:$0xff]  ;;  %v3722_v32 = vld [vmem:[%s5824_s5 + $0xf0] sm:$0xff]   ;;  %v3726_v36 = vld [vmem:[%s5824_s5 + $0xe8] sm:$0xff]  }
   0xb   :  { %3508 = vmatpush3.bf16.msra.mxu1 %v3707_v6  ;;  %3586 = vmatpush3.bf16.msra.mxu0 %v3725_v23  ;;  %v3283_v31 = vcombine.high %v56_v25, %v60_v26  ;;  %v3732_v33 = vld [vmem:[%s5824_s5 + $0x160] sm:$0xff]   ;;  %v3723_v34 = vld [vmem:[%s5824_s5 + $0xb0] sm:$0xff]   ;;  %v3736_v39 = vld [vmem:[%s5824_s5 + $0x158] sm:$0xff]   ;;  %v3282_v41 = vcombine.low %v56_v25, %v60_v26 }
   0xc   :  { %3509 = vmatprep.subr.bf16.mxu1 %v3708_v7  ;;  %3587 = vmatprep.subr.bf16.mxu0 %v3728_v27  ;;  %v3733_v35 = vld [vmem:[%s5824_s5 + $0x120] sm:$0xff]   ;;  %v3737_v40 = vld [vmem:[%s5824_s5 + $0x118] sm:$0xff]   ;;  %v3727_v42 = vld [vmem:[%s5824_s5 + $0xa8] sm:$0xff]  }
   0xd   :  { %v64_v37 = vld [vmem:[%s5825_s0 + $0x80] sm:$0xff]  ;;  %v3740_v45 = vld [vmem:[%s5824_s5 + $0x150] sm:$0xff]   ;;  %v3734_v47 = vld [vmem:[%s5824_s5 + $0xd8] sm:$0xff]  }
   0xe   :  { %v68_v38 = vld [vmem:[%s5825_s0 + $0xa0] sm:$0xff]  ;;  %v3741_v48 = vld [vmem:[%s5824_s5 + $0x110] sm:$0xff]   ;;  %v3744_v51 = vld [vmem:[%s5824_s5 + $0x148] sm:$0xff]  }
   0xf   :  { %3510 = vmatpush3.bf16.msra.mxu1 %v3709_v8  ;;  %3588 = vmatpush3.bf16.msra.mxu0 %v3729_v28  ;;  %v3730_v43 = vld [vmem:[%s5824_s5 + $0xe0] sm:$0xff]   ;;  %v3291_v44 = vcombine.high %v64_v37, %v68_v38  ;;  %v3290_v52 = vcombine.low %v64_v37, %v68_v38  ;;  %v3745_v53 = vld [vmem:[%s5824_s5 + $0x108] sm:$0xff]   ;;  %v3735_v54 = vld [vmem:[%s5824_s5 + $0x98] sm:$0xff]  }
  0x10   :  { %3511 = vmatprep.subr.bf16.mxu1 %v3710_v9  ;;  %3589 = vmatprep.subr.bf16.mxu0 %v3732_v33  ;;  %v3731_v46 = vld [vmem:[%s5824_s5 + $0xa0] sm:$0xff]   ;;  %v3738_v56 = vld [vmem:[%s5824_s5 + $0xd0] sm:$0xff]   ;;  %v3742_v59 = vld [vmem:[%s5824_s5 + $0xc8] sm:$0xff]  }
  0x11   :  { %v72_v49 = vld [vmem:[%s5825_s0 + $0xc0] sm:$0xff]  ;;  %v3739_v57 = vld [vmem:[%s5824_s5 + $0x90] sm:$0xff]   ;;  %v49_v60 = vld [vmem:[%s5825_s0 + $0x8] sm:$0xff] }
  0x12   :  { %v76_v50 = vld [vmem:[%s5825_s0 + $0xe0] sm:$0xff]  ;;  %v53_v62 = vld [vmem:[%s5825_s0 + $0x28] sm:$0xff]  ;;  %v50_v63 = vld [vmem:[%s5825_s0 + $0x10] sm:$0xff] }
  0x13   :  { %3512 = vmatpush3.bf16.msra.mxu1 %v3711_v10  ;;  %3590 = vmatpush3.bf16.msra.mxu0 %v3733_v35  ;;  %v3299_v55 = vcombine.high %v72_v49, %v76_v50  ;;  %v3748_v58 = vld [vmem:[%s5824_s5 + $0x140] sm:$0xff]   ;;  %v54_v0 = vld [vmem:[%s5825_s0 + $0x30] sm:$0xff]  ;;  %v3298_v4 = vcombine.low %v72_v49, %v76_v50  ;;  %v3743_v5 = vld [vmem:[%s5824_s5 + $0x88] sm:$0xff]   ;;  %v3277_v6 = vcombine.high %v49_v60, %v53_v62 }
  0x14   :  { %3513 = vmatprep.subr.bf16.mxu1 %v3712_v11  ;;  %3591 = vmatprep.subr.bf16.mxu0 %v3736_v39  ;;  %v3749_v61 = vld [vmem:[%s5824_s5 + $0x100] sm:$0xff]   ;;  %v3278_v2 = vcombine.low %v50_v63, %v54_v0  ;;  %v3279_v3 = vcombine.high %v50_v63, %v54_v0  ;;  %v58_v9 = vld [vmem:[%s5825_s0 + $0x50] sm:$0xff]  ;;  %v3750_v10 = vld [vmem:[%s5824_s5 + $0x1f8] sm:$0xff]  }
  0x15   :  { %v3746_v7 = vld [vmem:[%s5824_s5 + $0xc0] sm:$0xff]   ;;  %v62_v11 = vld [vmem:[%s5825_s0 + $0x70] sm:$0xff]  ;;  %v57_v12 = vld [vmem:[%s5825_s0 + $0x48] sm:$0xff] }
  0x16   :  { %937 = vmatprep.mubr.bf16.mxu0 %v3279_v3  ;;  %v3747_v8 = vld [vmem:[%s5824_s5 + $0x80] sm:$0xff]   ;;  %v3287_v13 = vcombine.high %v58_v9, %v62_v11  ;;  %v3286_v15 = vcombine.low %v58_v9, %v62_v11  ;;  %v3751_v17 = vld [vmem:[%s5824_s5 + $0x1b8] sm:$0xff]   ;;  %v70_v20 = vld [vmem:[%s5825_s0 + $0xb0] sm:$0xff] }
  0x17   :  { %3514 = vmatpush3.bf16.msra.mxu1 %v3713_v14  ;;  %3592 = vmatpush3.bf16.msra.mxu0 %v3737_v40  ;;  %v61_v14 = vld [vmem:[%s5825_s0 + $0x68] sm:$0xff]  ;;  %v3753_v23 = vld [vmem:[%s5824_s5 + $0x1b0] sm:$0xff]   ;;  %v88_v35 = vld [vmem:[%s5826_s2] sm:$0xff] }
  0x18   :  { %3515 = vmatprep.subr.bf16.mxu1 %v3714_v16  ;;  %3593 = vmatprep.subr.bf16.mxu0 %v3740_v45  ;;  %v3276_v16 = vcombine.low %v49_v60, %v53_v62  ;;  %v3285_v18 = vcombine.high %v57_v12, %v61_v14  ;;  %v65_v25 = vld [vmem:[%s5825_s0 + $0x88] sm:$0xff]  ;;  %v74_v28 = vld [vmem:[%s5825_s0 + $0xd0] sm:$0xff]  ;;  %v3758_v37 = vld [vmem:[%s5824_s5 + $0x1d8] sm:$0xff]  }
  0x19   :  { %v69_v26 = vld [vmem:[%s5825_s0 + $0xa8] sm:$0xff]  ;;  %1869 = vperm.xlu0 %3700, %v88_v35   ;;  %v3760_v45 = vld [vmem:[%s5824_s5 + $0x1d0] sm:$0xff]   ;;  %v51_v49 = vld [vmem:[%s5825_s0 + $0x18] sm:$0xff] }
  0x1a   :  { %v3293_v33 = vcombine.high %v65_v25, %v69_v26  ;;  %v73_v38 = vld [vmem:[%s5825_s0 + $0xc8] sm:$0xff]  ;;  %v55_v50 = vld [vmem:[%s5825_s0 + $0x38] sm:$0xff] }
  0x1b   :  { %3516 = vmatpush3.bf16.msra.mxu1 %v3715_v19  ;;  %3594 = vmatpush3.bf16.msra.mxu0 %v3741_v48  ;;  %v66_v19 = vld [vmem:[%s5825_s0 + $0x90] sm:$0xff]  ;;  %v77_v39 = vld [vmem:[%s5825_s0 + $0xe8] sm:$0xff]  ;;  %v71_v62 = vld [vmem:[%s5825_s0 + $0xb8] sm:$0xff] }
  0x1c   :  { %3517 = vmatprep.subr.bf16.mxu1 %v3716_v21  ;;  %3595 = vmatprep.subr.bf16.mxu0 %v3744_v51  ;;  %v3752_v21 = vld [vmem:[%s5824_s5 + $0x1f0] sm:$0xff]   ;;  %v3294_v27 = vcombine.low %v66_v19, %v70_v20  ;;  %v3762_v48 = vld [vmem:[%s5824_s5 + $0x1c8] sm:$0xff]   ;;  %v3300_v51 = vcombine.low %v73_v38, %v77_v39  ;;  %v75_v3 = vld [vmem:[%s5825_s0 + $0xd8] sm:$0xff] }
  0x1d   :  { %v3772_v11 = vld [vmem:[%s5827_s8 + $0xe8] ss:$16 sps:$4 sm:$0xff]   ;;  %v3810_v35 = vld [vmem:[%s5827_s8 + $0x2c] ss:$16 sps:$4 sm:$0xff]  }
  0x1f   :  { %3518 = vmatpush3.bf16.msra.mxu1 %v3717_v22  ;;  %3596 = vmatpush3.bf16.msra.mxu0 %v3745_v53  ;;  %v3295_v22 = vcombine.high %v66_v19, %v70_v20  ;;  %v3763_v53 = vld [vmem:[%s5824_s5 + $0x188] sm:$0xff]  }
  0x20   :  { %3543 = vmatprep.subr.bf16.mxu1 %v3718_v24  ;;  %3597 = vmatprep.subr.bf16.mxu0 %v3748_v58  ;;  %v3754_v24 = vld [vmem:[%s5824_s5 + $0x1e8] sm:$0xff]   ;;  %v63_v58 = vld [vmem:[%s5825_s0 + $0x78] sm:$0xff] }
  0x21   :  { %v3786_v19 = vld [vmem:[%s5827_s8 + $0xac] ss:$16 sps:$4 sm:$0xff]   ;;  %v3784_v20 = vld [vmem:[%s5827_s8 + $0xa8] ss:$16 sps:$4 sm:$0xff]  }
  0x22   :  { %808 = vmatmul.mubr.bf16.vlgmr.msra.gmra.mxu1 %v3274_v29  ;;  %v78_v29 = vld [vmem:[%s5825_s0 + $0xf0] sm:$0xff] }
  0x23   :  { %3544 = vmatpush3.bf16.msra.mxu1 %v3719_v30  ;;  %815 = vmatprep.mubr.bf16.mxu1 %v3283_v31  ;;  %v3303_v30 = vcombine.high %v74_v28, %v78_v29  ;;  %v3284_v31 = vcombine.low %v57_v12, %v61_v14  ;;  %v3302_v40 = vcombine.low %v74_v28, %v78_v29  ;;  %v3777_v12 = vld [vmem:[%s5827_s8 + $0xa4] ss:$16 sps:$4 sm:$0xff]   ;;  %v3780_v14 = vld [vmem:[%s5827_s8 + $0xcc] ss:$16 sps:$4 sm:$0xff]   ;;  %v3796_v28 = vld [vmem:[%s5827_s8 + $0x68] ss:$16 sps:$4 sm:$0xff]  }
  0x24   :  { %3545 = vmatprep.subr.bf16.mxu1 %v3722_v32  ;;  %3598 = vmatpush3.bf16.msra.mxu0 %v3749_v61  ;;  %v3755_v32 = vld [vmem:[%s5824_s5 + $0x1a8] sm:$0xff]   ;;  %v67_v61 = vld [vmem:[%s5825_s0 + $0x98] sm:$0xff]  ;;  %v3801_v29 = vld [vmem:[%s5827_s8 + $0x24] ss:$16 sps:$4 sm:$0xff]  }
  0x25   :  { %v3297_v0 = vcombine.high %v67_v61, %v71_v62 }
  0x27   :  { %3546 = vmatpush3.bf16.msra.mxu1 %v3723_v34  ;;  %938 = vmatmul.mubr.bf16.vlgmr.msra.gmra.mxu0 %v3278_v2  ;;  %v3756_v34 = vld [vmem:[%s5824_s5 + $0x1e0] sm:$0xff]  }
  0x28   :  { %3547 = vmatprep.subr.bf16.mxu1 %v3726_v36  ;;  %945 = vmatprep.mubr.bf16.mxu0 %v3287_v13  ;;  %v3757_v36 = vld [vmem:[%s5824_s5 + $0x1a0] sm:$0xff]  }
  0x29   :  { %v3768_v2 = vld [vmem:[%s5827_s8 + $0xe4] ss:$16 sps:$4 sm:$0xff]   ;;  %v3775_v13 = vld [vmem:[%s5827_s8 + $0xa0] ss:$16 sps:$4 sm:$0xff]  }
  0x2a   :  { %816 = vmatmul.mubr.bf16.gmra.mxu1 %v3282_v41  ;;  %v3292_v41 = vcombine.low %v65_v25, %v69_v26  ;;  %1295 = vmatprep.subr.bf16.mxu0 %v3768_v2  ;;  %v3795_v25 = vld [vmem:[%s5827_s8 + $0x44] ss:$16 sps:$4 sm:$0xff]   ;;  %v3793_v26 = vld [vmem:[%s5827_s8 + $0x40] ss:$16 sps:$4 sm:$0xff]  }
  0x2b   :  { %3548 = vmatpush3.bf16.msra.mxu1 %v3727_v42  ;;  %823 = vmatprep.mubr.bf16.mxu1 %v3291_v44  ;;  %v89_v42 = vld [vmem:[%s5826_s2 + $0x8] sm:$0xff]  ;;  %v3301_v44 = vcombine.high %v73_v38, %v77_v39  ;;  %v3848_v2 = vld [vmem:[%s5829_s7 + $0x40] ss:$16 sps:$4 sm:$0xff]  }
  0x2c   :  { %3549 = vmatprep.subr.bf16.mxu1 %v3730_v43  ;;  %v3759_v43 = vld [vmem:[%s5824_s5 + $0x198] sm:$0xff]   ;;  %2152 = vperm.xlu0 %3700, %v89_v42  }
  0x2d   :  { %v3814_v38 = vld [vmem:[%s5827_s8 + $0xc] ss:$16 sps:$4 sm:$0xff]   ;;  %v3812_v39 = vld [vmem:[%s5827_s8 + $0x8] ss:$16 sps:$4 sm:$0xff]  }
  0x2e   :  { %v3818_v42 = vld [vmem:[%s5829_s7 + $0xe8] ss:$16 sps:$4 sm:$0xff]  }
  0x2f   :  { %3550 = vmatpush3.bf16.msra.mxu1 %v3731_v46  ;;  %946 = vmatmul.mubr.bf16.gmra.mxu0 %v3286_v15  ;;  %v92_v46 = vld [vmem:[%s5826_s2 + $0x20] sm:$0xff]  ;;  %v3778_v15 = vld [vmem:[%s5827_s8 + $0xc8] ss:$16 sps:$4 sm:$0xff]  }
  0x30   :  { %3551 = vmatprep.subr.bf16.mxu1 %v3734_v47  ;;  %953 = vmatprep.mubr.bf16.mxu0 %v3295_v22  ;;  %v3761_v47 = vld [vmem:[%s5824_s5 + $0x190] sm:$0xff]  }
  0x31   :  { %2521 = vperm.xlu0 %3700, %v92_v46   ;;  %v3787_v22 = vld [vmem:[%s5827_s8 + $0x60] ss:$16 sps:$4 sm:$0xff]   ;;  %v3827_v46 = vld [vmem:[%s5829_s7 + $0xcc] ss:$16 sps:$4 sm:$0xff]  }
  0x32   :  { %824 = vmatmul.mubr.bf16.gmra.mxu1 %v3290_v52  ;;  %v94_v52 = vld [vmem:[%s5826_s2 + $0x30] sm:$0xff] }
  0x33   :  { %3552 = vmatpush3.bf16.msra.mxu1 %v3735_v54  ;;  %831 = vmatprep.mubr.bf16.mxu1 %v3299_v55  ;;  %v3281_v54 = vcombine.high %v51_v49, %v55_v50  ;;  %v3764_v55 = vld [vmem:[%s5824_s5 + $0x1c0] sm:$0xff]  }
  0x34   :  { %3553 = vmatprep.subr.bf16.mxu1 %v3738_v56  ;;  %v3765_v56 = vld [vmem:[%s5824_s5 + $0x180] sm:$0xff]  }
  0x35   :  { %2767 = vperm.xlu0 %3700, %v94_v52   ;;  %v3831_v52 = vld [vmem:[%s5829_s7 + $0xa8] ss:$16 sps:$4 sm:$0xff]  }
  0x37   :  { %3554 = vmatpush3.bf16.msra.mxu1 %v3739_v57  ;;  %954 = vmatmul.mubr.bf16.gmra.mxu0 %v3294_v27  ;;  %v59_v57 = vld [vmem:[%s5825_s0 + $0x58] sm:$0xff] }
  0x38   :  { %3555 = vmatprep.subr.bf16.mxu1 %v3742_v59  ;;  %961 = vmatprep.mubr.bf16.mxu0 %v3303_v30  ;;  %v3280_v59 = vcombine.low %v51_v49, %v55_v50  ;;  %v3289_v60 = vcombine.high %v59_v57, %v63_v58  ;;  %v3288_v63 = vcombine.low %v59_v57, %v63_v58  ;;  %v3798_v27 = vld [vmem:[%s5827_s8 + $0x6c] ss:$16 sps:$4 sm:$0xff]   ;;  %v3799_v30 = vld [vmem:[%s5827_s8 + $0x20] ss:$16 sps:$4 sm:$0xff]   ;;  %v3830_v49 = vld [vmem:[%s5829_s7 + $0xa4] ss:$16 sps:$4 sm:$0xff]  }
  0x39   :  { %v3833_v50 = vld [vmem:[%s5829_s7 + $0xac] ss:$16 sps:$4 sm:$0xff]   ;;  %v3838_v57 = vld [vmem:[%s5829_s7 + $0x88] ss:$16 sps:$4 sm:$0xff]   ;;  %v3843_v58 = vld [vmem:[%s5829_s7 + $0x64] ss:$16 sps:$4 sm:$0xff]  }
  0x3a   :  { %832 = vmatmul.mubr.bf16.gmra.mxu1 %v3298_v4  ;;  %v79_v4 = vld [vmem:[%s5825_s0 + $0xf8] sm:$0xff] }
  0x3b   :  { %3556 = vmatpush3.bf16.msra.mxu1 %v3743_v5  ;;  %872 = vmatprep.mubr.bf16.mxu1 %v3277_v6  ;;  %v3766_v5 = vld [vmem:[%s5827_s8 + $0xe0] ss:$16 sps:$4 sm:$0xff]   ;;  %v3771_v6 = vld [vmem:[%s5827_s8 + $0xc4] ss:$16 sps:$4 sm:$0xff]   ;;  %v3305_v9 = vcombine.high %v75_v3, %v79_v4 }
  0x3c   :  { %3557 = vmatprep.subr.bf16.mxu1 %v3746_v7  ;;  %1296 = vmatpush1.bf16.msra.mxu0 %v3766_v5  ;;  %v3296_v7 = vcombine.low %v67_v61, %v71_v62  ;;  %v3844_v61 = vld [vmem:[%s5829_s7 + $0x68] ss:$16 sps:$4 sm:$0xff]   ;;  %v3859_v5 = vld [vmem:[%s5829_s7 + $0x2c] ss:$16 sps:$4 sm:$0xff]  }
  0x3d   :  { %1297 = vmatprep.subr.bf16.mxu0 %v3771_v6  ;;  %v3847_v62 = vld [vmem:[%s5828_s1 + $0x18] sm:$0xff]   ;;  %v3854_v6 = vld [vmem:[%s5829_s7 + $0x20] ss:$16 sps:$4 sm:$0xff]  }
  0x3f   :  { %3558 = vmatpush3.bf16.msra.mxu1 %v3747_v8  ;;  %962 = vmatmul.mubr.bf16.gmra.mxu0 %v3302_v40  ;;  %v3769_v8 = vld [vmem:[%s5827_s8 + $0xc0] ss:$16 sps:$4 sm:$0xff]   ;;  %v3817_v40 = vld [vmem:[%s5829_s7 + $0xe4] ss:$16 sps:$4 sm:$0xff]  }
  0x40   :  { %3623 = vmatprep.subr.bf16.mxu1 %v3750_v10  ;;  %1327 = vmatprep.mubr.bf16.mxu0 %v5840_v1  ;;  %v3774_v10 = vld [vmem:[%s5827_s8 + $0xec] ss:$16 sps:$4 sm:$0xff]  }
  0x41   :  { %1298 = vmatpush1.bf16.msra.mxu0 %v3769_v8  ;;  %v3862_v8 = vld [vmem:[%s5829_s7 + $0x4] ss:$16 sps:$4 sm:$0xff]  }
  0x42   :  { %873 = vmatmul.mubr.bf16.vlgmr.msra.gmra.mxu1 %v3276_v16  ;;  %1299 = vmatprep.subr.bf16.mxu0 %v3777_v12  ;;  %v3783_v16 = vld [vmem:[%s5827_s8 + $0x84] ss:$16 sps:$4 sm:$0xff]  }
  0x43   :  { %3624 = vmatpush3.bf16.msra.mxu1 %v3751_v17  ;;  %880 = vmatprep.mubr.bf16.mxu1 %v3285_v18  ;;  %v3304_v17 = vcombine.low %v75_v3, %v79_v4  ;;  %v3781_v18 = vld [vmem:[%s5827_s8 + $0x80] ss:$16 sps:$4 sm:$0xff]   ;;  %v3851_v3 = vld [vmem:[%s5829_s7 + $0x48] ss:$16 sps:$4 sm:$0xff]   ;;  %v3856_v4 = vld [vmem:[%s5829_s7 + $0x24] ss:$16 sps:$4 sm:$0xff]  }
  0x44   :  { %3625 = vmatprep.subr.bf16.mxu1 %v3752_v21  ;;  %v3789_v21 = vld [vmem:[%s5827_s8 + $0x64] ss:$16 sps:$4 sm:$0xff]  }
  0x45   :  { %1300 = vmatpush1.bf16.msra.mxu0 %v3775_v13  ;;  %v4714_v12 = vld [vmem:[%s5830_s9 + $0xe4] ss:$16 sps:$4 sm:$0xff]   ;;  %v4719_v13 = vld [vmem:[%s5830_s9 + $0xec] ss:$16 sps:$4 sm:$0xff]  }
  0x46   :  { %1301 = vmatprep.subr.bf16.mxu0 %v3783_v16 }
  0x47   :  { %3626 = vmatpush3.bf16.msra.mxu1 %v3753_v23  ;;  %v3792_v23 = vld [vmem:[%s5827_s8 + $0x8c] ss:$16 sps:$4 sm:$0xff]  }
  0x48   :  { %3627 = vmatprep.subr.bf16.mxu1 %v3754_v24  ;;  %v3790_v24 = vld [vmem:[%s5827_s8 + $0x88] ss:$16 sps:$4 sm:$0xff]  }
  0x49   :  { %1302 = vmatpush1.bf16.msra.mxu0 %v3781_v18 }
  0x4a   :  { %881 = vmatmul.mubr.bf16.gmra.mxu1 %v3284_v31  ;;  %1303 = vmatprep.subr.bf16.mxu0 %v3789_v21  ;;  %v3804_v31 = vld [vmem:[%s5827_s8 + $0x4c] ss:$16 sps:$4 sm:$0xff]  }
  0x4b   :  { %3628 = vmatpush3.bf16.msra.mxu1 %v3755_v32  ;;  %888 = vmatprep.mubr.bf16.mxu1 %v3293_v33  ;;  %v3802_v32 = vld [vmem:[%s5827_s8 + $0x48] ss:$16 sps:$4 sm:$0xff]   ;;  %v3807_v33 = vld [vmem:[%s5827_s8 + $0x4] ss:$16 sps:$4 sm:$0xff]  }
  0x4c   :  { %3629 = vmatprep.subr.bf16.mxu1 %v3756_v34  ;;  %v3805_v34 = vld [vmem:[%s5827_s8] ss:$16 sps:$4 sm:$0xff]  }
  0x4d   :  { %1304 = vmatpush1.bf16.msra.mxu0 %v3787_v22 }
  0x4e   :  { %1305 = vmatprep.subr.bf16.mxu0 %v3795_v25 }
  0x4f   :  { %3630 = vmatpush3.bf16.msra.mxu1 %v3757_v36  ;;  %v3808_v36 = vld [vmem:[%s5827_s8 + $0x28] ss:$16 sps:$4 sm:$0xff]  }
  0x50   :  { %3631 = vmatprep.subr.bf16.mxu1 %v3758_v37  ;;  %v3811_v37 = vld [vmem:[%s5828_s1] sm:$0xff]  }
  0x51   :  { %1306 = vmatpush1.bf16.msra.mxu0 %v3793_v26 }
  0x52   :  { %889 = vmatmul.mubr.bf16.gmra.mxu1 %v3292_v41  ;;  %1307 = vmatprep.subr.bf16.mxu0 %v3801_v29  ;;  %v3815_v41 = vld [vmem:[%s5829_s7 + $0xe0] ss:$16 sps:$4 sm:$0xff]  }
  0x53   :  { %3632 = vmatpush3.bf16.msra.mxu1 %v3759_v43  ;;  %896 = vmatprep.mubr.bf16.mxu1 %v3301_v44  ;;  %v3820_v43 = vld [vmem:[%s5829_s7 + $0xec] ss:$16 sps:$4 sm:$0xff]  }
  0x54   :  { %3633 = vmatprep.subr.bf16.mxu1 %v3760_v45  ;;  %v3821_v44 = vld [vmem:[%s5828_s1 + $0x8] sm:$0xff]   ;;  %v3824_v45 = vld [vmem:[%s5829_s7 + $0xc4] ss:$16 sps:$4 sm:$0xff]  }
  0x55   :  { %1308 = vmatpush1.bf16.msra.mxu0 %v3799_v30 }
  0x56   :  { %1309 = vmatprep.subr.bf16.mxu0 %v3807_v33 }
  0x57   :  { %3634 = vmatpush3.bf16.msra.mxu1 %v3761_v47  ;;  %v3822_v47 = vld [vmem:[%s5829_s7 + $0xc0] ss:$16 sps:$4 sm:$0xff]  }
  0x58   :  { %3635 = vmatprep.subr.bf16.mxu1 %v3762_v48  ;;  %v3825_v48 = vld [vmem:[%s5829_s7 + $0xc8] ss:$16 sps:$4 sm:$0xff]  }
  0x59   :  { %1310 = vmatpush1.bf16.msra.mxu0 %v3805_v34 }
  0x5a   :  { %897 = vmatmul.mubr.bf16.gmra.mxu1 %v3300_v51  ;;  %1601 = vmatprep.subr.bf16.mxu0 %v3817_v40  ;;  %v3828_v51 = vld [vmem:[%s5829_s7 + $0xa0] ss:$16 sps:$4 sm:$0xff]  }
  0x5b   :  { %3636 = vmatpush3.bf16.msra.mxu1 %v3763_v53  ;;  %1002 = vmatprep.mubr.bf16.mxu1 %v3281_v54  ;;  %v3834_v53 = vld [vmem:[%s5828_s1 + $0x10] sm:$0xff]  }
  0x5c   :  { %3637 = vmatprep.subr.bf16.mxu1 %v3764_v55  ;;  %1328 = vmatmul.mubr.bf16.vlgmr.msra.gmra.mxu0 %v3811_v37  ;;  %v3837_v54 = vld [vmem:[%s5829_s7 + $0x84] ss:$16 sps:$4 sm:$0xff]   ;;  %v3840_v55 = vld [vmem:[%s5829_s7 + $0x8c] ss:$16 sps:$4 sm:$0xff]  }
  0x5d   :  { %1337 = vmatprep.mubr.bf16.mxu0 %v5840_v1  ;;  %1602 = vmatpush1.bf16.msra.mxu0 %v3815_v41 }
  0x5e   :  { %1603 = vmatprep.subr.bf16.mxu0 %v3824_v45 }
  0x5f   :  { %3638 = vmatpush3.bf16.msra.mxu1 %v3765_v56  ;;  %v3835_v56 = vld [vmem:[%s5829_s7 + $0x80] ss:$16 sps:$4 sm:$0xff]  }
  0x60   :  { %1368 = vmatprep.subr.bf16.mxu1 %v3774_v10  ;;  %v3860_v10 = vld [vmem:[%s5829_s7] ss:$16 sps:$4 sm:$0xff]  }
  0x61   :  { %1604 = vmatpush1.bf16.msra.mxu0 %v3822_v47 }
  0x62   :  { %1003 = vmatmul.mubr.bf16.vlgmr.msra.gmra.mxu1 %v3280_v59  ;;  %1605 = vmatprep.subr.bf16.mxu0 %v3830_v49  ;;  %v3846_v59 = vld [vmem:[%s5829_s7 + $0x6c] ss:$16 sps:$4 sm:$0xff]  }
  0x63   :  { %1010 = vmatprep.mubr.bf16.mxu1 %v3289_v60  ;;  %1369 = vmatpush1.bf16.msra.mxu1 %v3772_v11  ;;  %v3841_v60 = vld [vmem:[%s5829_s7 + $0x60] ss:$16 sps:$4 sm:$0xff]   ;;  %v3863_v11 = vld [vmem:[%s5829_s7 + $0x8] ss:$16 sps:$4 sm:$0xff]  }
  0x64   :  { %1370 = vmatprep.subr.bf16.mxu1 %v3780_v14  ;;  %1338 = vmatmul.mubr.bf16.gmra.mxu0 %v3821_v44 }
  0x65   :  { %1347 = vmatprep.mubr.bf16.mxu0 %v5840_v1  ;;  %1606 = vmatpush1.bf16.msra.mxu0 %v3828_v51 }
  0x66   :  { %1607 = vmatprep.subr.bf16.mxu0 %v3837_v54  ;;  %v4748_v54 = vld [vmem:[%s5831_s6] ss:$0 sm:$0xff] }
  0x67   :  { %1371 = vmatpush1.bf16.msra.mxu1 %v3778_v15 }
  0x68   :  { %1372 = vmatprep.subr.bf16.mxu1 %v3786_v19 }
  0x69   :  { %1608 = vmatpush1.bf16.msra.mxu0 %v3835_v56 }
  0x6a   :  { %1011 = vmatmul.mubr.bf16.gmra.mxu1 %v3288_v63  ;;  %1609 = vmatprep.subr.bf16.mxu0 %v3843_v58  ;;  %v3850_v63 = vld [vmem:[%s5829_s7 + $0x44] ss:$16 sps:$4 sm:$0xff]  }
  0x6b   :  { %1018 = vmatprep.mubr.bf16.mxu1 %v3297_v0  ;;  %1373 = vmatpush1.bf16.msra.mxu1 %v3784_v20  ;;  %v3853_v0 = vld [vmem:[%s5829_s7 + $0x4c] ss:$16 sps:$4 sm:$0xff]  }
  0x6c   :  { %1374 = vmatprep.subr.bf16.mxu1 %v3792_v23  ;;  %1348 = vmatmul.mubr.bf16.gmra.mxu0 %v3834_v53 }
  0x6d   :  { %1357 = vmatprep.mubr.bf16.mxu0 %v5840_v1  ;;  %1610 = vmatpush1.bf16.msra.mxu0 %v3841_v60 }
  0x6e   :  { %1611 = vmatprep.subr.bf16.mxu0 %v3850_v63 }
  0x6f   :  { %1375 = vmatpush1.bf16.msra.mxu1 %v3790_v24 }
  0x70   :  { %1376 = vmatprep.subr.bf16.mxu1 %v3798_v27 }
  0x71   :  { %1612 = vmatpush1.bf16.msra.mxu0 %v3848_v2 }
  0x72   :  { %1019 = vmatmul.mubr.bf16.gmra.mxu1 %v3296_v7  ;;  %v3857_v7 = vld [vmem:[%s5829_s7 + $0x28] ss:$16 sps:$4 sm:$0xff]   ;;  %1613 = vmatprep.subr.bf16.mxu0 %v3856_v4 }
  0x73   :  { %1026 = vmatprep.mubr.bf16.mxu1 %v3305_v9  ;;  %1377 = vmatpush1.bf16.msra.mxu1 %v3796_v28  ;;  %v3865_v9 = vld [vmem:[%s5829_s7 + $0xc] ss:$16 sps:$4 sm:$0xff]  }
  0x74   :  { %1378 = vmatprep.subr.bf16.mxu1 %v3804_v31  ;;  %1358 = vmatmul.mubr.bf16.gmra.mxu0 %v3847_v62 }
  0x75   :  { %1633 = vmatprep.mubr.bf16.mxu0 %v5840_v1  ;;  %1614 = vmatpush1.bf16.msra.mxu0 %v3854_v6 }
  0x76   :  { %1615 = vmatprep.subr.bf16.mxu0 %v3862_v8 }
  0x77   :  { %1379 = vmatpush1.bf16.msra.mxu1 %v3802_v32 }
  0x78   :  { %1380 = vmatprep.subr.bf16.mxu1 %v3810_v35 }
  0x79   :  { %1616 = vmatpush1.bf16.msra.mxu0 %v3860_v10 }
  0x7a   :  { %1027 = vmatmul.mubr.bf16.gmra.mxu1 %v3304_v17  ;;  %2039 = vmatprep.subr.bf16.mxu0 %v4714_v12 }
  0x7b   :  { %1400 = vmatprep.mubr.bf16.mxu1 %v5840_v1  ;;  %1381 = vmatpush1.bf16.msra.mxu1 %v3808_v36 }
  0x7c   :  { %1382 = vmatprep.subr.bf16.mxu1 %v3814_v38 }
  0x7f   :  { %1383 = vmatpush1.bf16.msra.mxu1 %v3812_v39 }
  0x80   :  { %1674 = vmatprep.subr.bf16.mxu1 %v3820_v43 }
  0x82   :  { %1401 = vmatmul.mubr.bf16.vlgmr.msra.gmra.mxu1 %v3811_v37 }
  0x83   :  { %1410 = vmatprep.mubr.bf16.mxu1 %v5840_v1  ;;  %1675 = vmatpush1.bf16.msra.mxu1 %v3818_v42 }
  0x84   :  { %1676 = vmatprep.subr.bf16.mxu1 %v3827_v46 }
  0x87   :  { %1677 = vmatpush1.bf16.msra.mxu1 %v3825_v48 }
  0x88   :  { %1678 = vmatprep.subr.bf16.mxu1 %v3833_v50 }
  0x8a   :  { %1411 = vmatmul.mubr.bf16.gmra.mxu1 %v3821_v44 }
  0x8b   :  { %1420 = vmatprep.mubr.bf16.mxu1 %v5840_v1  ;;  %1679 = vmatpush1.bf16.msra.mxu1 %v3831_v52 }
  0x8c   :  { %1680 = vmatprep.subr.bf16.mxu1 %v3840_v55 }
  0x8f   :  { %1681 = vmatpush1.bf16.msra.mxu1 %v3838_v57 }
  0x90   :  { %1682 = vmatprep.subr.bf16.mxu1 %v3846_v59 }
  0x92   :  { %1421 = vmatmul.mubr.bf16.gmra.mxu1 %v3834_v53 }
  0x93   :  { %1430 = vmatprep.mubr.bf16.mxu1 %v5840_v1  ;;  %1683 = vmatpush1.bf16.msra.mxu1 %v3844_v61 }
  0x94   :  { %1684 = vmatprep.subr.bf16.mxu1 %v3853_v0 }
  0x97   :  { %1685 = vmatpush1.bf16.msra.mxu1 %v3851_v3 }
  0x98   :  { %1686 = vmatprep.subr.bf16.mxu1 %v3859_v5 }
  0x9a   :  { %1431 = vmatmul.mubr.bf16.gmra.mxu1 %v3847_v62 }
  0x9b   :  { %1706 = vmatprep.mubr.bf16.mxu1 %v5840_v1  ;;  %1687 = vmatpush1.bf16.msra.mxu1 %v3857_v7 }
  0x9c   :  { %1688 = vmatprep.subr.bf16.mxu1 %v3865_v9 }
  0x9f   :  { %1689 = vmatpush1.bf16.msra.mxu1 %v3863_v11 }
  0xa0   :  { %2080 = vmatprep.subr.bf16.mxu1 %v4719_v13 }
  0xe2   :  { %v3519_v14 = vpop.f32.mrf.mxu1 }
  0xe4   :  { %v3520_v15 = vpop.f32.mrf.mxu1 }
  0xe5   :  { %v3521_v52 = vadd.f32 %v3520_v15, %v3519_v14 }
  0xe6   :  { %v3522_v16 = vpop.f32.mrf.mxu1 }
  0xe7   :  { %v3599_v28 = vpop.f32.mrf.mxu0  ;;  %v810_v59 = vadd.f32 %v3521_v52, %v4748_v54 }
  0xe8   :  { %v3523_v17 = vpop.f32.mrf.mxu1 }
  0xe9   :  { %v3600_v31 = vpop.f32.mrf.mxu0  ;;  %v3524_v56 = vadd.f32 %v3523_v17, %v3522_v16 }
  0xea   :  { %v3525_v18 = vpop.f32.mrf.mxu1  ;;  %v3601_v2 = vadd.f32 %v3600_v31, %v3599_v28 }
  0xeb   :  { %v3602_v34 = vpop.f32.mrf.mxu0  ;;  %v813_v63 = vadd.f32 %v3524_v56, %v4748_v54 }
  0xec   :  { %v3526_v19 = vpop.f32.mrf.mxu1 }
  0xed   :  { %v3603_v37 = vpop.f32.mrf.mxu0  ;;  %v3527_v3 = vadd.f32 %v3526_v19, %v3525_v18 }
  0xee   :  { %v3528_v20 = vpop.f32.mrf.mxu1  ;;  %v3604_v6 = vadd.f32 %v3603_v37, %v3602_v34 }
  0xef   :  { %v3605_v40 = vpop.f32.mrf.mxu0  ;;  %v818_v15 = vadd.f32 %v3527_v3, %v4748_v54  ;;  %v4791_v3 = vld [vmem:[%s5830_s9 + $0xc0] ss:$16 sps:$4 sm:$0xff]  }
  0xf0   :  { %v3529_v21 = vpop.f32.mrf.mxu1 }
  0xf1   :  { %v3606_v43 = vpop.f32.mrf.mxu0  ;;  %v3530_v10 = vadd.f32 %v3529_v21, %v3528_v20 }
  0xf2   :  { %v4723_v22 = vpop.f32.mrf.mxu1  ;;  %v3607_v28 = vadd.f32 %v3606_v43, %v3605_v40  ;;  %v4767_v40 = vld [vmem:[%s5830_s9 + $0xe0] ss:$16 sps:$4 sm:$0xff]  }
  0xf3   :  { %v3608_v46 = vpop.f32.mrf.mxu0  ;;  %v821_v18 = vadd.f32 %v3530_v10, %v4748_v54 }
  0xf4   :  { %v4725_v23 = vpop.f32.mrf.mxu1 }
  0xf5   :  { %v3609_v49 = vpop.f32.mrf.mxu0  ;;  %v3533_v34 = vadd.f32 %v4725_v23, %v4723_v22  ;;  %v4772_v22 = vld [vmem:[%s5830_s9 + $0xe8] ss:$16 sps:$4 sm:$0xff]  }
  0xf6   :  { %v4727_v24 = vpop.f32.mrf.mxu1  ;;  %v3610_v20 = vadd.f32 %v3609_v49, %v3608_v46  ;;  %v4777_v49 = vld [vmem:[%s5830_s9 + $0xc4] ss:$16 sps:$4 sm:$0xff]  }
  0xf7   :  { %v4743_v53 = vpop.f32.mrf.mxu0 }
  0xf8   :  { %v4729_v25 = vpop.f32.mrf.mxu1 }
  0xf9   :  { %v3612_v61 = vpop.f32.mrf.mxu0 }
  0xfa   :  { %v4731_v26 = vpop.f32.mrf.mxu1 }
  0xfb   :  { %v3614_v7 = vpop.f32.mrf.mxu0 }
  0xfc   :  { %v4733_v27 = vpop.f32.mrf.mxu1 }
  0xfe   :  { %v4735_v29 = vpop.f32.mrf.mxu1 }
 0x100   :  { %v4737_v30 = vpop.f32.mrf.mxu1 }
 0x102   :  { %v3559_v32 = vpop.f32.mrf.mxu1 }
 0x104   :  { %v3560_v33 = vpop.f32.mrf.mxu1 }
 0x105   :  { %v3561_v57 = vadd.f32 %v3560_v33, %v3559_v32  ;;  %v3615_v33 = vpop.f32.mrf.mxu0 }
 0x106   :  { %v3562_v35 = vpop.f32.mrf.mxu1 }
 0x107   :  { %v875_v0 = vadd.f32 %v3561_v57, %v810_v59 }
 0x108   :  { %v3563_v36 = vpop.f32.mrf.mxu1 }
 0x109   :  { %v3564_v60 = vadd.f32 %v3563_v36, %v3562_v35  ;;  %v940_v11 = vadd.f32 %v3601_v2, %v875_v0 }
 0x10a   :  { %v3565_v38 = vpop.f32.mrf.mxu1 }
 0x10b   :  { %v878_v5 = vadd.f32 %v3564_v60, %v813_v63 }
 0x10c   :  { %v3566_v39 = vpop.f32.mrf.mxu1 }
 0x10d   :  { %v3567_v14 = vadd.f32 %v3566_v39, %v3565_v38  ;;  %v943_v17 = vadd.f32 %v3604_v6, %v878_v5  ;;  %v4760_v38 = vpop.f32.mrf.mxu0  ;;  %v4804_v6 = vld [vmem:[%s5830_s9 + $0xa4] ss:$16 sps:$4 sm:$0xff]  }
 0x10e   :  { %v3568_v41 = vpop.f32.mrf.mxu1 }
 0x10f   :  { %v883_v19 = vadd.f32 %v3567_v14, %v818_v15  ;;  %v3618_v63 = vpop.f32.mrf.mxu0 }
 0x110   :  { %v3569_v42 = vpop.f32.mrf.mxu1 }
 0x111   :  { %v3570_v32 = vadd.f32 %v3569_v42, %v3568_v41  ;;  %v3536_v42 = vadd.f32 %v4729_v25, %v4727_v24  ;;  %v948_v23 = vadd.f32 %v3607_v28, %v883_v19  ;;  %v4782_v24 = vld [vmem:[%s5830_s9 + $0xcc] ss:$16 sps:$4 sm:$0xff]   ;;  %v826_v25 = vadd.f32 %v3533_v34, %v4748_v54 }
 0x112   :  { %v3571_v44 = vpop.f32.mrf.mxu1 }
 0x113   :  { %v886_v37 = vadd.f32 %v3570_v32, %v821_v18 }
 0x114   :  { %v3572_v45 = vpop.f32.mrf.mxu1 }
 0x115   :  { %v3573_v43 = vadd.f32 %v3572_v45, %v3571_v44  ;;  %v829_v44 = vadd.f32 %v3536_v42, %v4748_v54 }
 0x116   :  { %v3574_v47 = vpop.f32.mrf.mxu1 }
 0x118   :  { %v3575_v48 = vpop.f32.mrf.mxu1 }
 0x119   :  { %v3576_v59 = vadd.f32 %v3575_v48, %v3574_v47  ;;  %v4796_v47 = vld [vmem:[%s5830_s9 + $0xc8] ss:$16 sps:$4 sm:$0xff]   ;;  %v891_v48 = vadd.f32 %v3573_v43, %v826_v25 }
 0x11a   :  { %v4739_v50 = vpop.f32.mrf.mxu1  ;;  %v4884_v25 = vld [vmem:[%s5830_s9 + $0x68] ss:$16 sps:$4 sm:$0xff]  }
 0x11b   :  { %v894_v10 = vadd.f32 %v3576_v59, %v829_v44  ;;  %5897 = vst [vmem:[#allocation13_spill] sm:$0xff] %v4884_v25 }
 0x11c   :  { %v4741_v51 = vpop.f32.mrf.mxu1 }
 0x11e   :  { %v4750_v55 = vpop.f32.mrf.mxu1 }
 0x120   :  { %v4752_v58 = vpop.f32.mrf.mxu1 }
 0x122   :  { %v3639_v62 = vpop.f32.mrf.mxu1 }
 0x124   :  { %v3640_v4 = vpop.f32.mrf.mxu1 }
 0x125   :  { %v3641_v8 = vadd.f32 %v3640_v4, %v3639_v62  ;;  %v951_v62 = vadd.f32 %v3610_v20, %v886_v37  ;;  %v3613_v4 = vadd.f32 %v3612_v61, %v4743_v53  ;;  %v3616_v53 = vadd.f32 %v3615_v33, %v3614_v7  ;;  %v4852_v20 = vld [vmem:[%s5830_s9 + $0x80] ss:$16 sps:$4 sm:$0xff]  }
 0x126   :  { %v3642_v9 = vpop.f32.mrf.mxu1  ;;  %v3579_v33 = vadd.f32 %v4741_v51, %v4739_v50  ;;  %v3582_v50 = vadd.f32 %v4752_v58, %v4750_v55  ;;  %5892 = vst [vmem:[#allocation8_spill] sm:$0xff] %v4852_v20  ;;  %v4857_v55 = vld [vmem:[%s5830_s9 + $0x88] ss:$16 sps:$4 sm:$0xff]  }
 0x127   :  { %v1005_v35 = vadd.f32 %v3641_v8, %v940_v11  ;;  %v4809_v8 = vld [vmem:[%s5830_s9 + $0xac] ss:$16 sps:$4 sm:$0xff]   ;;  %v3620_v11 = vpop.f32.mrf.mxu0  ;;  %v956_v7 = vadd.f32 %v3613_v4, %v891_v48  ;;  %5893 = vst [vmem:[#allocation9_spill] sm:$0xff] %v4857_v55  ;;  %v4903_v48 = vld [vmem:[%s5830_s9 + $0x40] ss:$16 sps:$4 sm:$0xff]  }
 0x128   :  { %v3643_v16 = vpop.f32.mrf.mxu1  ;;  %5900 = vst [vmem:[#allocation16_spill] sm:$0xff] %v4903_v48  ;;  %v4908_v4 = vld [vmem:[%s5830_s9 + $0x48] ss:$16 sps:$4 sm:$0xff]  }
 0x129   :  { %v3644_v36 = vadd.f32 %v3643_v16, %v3642_v9  ;;  %v1035_v39 = vmax.f32 %v1005_v35, 0.0  ;;  %v3539_v9 = vadd.f32 %v4733_v27, %v4731_v26  ;;  %v4822_v26 = vld [vmem:[%s5830_s9 + $0xa0] ss:$16 sps:$4 sm:$0xff]   ;;  %v4827_v27 = vld [vmem:[%s5830_s9 + $0xa8] ss:$16 sps:$4 sm:$0xff]   ;;  %v3621_v51 = vpop.f32.mrf.mxu0  ;;  %5901 = vst [vmem:[#allocation17_spill] sm:$0xff] %v4908_v4 }
 0x12a   :  { %v3645_v52 = vpop.f32.mrf.mxu1  ;;  %5888 = vst [vmem:[#allocation4_spill] sm:$0xff] %v4822_v26  ;;  %5889 = vst [vmem:[#allocation5_spill] sm:$0xff] %v4827_v27  ;;  %v4841_v35 = vld [vmem:[%s5830_s9 + $0x8c] ss:$16 sps:$4 sm:$0xff]  }
 0x12b   :  { %v1008_v31 = vadd.f32 %v3644_v36, %v943_v17  ;;  %v3542_v17 = vadd.f32 %v4737_v30, %v4735_v29  ;;  %v4836_v30 = vld [vmem:[%s5830_s9 + $0x84] ss:$16 sps:$4 sm:$0xff]   ;;  %5891 = vst [vmem:[#allocation7_spill] sm:$0xff] %v4841_v35  ;;  %v834_v36 = vadd.f32 %v3539_v9, %v4748_v54 }
 0x12c   :  { %v3646_v21 = vpop.f32.mrf.mxu1  ;;  %5890 = vst [vmem:[#allocation6_spill] sm:$0xff] %v4836_v30  ;;  %v4915_v9 = vld [vmem:[%s5830_s9 + $0x24] ss:$16 sps:$4 sm:$0xff]  }
 0x12d   :  { %v1036_v56 = vmax.f32 %v1008_v31, 0.0  ;;  %v3647_v41 = vadd.f32 %v3646_v21, %v3645_v52  ;;  %v959_v52 = vadd.f32 %v3616_v53, %v894_v10  ;;  %v837_v31 = vadd.f32 %v3542_v17, %v4748_v54  ;;  %v4865_v54 = vld [vmem:[%s5830_s9 + $0x64] ss:$16 sps:$4 sm:$0xff]   ;;  %5902 = vst [vmem:[#allocation18_spill] sm:$0xff] %v4915_v9  ;;  %v4920_v10 = vld [vmem:[%s5830_s9 + $0x2c] ss:$16 sps:$4 sm:$0xff]  }
 0x12e   :  { %v3648_v57 = vpop.f32.mrf.mxu1  ;;  %v899_v58 = vadd.f32 %v3579_v33, %v834_v36  ;;  %v3619_v21 = vadd.f32 %v3618_v63, %v4760_v38  ;;  %5894 = vst [vmem:[#allocation10_spill] sm:$0xff] %v4865_v54  ;;  %v4896_v63 = vld [vmem:[%s5830_s9 + $0x4c] ss:$16 sps:$4 sm:$0xff]   ;;  %5903 = vst [vmem:[#allocation19_spill] sm:$0xff] %v4920_v10  ;;  %v4944_v17 = vld [vmem:[%s5830_s9 + $0x4] ss:$16 sps:$4 sm:$0xff]  }
 0x12f   :  { %v1043_v46 = vpack.c.bf16 %v1036_v56, %v1035_v39  ;;  %v1013_v0 = vadd.f32 %v3647_v41, %v948_v23  ;;  %v4870_v39 = vld [vmem:[%s5830_s9 + $0x6c] ss:$16 sps:$4 sm:$0xff]   ;;  %v3622_v56 = vadd.f32 %v3621_v51, %v3620_v11  ;;  %v902_v38 = vadd.f32 %v3582_v50, %v837_v31  ;;  %5899 = vst [vmem:[#allocation15_spill] sm:$0xff] %v4896_v63  ;;  %v1865_v11 = vld [vmem:[%s5832_s3] sm:$0xff]  ;;  %v4964_v36 = vld [vmem:[%s5830_s9 + $0x8] ss:$16 sps:$4 sm:$0xff]   ;;  %v5010_v50 = vpop.f32.mrf.mxu0 }
 0x130   :  { %v3649_v60 = vpop.f32.mrf.mxu1  ;;  %5895 = vst [vmem:[#allocation11_spill] sm:$0xff] %v4870_v39  ;;  %v964_v59 = vadd.f32 %v3619_v21, %v899_v58  ;;  %5906 = vst [vmem:[#allocation22_spill] sm:$0xff] %v4944_v17 }
 0x131   :  { %v3650_v2 = vadd.f32 %v3649_v60, %v3648_v57  ;;  %1634 = vmatmul.mubr.bf16.vlgmr.msra.gmra.mxu0 %v1043_v46  ;;  %1707 = vmatmul.mubr.bf16.vlgmr.msra.gmra.mxu1 %v1043_v46  ;;  %v1037_v14 = vmax.f32 %v1013_v0, 0.0  ;;  %v4879_v46 = vld [vmem:[%s5830_s9 + $0x60] ss:$16 sps:$4 sm:$0xff]   ;;  %5909 = vst [vmem:[#allocation25_spill] sm:$0xff] %v4964_v36 }
 0x132   :  { %v3651_v45 = vpop.f32.mrf.mxu1  ;;  %2040 = vmatpush1.bf16.msra.mxu0 %v4767_v40  ;;  %2081 = vmatpush1.bf16.msra.mxu1 %v4772_v22  ;;  %5896 = vst [vmem:[#allocation12_spill] sm:$0xff] %v4879_v46 }
 0x133   :  { %v1016_v5 = vadd.f32 %v3650_v2, %v951_v62  ;;  %2041 = vmatprep.subr.bf16.mxu0 %v4777_v49  ;;  %2082 = vmatprep.subr.bf16.mxu1 %v4782_v24  ;;  %v4891_v62 = vld [vmem:[%s5830_s9 + $0x44] ss:$16 sps:$4 sm:$0xff]   ;;  %v967_v2 = vadd.f32 %v3622_v56, %v902_v38 }
 0x134   :  { %v3652_v61 = vpop.f32.mrf.mxu1  ;;  %1643 = vmatprep.mubr.bf16.mxu0 %v5840_v1  ;;  %1716 = vmatprep.mubr.bf16.mxu1 %v5840_v1  ;;  %5898 = vst [vmem:[#allocation14_spill] sm:$0xff] %v4891_v62 }
 0x135   :  { %v1038_v15 = vmax.f32 %v1016_v5, 0.0  ;;  %v3653_v16 = vadd.f32 %v3652_v61, %v3651_v45 }
 0x136   :  { %v3654_v32 = vpop.f32.mrf.mxu1  ;;  %2042 = vmatpush1.bf16.msra.mxu0 %v4791_v3  ;;  %2083 = vmatpush1.bf16.msra.mxu1 %v4796_v47 }
 0x137   :  { %v1044_v29 = vpack.c.bf16 %v1038_v15, %v1037_v14  ;;  %2043 = vmatprep.subr.bf16.mxu0 %v4804_v6  ;;  %2084 = vmatprep.subr.bf16.mxu1 %v4809_v8  ;;  %v1021_v19 = vadd.f32 %v3653_v16, %v956_v7  ;;  %v4932_v14 = vld [vmem:[%s5830_s9 + $0x20] ss:$16 sps:$4 sm:$0xff]   ;;  %v4937_v15 = vld [vmem:[%s5830_s9 + $0x28] ss:$16 sps:$4 sm:$0xff]   ;;  %v4951_v7 = vpop.permute.xlu0 %1869 }
 0x138   :  { %v3655_v18 = vpop.f32.mrf.mxu1  ;;  %5904 = vst [vmem:[#allocation20_spill] sm:$0xff] %v4932_v14  ;;  %5905 = vst [vmem:[#allocation21_spill] sm:$0xff] %v4937_v15  ;;  %v1872_v33 = vmul.f32 %v4951_v7, %v1865_v11 }
 0x139   :  { %v3656_v28 = vadd.f32 %v3655_v18, %v3654_v32  ;;  %1644 = vmatmul.mubr.bf16.gmra.mxu0 %v1044_v29  ;;  %1717 = vmatmul.mubr.bf16.gmra.mxu1 %v1044_v29  ;;  %v1039_v42 = vmax.f32 %v1021_v19, 0.0  ;;  %v4949_v32 = vld [vmem:[%s5830_s9 + $0xc] ss:$16 sps:$4 sm:$0xff]   ;;  %v4959_v29 = vld [vmem:[%s5830_s9] ss:$16 sps:$4 sm:$0xff]   ;;  %v5014_v19 = vpop.f32.mrf.mxu0 }
 0x13a   :  { %v3657_v34 = vpop.f32.mrf.mxu1  ;;  %2044 = vmatpush1.bf16.msra.mxu0 %v4822_v26  ;;  %2085 = vmatpush1.bf16.msra.mxu1 %v4827_v27  ;;  %5907 = vst [vmem:[#allocation23_spill] sm:$0xff] %v4949_v32  ;;  %5908 = vst [vmem:[#allocation24_spill] sm:$0xff] %v4959_v29 }
 0x13b   :  { %v1024_v37 = vadd.f32 %v3656_v28, %v959_v52  ;;  %2045 = vmatprep.subr.bf16.mxu0 %v4836_v30  ;;  %2086 = vmatprep.subr.bf16.mxu1 %v4841_v35  ;;  %v1878_v52 = vpack.c.bf16 %v1872_v33, %v1872_v33  ;;  %v1333_v31 = vpop.f32.mrf.mxu0 }
 0x13c   :  { %v3658_v41 = vpop.f32.mrf.mxu1  ;;  %1653 = vmatprep.mubr.bf16.mxu0 %v5840_v1  ;;  %1726 = vmatprep.mubr.bf16.mxu1 %v5840_v1 }
 0x13d   :  { %v1040_v57 = vmax.f32 %v1024_v37, 0.0  ;;  %v3659_v23 = vadd.f32 %v3658_v41, %v3657_v34  ;;  %v1335_v58 = vpop.f32.mrf.mxu0 }
 0x13e   :  { %v3660_v43 = vpop.f32.mrf.mxu1  ;;  %2046 = vmatpush1.bf16.msra.mxu0 %v4852_v20  ;;  %2087 = vmatpush1.bf16.msra.mxu1 %v4857_v55 }
 0x13f   :  { %v1045_v60 = vpack.c.bf16 %v1040_v57, %v1039_v42  ;;  %2047 = vmatprep.subr.bf16.mxu0 %v4865_v54  ;;  %2088 = vmatprep.subr.bf16.mxu1 %v4870_v39  ;;  %v1029_v44 = vadd.f32 %v3659_v23, %v964_v59  ;;  %v1339_v37 = vpop.f32.mrf.mxu0  ;;  %v90_v42 = vld [vmem:[%s5826_s2 + $0x10] sm:$0xff]  ;;  %v91_v23 = vld [vmem:[%s5826_s2 + $0x18] sm:$0xff] }
 0x140   :  { %v3661_v0 = vpop.f32.mrf.mxu1  ;;  %2275 = vperm.xlu1 %3701, %v90_v42  }
 0x141   :  { %v3662_v45 = vadd.f32 %v3661_v0, %v3660_v43  ;;  %1654 = vmatmul.mubr.bf16.gmra.mxu0 %v1045_v60  ;;  %1727 = vmatmul.mubr.bf16.gmra.mxu1 %v1045_v60  ;;  %v1041_v53 = vmax.f32 %v1029_v44, 0.0  ;;  %v5018_v41 = vpop.f32.mrf.mxu0  ;;  %v93_v60 = vld [vmem:[%s5826_s2 + $0x28] sm:$0xff]  ;;  %v95_v44 = vld [vmem:[%s5826_s2 + $0x38] sm:$0xff] }
 0x142   :  { %2048 = vmatpush1.bf16.msra.mxu0 %v4879_v46  ;;  %2089 = vmatpush1.bf16.msra.mxu1 %v4884_v25  ;;  %v5008_v18 = vpop.f32.mrf.mxu1 }
 0x143   :  { %v1032_v5 = vadd.f32 %v3662_v45, %v967_v2  ;;  %2049 = vmatprep.subr.bf16.mxu0 %v4891_v62  ;;  %2090 = vmatprep.subr.bf16.mxu1 %v4896_v63 }
 0x144   :  { %1663 = vmatprep.mubr.bf16.mxu0 %v5840_v1  ;;  %1736 = vmatprep.mubr.bf16.mxu1 %v5840_v1  ;;  %v5012_v51 = vpop.f32.mrf.mxu1 }
 0x145   :  { %v1042_v61 = vmax.f32 %v1032_v5, 0.0  ;;  %2398 = vperm.xlu1 %3701, %v91_v23   ;;  %v5864_v23 = vlaneseq }
 0x146   :  { %2050 = vmatpush1.bf16.msra.mxu0 %v4903_v48  ;;  %2091 = vmatpush1.bf16.msra.mxu1 %v4908_v4  ;;  %v1406_v28 = vpop.f32.mrf.mxu1 }
 0x147   :  { %v1046_v16 = vpack.c.bf16 %v1042_v61, %v1041_v53  ;;  %2051 = vmatprep.subr.bf16.mxu0 %v4915_v9  ;;  %2092 = vmatprep.subr.bf16.mxu1 %v4920_v10 }
 0x148   :  { %v1408_v34 = vpop.f32.mrf.mxu1 }
 0x149   :  { %1664 = vmatmul.mubr.bf16.gmra.mxu0 %v1046_v16  ;;  %1737 = vmatmul.mubr.bf16.gmra.mxu1 %v1046_v16 }
 0x14a   :  { %2052 = vmatpush1.bf16.msra.mxu0 %v4932_v14  ;;  %2093 = vmatpush1.bf16.msra.mxu1 %v4937_v15  ;;  %v1412_v21 = vpop.f32.mrf.mxu1 }
 0x14b   :  { %2053 = vmatprep.subr.bf16.mxu0 %v4944_v17  ;;  %2094 = vmatprep.subr.bf16.mxu1 %v4949_v32 }
 0x14c   :  { %2071 = vmatprep.mubr.bf16.mxu0 %v5840_v1  ;;  %2112 = vmatprep.mubr.bf16.mxu1 %v5840_v1  ;;  %v5016_v56 = vpop.f32.mrf.mxu1 }
 0x14d   :  { %2644 = vperm.xlu1 %3701, %v93_v60  }
 0x14e   :  { %2054 = vmatpush1.bf16.msra.mxu0 %v4959_v29  ;;  %2095 = vmatpush1.bf16.msra.mxu1 %v4964_v36 }
 0x14f   :  { %2162 = vmatprep.subr.bf16.mxu0 %v4714_v12  ;;  %2203 = vmatprep.subr.bf16.mxu1 %v4719_v13 }
 0x151   :  { %2072 = vmatmul.mubr.bf16.vlgmr.msra.gmra.mxu0 %v1878_v52  ;;  %2113 = vmatmul.mubr.bf16.vlgmr.msra.gmra.mxu1 %v1878_v52 }
 0x152   :  { %2163 = vmatpush1.bf16.msra.mxu0 %v4767_v40  ;;  %2204 = vmatpush1.bf16.msra.mxu1 %v4772_v22 }
 0x153   :  { %2164 = vmatprep.subr.bf16.mxu0 %v4777_v49  ;;  %2205 = vmatprep.subr.bf16.mxu1 %v4782_v24 }
 0x154   :  { %2194 = vmatprep.mubr.bf16.mxu0 %v5840_v1  ;;  %2235 = vmatprep.mubr.bf16.mxu1 %v5840_v1 }
 0x155   :  { %2890 = vperm.xlu1 %3701, %v95_v44   ;;  %v1750_v44 = vshrl.u32 %v5864_v23, 7 }
 0x156   :  { %2165 = vmatpush1.bf16.msra.mxu0 %v4791_v3  ;;  %2206 = vmatpush1.bf16.msra.mxu1 %v4796_v47 }
 0x157   :  { %2166 = vmatprep.subr.bf16.mxu0 %v4804_v6  ;;  %2207 = vmatprep.subr.bf16.mxu1 %v4809_v8 }
 0x15a   :  { %2167 = vmatpush1.bf16.msra.mxu0 %v4822_v26  ;;  %2208 = vmatpush1.bf16.msra.mxu1 %v4827_v27 }
 0x15b   :  { %2168 = vmatprep.subr.bf16.mxu0 %v4836_v30  ;;  %2209 = vmatprep.subr.bf16.mxu1 %v4841_v35 }
 0x15e   :  { %2169 = vmatpush1.bf16.msra.mxu0 %v4852_v20  ;;  %2210 = vmatpush1.bf16.msra.mxu1 %v4857_v55 }
 0x15f   :  { %2170 = vmatprep.subr.bf16.mxu0 %v4865_v54  ;;  %2211 = vmatprep.subr.bf16.mxu1 %v4870_v39 }
 0x162   :  { %2171 = vmatpush1.bf16.msra.mxu0 %v4879_v46  ;;  %2212 = vmatpush1.bf16.msra.mxu1 %v4884_v25 }
 0x163   :  { %2172 = vmatprep.subr.bf16.mxu0 %v4891_v62  ;;  %2213 = vmatprep.subr.bf16.mxu1 %v4896_v63 }
 0x166   :  { %2173 = vmatpush1.bf16.msra.mxu0 %v4903_v48  ;;  %2214 = vmatpush1.bf16.msra.mxu1 %v4908_v4  ;;  %v1755_v4 = vsub.s32 1, %v1750_v44  ;;  %v1763_v48 = vsub.s32 3, %v1750_v44 }
 0x167   :  { %2174 = vmatprep.subr.bf16.mxu0 %v4915_v9  ;;  %2215 = vmatprep.subr.bf16.mxu1 %v4920_v10  ;;  %v1747_v9 = vld [vmem:[%s5833_s10] sm:$0xf] }
 0x168   :  { %v5088_v20 = vrot.slane %v1747_v9, %v1755_v4  ;;  %v5090_v35 = vrot.slane %v1747_v9, %v1763_v48 }
 0x16a   :  { %2175 = vmatpush1.bf16.msra.mxu0 %v4932_v14  ;;  %2216 = vmatpush1.bf16.msra.mxu1 %v4937_v15  ;;  %v1759_v15 = vsub.s32 2, %v1750_v44 }
 0x16b   :  { %2176 = vmatprep.subr.bf16.mxu0 %v4944_v17  ;;  %2217 = vmatprep.subr.bf16.mxu1 %v4949_v32  ;;  %v1751_v17 = vsub.s32 0, %v1750_v44 }
 0x16c   :  { %v5086_v39 = vrot.slane %v1747_v9, %v1759_v15 }
 0x16d   :  { %v5084_v46 = vrot.slane %v1747_v9, %v1751_v17 }
 0x16e   :  { %2177 = vmatpush1.bf16.msra.mxu0 %v4959_v29  ;;  %2218 = vmatpush1.bf16.msra.mxu1 %v4964_v36 }
 0x16f   :  { %2285 = vmatprep.subr.bf16.mxu0 %v4714_v12  ;;  %2326 = vmatprep.subr.bf16.mxu1 %v4719_v13  ;;  %v5020_v12 = vpop.f32.mrf.mxu1  ;;  %v5022_v13 = vpop.f32.mrf.mxu0 }
 0x171   :  { %v5024_v38 = vpop.f32.mrf.mxu1  ;;  %v5029_v57 = vpop.f32.mrf.mxu0 }
 0x173   :  { %v5034_v43 = vpop.f32.mrf.mxu1  ;;  %v5036_v59 = vpop.f32.mrf.mxu0 }
 0x175   :  { %v5041_v0 = vpop.f32.mrf.mxu1  ;;  %v5043_v2 = vpop.f32.mrf.mxu0 }
 0x177   :  { %v5048_v45 = vpop.f32.mrf.mxu1  ;;  %v5050_v5 = vpop.f32.mrf.mxu0 }
 0x179   :  { %v5052_v53 = vpop.f32.mrf.mxu1  ;;  %v5054_v61 = vpop.f32.mrf.mxu0 }
 0x17b   :  { %v5056_v11 = vpop.f32.mrf.mxu1  ;;  %v5058_v16 = vpop.f32.mrf.mxu0 }
 0x17d   :  { %v5060_v33 = vpop.f32.mrf.mxu1  ;;  %v5062_v52 = vpop.f32.mrf.mxu0 }
 0x17f   :  { %v5064_v42 = vpop.f32.mrf.mxu1  ;;  %v5066_v60 = vpop.f32.mrf.mxu0 }
 0x181   :  { %v5068_v1 = vpop.f32.mrf.mxu1  ;;  %v5071_v36 = vpop.f32.mrf.mxu0 }
 0x1f1   :  { %v5073_v29 = vpop.f32.mrf.mxu0  ;;  %v5075_v32 = vpop.f32.mrf.mxu1 }
 0x1f3   :  { %v5077_v14 = vpop.f32.mrf.mxu0  ;;  %v5079_v10 = vpop.f32.mrf.mxu1 }
 0x1f5   :  { %v1639_v63 = vpop.f32.mrf.mxu0  ;;  %v1712_v23 = vpop.f32.mrf.mxu1 }
 0x1f6   :  { %v1640_v62 = vadd.f32 %v1639_v63, %v1333_v31  ;;  %v1713_v25 = vadd.f32 %v1712_v23, %v1406_v28 }
 0x1f7   :  { %v1641_v54 = vpop.f32.mrf.mxu0  ;;  %v1714_v55 = vpop.f32.mrf.mxu1 }
 0x1f8   :  { %v1642_v30 = vadd.f32 %v1641_v54, %v1335_v58  ;;  %v1715_v27 = vadd.f32 %v1714_v55, %v1408_v34  ;;  %v5093_v26 = vadd.f32 %v5084_v46, %v1640_v62  ;;  %v5096_v44 = vadd.f32 %v5086_v39, %v1713_v25 }
 0x1f9   :  { %v1645_v63 = vpop.f32.mrf.mxu0  ;;  %v1718_v28 = vpop.f32.mrf.mxu1 }
 0x1fa   :  { %v1646_v17 = vadd.f32 %v1645_v63, %v1339_v37  ;;  %v1719_v31 = vadd.f32 %v1718_v28, %v1412_v21  ;;  %v5099_v15 = vadd.f32 %v5088_v20, %v1642_v30  ;;  %v5102_v4 = vadd.f32 %v5090_v35, %v1715_v27 }
 0x1fb   :  { %v1647_v48 = vpop.f32.mrf.mxu0  ;;  %v1720_v9 = vpop.f32.mrf.mxu1 }
 0x1fc   :  { %v1648_v55 = vadd.f32 %v1647_v48, %v5018_v41  ;;  %v1721_v54 = vadd.f32 %v1720_v9, %v5016_v56  ;;  %v5107_v62 = vadd.f32 %v5084_v46, %v1646_v17  ;;  %v5110_v25 = vadd.f32 %v5086_v39, %v1719_v31 }
 0x1fd   :  { %v1649_v34 = vpop.f32.mrf.mxu0  ;;  %v1722_v58 = vpop.f32.mrf.mxu1 }
 0x1fe   :  { %v1650_v30 = vadd.f32 %v1649_v34, %v5022_v13  ;;  %v1723_v21 = vadd.f32 %v1722_v58, %v5020_v12  ;;  %v5115_v27 = vadd.f32 %v5088_v20, %v1648_v55  ;;  %v5118_v37 = vadd.f32 %v5090_v35, %v1721_v54 }
 0x1ff   :  { %v1651_v41 = vpop.f32.mrf.mxu0  ;;  %v1724_v56 = vpop.f32.mrf.mxu1 }
 0x200   :  { %v1652_v23 = vadd.f32 %v1651_v41, %v5029_v57  ;;  %v1725_v63 = vadd.f32 %v1724_v56, %v5024_v38  ;;  %v5123_v28 = vadd.f32 %v5084_v46, %v1650_v30  ;;  %v5126_v17 = vadd.f32 %v5086_v39, %v1723_v21 }
 0x201   :  { %v1655_v13 = vpop.f32.mrf.mxu0  ;;  %v1728_v12 = vpop.f32.mrf.mxu1 }
 0x202   :  { %v1656_v31 = vadd.f32 %v1655_v13, %v5036_v59  ;;  %v1729_v48 = vadd.f32 %v1728_v12, %v5034_v43  ;;  %v5131_v9 = vadd.f32 %v5088_v20, %v1652_v23  ;;  %v5134_v55 = vadd.f32 %v5090_v35, %v1725_v63 }
 0x203   :  { %v1657_v57 = vpop.f32.mrf.mxu0  ;;  %v1730_v38 = vpop.f32.mrf.mxu1 }
 0x204   :  { %v1658_v54 = vadd.f32 %v1657_v57, %v5043_v2  ;;  %v1731_v34 = vadd.f32 %v1730_v38, %v5041_v0  ;;  %v5139_v58 = vadd.f32 %v5084_v46, %v1656_v31  ;;  %v5142_v30 = vadd.f32 %v5086_v39, %v1729_v48 }
 0x205   :  { %v1659_v59 = vpop.f32.mrf.mxu0  ;;  %v1732_v43 = vpop.f32.mrf.mxu1 }
 0x206   :  { %5910 = vst [vmem:[#allocation26_spill] sm:$0xff] %v5139_v58  ;;  %5911 = vst [vmem:[#allocation27_spill] sm:$0xff] %v5142_v30  ;;  %v1660_v21 = vadd.f32 %v1659_v59, %v5050_v5  ;;  %v1733_v41 = vadd.f32 %v1732_v43, %v5048_v45  ;;  %v5147_v56 = vadd.f32 %v5088_v20, %v1658_v54 }
 0x207   :  { %v5150_v23 = vadd.f32 %v5090_v35, %v1731_v34  ;;  %v1661_v2 = vpop.f32.mrf.mxu0  ;;  %v1734_v0 = vpop.f32.mrf.mxu1 }
 0x208   :  { %5912 = vst [vmem:[#allocation28_spill] sm:$0xff] %v5147_v56  ;;  %v1662_v63 = vadd.f32 %v1661_v2, %v5054_v61  ;;  %v1735_v13 = vadd.f32 %v1734_v0, %v5052_v53  ;;  %v5155_v12 = vadd.f32 %v5084_v46, %v1660_v21  ;;  %v5158_v31 = vadd.f32 %v5086_v39, %v1733_v41 }
 0x209   :  { %5913 = vst [vmem:[#allocation29_spill] sm:$0xff] %v5150_v23  ;;  %v1665_v5 = vpop.f32.mrf.mxu0  ;;  %v1738_v45 = vpop.f32.mrf.mxu1  ;;  %v1636_v53 = vadd.f32 %v5073_v29, %v5010_v50 }
 0x20a   :  { %5914 = vst [vmem:[#allocation30_spill] sm:$0xff] %v5155_v12  ;;  %5915 = vst [vmem:[#allocation31_spill] sm:$0xff] %v5158_v31  ;;  %v1666_v48 = vadd.f32 %v1665_v5, %v5058_v16  ;;  %v1739_v57 = vadd.f32 %v1738_v45, %v5056_v11  ;;  %v5163_v38 = vadd.f32 %v5088_v20, %v1662_v63 }
 0x20b   :  { %v5166_v54 = vadd.f32 %v5090_v35, %v1735_v13  ;;  %v1667_v61 = vpop.f32.mrf.mxu0  ;;  %v1740_v34 = vpop.f32.mrf.mxu1  ;;  %v1638_v16 = vadd.f32 %v5077_v14, %v5014_v19  ;;  %v1769_v13 = vadd.f32 %v5084_v46, %v1636_v53 }
 0x20c   :  { %5916 = vst [vmem:[#allocation32_spill] sm:$0xff] %v5163_v38  ;;  %v1668_v59 = vadd.f32 %v1667_v61, %v5062_v52  ;;  %v1741_v43 = vadd.f32 %v1740_v34, %v5060_v33  ;;  %v5173_v21 = vadd.f32 %v5084_v46, %v1666_v48  ;;  %v5176_v11 = vadd.f32 %v5086_v39, %v1739_v57 }
 0x20d   :  { %5917 = vst [vmem:[#allocation33_spill] sm:$0xff] %v5166_v54  ;;  %v1669_v41 = vpop.f32.mrf.mxu0  ;;  %v1742_v2 = vpop.f32.mrf.mxu1  ;;  %v1770_v57 = vadd.f32 %v5088_v20, %v1638_v16  ;;  %v1711_v16 = vadd.f32 %v5079_v10, %v5012_v51 }
 0x20e   :  { %5918 = vst [vmem:[#allocation34_spill] sm:$0xff] %v5173_v21  ;;  %5919 = vst [vmem:[#allocation35_spill] sm:$0xff] %v5176_v11  ;;  %v1670_v0 = vadd.f32 %v1669_v41, %v5066_v60  ;;  %v1743_v29 = vadd.f32 %v1742_v2, %v5064_v42  ;;  %v5183_v50 = vadd.f32 %v5088_v20, %v1668_v59 }
 0x20f   :  { %v5186_v33 = vadd.f32 %v5090_v35, %v1741_v43  ;;  %v1671_v52 = vpop.f32.mrf.mxu0  ;;  %v1744_v63 = vpop.f32.mrf.mxu1  ;;  %v1709_v2 = vadd.f32 %v5075_v32, %v5008_v18 }
 0x210   :  { %5920 = vst [vmem:[#allocation36_spill] sm:$0xff] %v5183_v50  ;;  %v1672_v5 = vadd.f32 %v1671_v52, %v5071_v36  ;;  %v1745_v14 = vadd.f32 %v1744_v63, %v5068_v1  ;;  %v5192_v19 = vadd.f32 %v5084_v46, %v1670_v0  ;;  %v5195_v60 = vadd.f32 %v5086_v39, %v1743_v29 }
 0x211   :  { %5921 = vst [vmem:[#allocation37_spill] sm:$0xff] %v5186_v33  ;;  %v2073_v42 = vpop.f32.mrf.mxu0  ;;  %v2114_v45 = vpop.f32.mrf.mxu1 }
 0x212   :  { %5922 = vst [vmem:[#allocation38_spill] sm:$0xff] %v5192_v19  ;;  %5923 = vst [vmem:[#allocation39_spill] sm:$0xff] %v5195_v60  ;;  %v2121_v48 = vadd.f32 %v2073_v42, %v1769_v13  ;;  %v5199_v61 = vadd.f32 %v5088_v20, %v1672_v5  ;;  %v5202_v53 = vadd.f32 %v5090_v35, %v1745_v14 }
 0x213   :  { %v2075_v36 = vpop.f32.mrf.mxu0  ;;  %v2116_v34 = vpop.f32.mrf.mxu1  ;;  %v1771_v20 = vadd.f32 %v5086_v39, %v1709_v2  ;;  %v1772_v13 = vadd.f32 %v5090_v35, %v1711_v16  ;;  %v1866_v39 = vld [vmem:[%s5834_s4] sm:$0xff]  ;;  %v5930_v16 = vld [vmem:[#allocation6_spill] sm:$0xff] }
 0x214   :  { %5924 = vst [vmem:[#allocation40_spill] sm:$0xff] %v5199_v61  ;;  %5925 = vst [vmem:[#allocation41_spill] sm:$0xff] %v5202_v53  ;;  %v3470_v1 = vmul.f32 -1.442695, %v2121_v48  ;;  %v2122_v59 = vadd.f32 %v2075_v36, %v1770_v57  ;;  %v1873_v51 = vmul.f32 %v4951_v7, %v1866_v39  ;;  %v5927_v7 = vmov 0   ;;  %v5939_v39 = vld [vmem:[#allocation15_spill] sm:$0xff] }
 0x215   :  { %v2077_v46 = vpop.f32.mrf.mxu0  ;;  %v2118_v43 = vpop.f32.mrf.mxu1  ;;  %v2123_v52 = vadd.f32 %v2114_v45, %v1771_v20  ;;  %v2124_v14 = vadd.f32 %v2116_v34, %v1772_v13  ;;  %v5929_v20 = vld [vmem:[#allocation5_spill] sm:$0xff] }
 0x216   :  { %3922 = vpow2.f32 %v3470_v1  ;;  %v3471_v41 = vmul.f32 -1.442695, %v2122_v59  ;;  %v5933_v13 = vld [vmem:[#allocation9_spill] sm:$0xff] }
 0x217   :  { %v2078_v0 = vpop.f32.mrf.mxu0  ;;  %v2119_v29 = vpop.f32.mrf.mxu1  ;;  %v3472_v63 = vmul.f32 -1.442695, %v2123_v52  ;;  %v5931_v52 = vld [vmem:[#allocation7_spill] sm:$0xff] }
 0x218   :  { %3924 = vpow2.f32 %v3471_v41  ;;  %v5219_v41 = vpop.permute.xlu0 %2152  ;;  %v5928_v29 = vld [vmem:[#allocation4_spill] sm:$0xff] }
 0x219   :  { %3926 = vpow2.f32 %v3472_v63  ;;  %v5932_v63 = vld [vmem:[#allocation8_spill] sm:$0xff] }
 0x223   :  { %v3923_v5 = vpop.eup %3922 }
 0x224   :  { %v2134_v42 = vadd.f32 1.0, %v3923_v5  ;;  %v5934_v5 = vld [vmem:[#allocation10_spill] sm:$0xff] }
 0x225   :  { %v3925_v48 = vpop.eup %3924 }
 0x226   :  { %3928 = vrcp.f32 %v2134_v42  ;;  %v2135_v57 = vadd.f32 1.0, %v3925_v48  ;;  %v3927_v32 = vpop.eup %3926  ;;  %v5936_v42 = vld [vmem:[#allocation12_spill] sm:$0xff]  ;;  %v5937_v48 = vld [vmem:[#allocation13_spill] sm:$0xff] }
 0x227   :  { %3930 = vtanh.f32 %v2124_v14  ;;  %v2136_v35 = vadd.f32 1.0, %v3927_v32  ;;  %v5935_v14 = vld [vmem:[#allocation11_spill] sm:$0xff]  ;;  %v5940_v32 = vld [vmem:[#allocation16_spill] sm:$0xff] }
 0x228   :  { %3932 = vrcp.f32 %v2135_v57  ;;  %v5938_v57 = vld [vmem:[#allocation14_spill] sm:$0xff] }
 0x229   :  { %3934 = vrcp.f32 %v2136_v35  ;;  %v5945_v35 = vld [vmem:[#allocation21_spill] sm:$0xff] }
 0x233   :  { %v3929_v18 = vpop.eup %3928 }
 0x234   :  { %v3931_v10 = vpop.eup %3930 }
 0x235   :  { %v3933_v45 = vpop.eup %3932  ;;  %v2145_v34 = vmul.f32 %v3931_v10, %v3929_v18  ;;  %v5941_v18 = vld [vmem:[#allocation17_spill] sm:$0xff]  ;;  %v5942_v10 = vld [vmem:[#allocation18_spill] sm:$0xff] }
 0x236   :  { %v2144_v36 = vmul.f32 %v3933_v45, %v1873_v51  ;;  %v3935_v59 = vpop.eup %3934  ;;  %v5943_v51 = vld [vmem:[#allocation19_spill] sm:$0xff]  ;;  %v5944_v45 = vld [vmem:[#allocation20_spill] sm:$0xff] }
 0x238   :  { %v5214_v1 = vadd.f32 %v2145_v34, %v2144_v36  ;;  %v5946_v36 = vld [vmem:[#allocation22_spill] sm:$0xff]  ;;  %v5947_v34 = vld [vmem:[#allocation23_spill] sm:$0xff] }
 0x23a   :  { %3936 = vtanh.f32 %v5214_v1 }
 0x247   :  { %v3937_v46 = vpop.eup %3936 }
 0x248   :  { %v5217_v43 = vmul.f32 %v3937_v46, %v3935_v59  ;;  %v5948_v59 = vld [vmem:[#allocation24_spill] sm:$0xff]  ;;  %v5949_v46 = vld [vmem:[#allocation25_spill] sm:$0xff] }
 0x24a   :  { %5926 = vst [vmem:[#allocation42_spill] sm:$0xff] %v5217_v43  ;;  %v2155_v2 = vmul.f32 %v5219_v41, %v5217_v43 }
 0x24c   :  { %v2161_v0 = vpack.c.bf16 %v2155_v2, %v2155_v2  ;;  %v5258_v2 = vld [vmem:[%s5830_s9 + $0xe4] ss:$16 sps:$4 sm:$0xff]  }
 0x24e   :  { %2195 = vmatmul.mubr.bf16.vlgmr.msra.gmra.mxu0 %v2161_v0  ;;  %2236 = vmatmul.mubr.bf16.vlgmr.msra.gmra.mxu1 %v2161_v0  ;;  %v5264_v0 = vld [vmem:[%s5830_s9 + $0xec] ss:$16 sps:$4 sm:$0xff]  }
 0x24f   :  { %2286 = vmatpush1.bf16.msra.mxu0 %v4767_v40  ;;  %2327 = vmatpush1.bf16.msra.mxu1 %v4772_v22 }
 0x250   :  { %2287 = vmatprep.subr.bf16.mxu0 %v4777_v49  ;;  %2328 = vmatprep.subr.bf16.mxu1 %v4782_v24 }
 0x251   :  { %2317 = vmatprep.mubr.bf16.mxu0 %v5927_v7  ;;  %2358 = vmatprep.mubr.bf16.mxu1 %v5927_v7 }
 0x253   :  { %2288 = vmatpush1.bf16.msra.mxu0 %v4791_v3  ;;  %2329 = vmatpush1.bf16.msra.mxu1 %v4796_v47 }
 0x254   :  { %2289 = vmatprep.subr.bf16.mxu0 %v4804_v6  ;;  %2330 = vmatprep.subr.bf16.mxu1 %v4809_v8 }
 0x257   :  { %2290 = vmatpush1.bf16.msra.mxu0 %v5928_v29  ;;  %2331 = vmatpush1.bf16.msra.mxu1 %v5929_v20 }
 0x258   :  { %2291 = vmatprep.subr.bf16.mxu0 %v5930_v16  ;;  %2332 = vmatprep.subr.bf16.mxu1 %v5931_v52 }
 0x25b   :  { %2292 = vmatpush1.bf16.msra.mxu0 %v5932_v63  ;;  %2333 = vmatpush1.bf16.msra.mxu1 %v5933_v13 }
 0x25c   :  { %2293 = vmatprep.subr.bf16.mxu0 %v5934_v5  ;;  %2334 = vmatprep.subr.bf16.mxu1 %v5935_v14 }
 0x25f   :  { %2294 = vmatpush1.bf16.msra.mxu0 %v5936_v42  ;;  %2335 = vmatpush1.bf16.msra.mxu1 %v5937_v48 }
 0x260   :  { %2295 = vmatprep.subr.bf16.mxu0 %v5938_v57  ;;  %2336 = vmatprep.subr.bf16.mxu1 %v5939_v39 }
 0x263   :  { %2296 = vmatpush1.bf16.msra.mxu0 %v5940_v32  ;;  %2337 = vmatpush1.bf16.msra.mxu1 %v5941_v18 }
 0x264   :  { %2297 = vmatprep.subr.bf16.mxu0 %v5942_v10  ;;  %2338 = vmatprep.subr.bf16.mxu1 %v5943_v51 }
 0x267   :  { %2298 = vmatpush1.bf16.msra.mxu0 %v5944_v45  ;;  %2339 = vmatpush1.bf16.msra.mxu1 %v5945_v35 }
 0x268   :  { %2299 = vmatprep.subr.bf16.mxu0 %v5946_v36  ;;  %2340 = vmatprep.subr.bf16.mxu1 %v5947_v34 }
 0x26b   :  { %2300 = vmatpush1.bf16.msra.mxu0 %v5948_v59  ;;  %2341 = vmatpush1.bf16.msra.mxu1 %v5949_v46 }
 0x26c   :  { %2408 = vmatprep.subr.bf16.mxu0 %v5258_v2  ;;  %2449 = vmatprep.subr.bf16.mxu1 %v5264_v0 }
 0x30e   :  { %v2196_v53 = vpop.f32.mrf.mxu0  ;;  %v2237_v60 = vpop.f32.mrf.mxu1 }
 0x30f   :  { %v2244_v61 = vadd.f32 %v2196_v53, %v5093_v26  ;;  %v2246_v12 = vadd.f32 %v2237_v60, %v5096_v44 }
 0x310   :  { %v2198_v19 = vpop.f32.mrf.mxu0  ;;  %v2239_v43 = vpop.f32.mrf.mxu1 }
 0x311   :  { %v3473_v33 = vmul.f32 -1.442695, %v2244_v61  ;;  %v2245_v11 = vadd.f32 %v2198_v19, %v5099_v15  ;;  %v3475_v23 = vmul.f32 -1.442695, %v2246_v12  ;;  %v2247_v30 = vadd.f32 %v2239_v43, %v5102_v4 }
 0x312   :  { %v2200_v50 = vpop.f32.mrf.mxu0  ;;  %v2241_v21 = vpop.f32.mrf.mxu1 }
 0x313   :  { %3938 = vpow2.f32 %v3473_v33  ;;  %v3474_v54 = vmul.f32 -1.442695, %v2245_v11 }
 0x314   :  { %v2201_v31 = vpop.f32.mrf.mxu0  ;;  %v2242_v38 = vpop.f32.mrf.mxu1 }
 0x315   :  { %3940 = vpow2.f32 %v3474_v54  ;;  %v2156_v31 = vmul.f32 %v5219_v41, %v5214_v1 }
 0x316   :  { %3942 = vpow2.f32 %v3475_v23 }
 0x317   :  { %3944 = vtanh.f32 %v2247_v30 }
 0x320   :  { %v3939_v56 = vpop.eup %3938 }
 0x321   :  { %v2257_v58 = vadd.f32 1.0, %v3939_v56  ;;  %v5278_v56 = vpop.permute.xlu1 %2275 }
 0x322   :  { %v3941_v26 = vpop.eup %3940 }
 0x323   :  { %3946 = vrcp.f32 %v2257_v58  ;;  %v2258_v61 = vadd.f32 1.0, %v3941_v26  ;;  %v3943_v15 = vpop.eup %3942 }
 0x324   :  { %v3945_v21 = vpop.eup %3944  ;;  %v2259_v44 = vadd.f32 1.0, %v3943_v15 }
 0x325   :  { %3948 = vrcp.f32 %v2258_v61 }
 0x326   :  { %3950 = vrcp.f32 %v2259_v44 }
 0x330   :  { %v3947_v50 = vpop.eup %3946 }
 0x331   :  { %v2268_v38 = vmul.f32 %v3947_v50, %v3945_v21 }
 0x332   :  { %v3949_v54 = vpop.eup %3948 }
 0x333   :  { %v2267_v12 = vmul.f32 %v3949_v54, %v2156_v31  ;;  %v3951_v4 = vpop.eup %3950 }
 0x335   :  { %v5273_v11 = vadd.f32 %v2268_v38, %v2267_v12 }
 0x337   :  { %3952 = vtanh.f32 %v5273_v11  ;;  %v2279_v44 = vmul.f32 %v5278_v56, %v5273_v11  ;;  %v5334_v11 = vld [vmem:[%s5830_s9 + $0xe0] ss:$16 sps:$4 sm:$0xff]  }
 0x344   :  { %v3953_v30 = vpop.eup %3952 }
 0x345   :  { %v5276_v58 = vmul.f32 %v3953_v30, %v3951_v4 }
 0x347   :  { %v2278_v23 = vmul.f32 %v5278_v56, %v5276_v58  ;;  %v5340_v56 = vld [vmem:[%s5830_s9 + $0xe8] ss:$16 sps:$4 sm:$0xff]  }
 0x349   :  { %v2284_v33 = vpack.c.bf16 %v2278_v23, %v2278_v23 }
 0x34b   :  { %2318 = vmatmul.mubr.bf16.vlgmr.msra.gmra.mxu0 %v2284_v33  ;;  %2359 = vmatmul.mubr.bf16.vlgmr.msra.gmra.mxu1 %v2284_v33 }
 0x34c   :  { %2409 = vmatpush1.bf16.msra.mxu0 %v4767_v40  ;;  %2450 = vmatpush1.bf16.msra.mxu1 %v4772_v22 }
 0x34d   :  { %2410 = vmatprep.subr.bf16.mxu0 %v4777_v49  ;;  %2451 = vmatprep.subr.bf16.mxu1 %v4782_v24 }
 0x34e   :  { %2440 = vmatprep.mubr.bf16.mxu0 %v5927_v7  ;;  %2481 = vmatprep.mubr.bf16.mxu1 %v5927_v7 }
 0x350   :  { %2411 = vmatpush1.bf16.msra.mxu0 %v4791_v3  ;;  %2452 = vmatpush1.bf16.msra.mxu1 %v4796_v47 }
 0x351   :  { %2412 = vmatprep.subr.bf16.mxu0 %v4804_v6  ;;  %2453 = vmatprep.subr.bf16.mxu1 %v4809_v8 }
 0x354   :  { %2413 = vmatpush1.bf16.msra.mxu0 %v5928_v29  ;;  %2454 = vmatpush1.bf16.msra.mxu1 %v5929_v20 }
 0x355   :  { %2414 = vmatprep.subr.bf16.mxu0 %v5930_v16  ;;  %2455 = vmatprep.subr.bf16.mxu1 %v5931_v52 }
 0x358   :  { %2415 = vmatpush1.bf16.msra.mxu0 %v5932_v63  ;;  %2456 = vmatpush1.bf16.msra.mxu1 %v5933_v13 }
 0x359   :  { %2416 = vmatprep.subr.bf16.mxu0 %v5934_v5  ;;  %2457 = vmatprep.subr.bf16.mxu1 %v5935_v14 }
 0x35c   :  { %2417 = vmatpush1.bf16.msra.mxu0 %v5936_v42  ;;  %2458 = vmatpush1.bf16.msra.mxu1 %v5937_v48 }
 0x35d   :  { %2418 = vmatprep.subr.bf16.mxu0 %v5938_v57  ;;  %2459 = vmatprep.subr.bf16.mxu1 %v5939_v39 }
 0x360   :  { %2419 = vmatpush1.bf16.msra.mxu0 %v5940_v32  ;;  %2460 = vmatpush1.bf16.msra.mxu1 %v5941_v18 }
 0x361   :  { %2420 = vmatprep.subr.bf16.mxu0 %v5942_v10  ;;  %2461 = vmatprep.subr.bf16.mxu1 %v5943_v51 }
 0x364   :  { %2421 = vmatpush1.bf16.msra.mxu0 %v5944_v45  ;;  %2462 = vmatpush1.bf16.msra.mxu1 %v5945_v35 }
 0x365   :  { %2422 = vmatprep.subr.bf16.mxu0 %v5946_v36  ;;  %2463 = vmatprep.subr.bf16.mxu1 %v5947_v34 }
 0x368   :  { %2423 = vmatpush1.bf16.msra.mxu0 %v5948_v59  ;;  %2464 = vmatpush1.bf16.msra.mxu1 %v5949_v46 }
 0x369   :  { %2531 = vmatprep.subr.bf16.mxu0 %v5258_v2  ;;  %2572 = vmatprep.subr.bf16.mxu1 %v5264_v0 }
 0x40b   :  { %v2319_v40 = vpop.f32.mrf.mxu0  ;;  %v2360_v22 = vpop.f32.mrf.mxu1 }
 0x40c   :  { %v2367_v49 = vadd.f32 %v2319_v40, %v5107_v62  ;;  %v2369_v26 = vadd.f32 %v2360_v22, %v5110_v25  ;;  %v5327_v22 = vpop.permute.xlu1 %2398 }
 0x40d   :  { %v2321_v24 = vpop.f32.mrf.mxu0  ;;  %v2362_v3 = vpop.f32.mrf.mxu1 }
 0x40e   :  { %v3476_v47 = vmul.f32 -1.442695, %v2367_v49  ;;  %v2368_v19 = vadd.f32 %v2321_v24, %v5115_v27  ;;  %v3478_v61 = vmul.f32 -1.442695, %v2369_v26  ;;  %v2370_v15 = vadd.f32 %v2362_v3, %v5118_v37  ;;  %v5346_v3 = vld [vmem:[%s5830_s9 + $0xc4] ss:$16 sps:$4 sm:$0xff]  }
 0x40f   :  { %v2323_v60 = vpop.f32.mrf.mxu0  ;;  %v2364_v53 = vpop.f32.mrf.mxu1 }
 0x410   :  { %3954 = vpow2.f32 %v3476_v47  ;;  %v3477_v1 = vmul.f32 -1.442695, %v2368_v19  ;;  %v5352_v47 = vld [vmem:[%s5830_s9 + $0xcc] ss:$16 sps:$4 sm:$0xff]   ;;  %v5360_v19 = vld [vmem:[%s5830_s9 + $0xc0] ss:$16 sps:$4 sm:$0xff]  }
 0x411   :  { %v2324_v43 = vpop.f32.mrf.mxu0  ;;  %v2365_v41 = vpop.f32.mrf.mxu1  ;;  %v5366_v60 = vld [vmem:[%s5830_s9 + $0xc8] ss:$16 sps:$4 sm:$0xff]  }
 0x412   :  { %3956 = vpow2.f32 %v3477_v1 }
 0x413   :  { %3958 = vpow2.f32 %v3478_v61 }
 0x414   :  { %3960 = vtanh.f32 %v2370_v15 }
 0x41d   :  { %v3955_v21 = vpop.eup %3954 }
 0x41e   :  { %v2380_v50 = vadd.f32 1.0, %v3955_v21  ;;  %v5406_v21 = vpop.permute.xlu0 %2521 }
 0x41f   :  { %v3957_v62 = vpop.eup %3956 }
 0x420   :  { %3962 = vrcp.f32 %v2380_v50  ;;  %v2381_v31 = vadd.f32 1.0, %v3957_v62  ;;  %v3959_v27 = vpop.eup %3958 }
 0x421   :  { %v3961_v38 = vpop.eup %3960  ;;  %v2382_v25 = vadd.f32 1.0, %v3959_v27  ;;  %v5427_v27 = vld [vmem:[%s5830_s9 + $0xac] ss:$16 sps:$4 sm:$0xff]  }
 0x422   :  { %3964 = vrcp.f32 %v2381_v31  ;;  %v5421_v31 = vld [vmem:[%s5830_s9 + $0xa4] ss:$16 sps:$4 sm:$0xff]  }
 0x423   :  { %3966 = vrcp.f32 %v2382_v25  ;;  %v5463_v25 = vld [vmem:[%s5830_s9 + $0x88] ss:$16 sps:$4 sm:$0xff]  }
 0x42d   :  { %v3963_v54 = vpop.eup %3962 }
 0x42e   :  { %v2391_v12 = vmul.f32 %v3963_v54, %v3961_v38  ;;  %v5433_v38 = vld [vmem:[%s5830_s9 + $0xa0] ss:$16 sps:$4 sm:$0xff]   ;;  %v5439_v54 = vld [vmem:[%s5830_s9 + $0xa8] ss:$16 sps:$4 sm:$0xff]  }
 0x42f   :  { %v3965_v4 = vpop.eup %3964 }
 0x430   :  { %v2390_v30 = vmul.f32 %v3965_v4, %v2279_v44  ;;  %v3967_v37 = vpop.eup %3966  ;;  %v5445_v44 = vld [vmem:[%s5830_s9 + $0x84] ss:$16 sps:$4 sm:$0xff]   ;;  %v5457_v4 = vld [vmem:[%s5830_s9 + $0x80] ss:$16 sps:$4 sm:$0xff]  }
 0x432   :  { %v5322_v23 = vadd.f32 %v2391_v12, %v2390_v30  ;;  %v5451_v12 = vld [vmem:[%s5830_s9 + $0x8c] ss:$16 sps:$4 sm:$0xff]   ;;  %v5469_v30 = vld [vmem:[%s5830_s9 + $0x64] ss:$16 sps:$4 sm:$0xff]  }
 0x434   :  { %3968 = vtanh.f32 %v5322_v23  ;;  %v2402_v53 = vmul.f32 %v5327_v22, %v5322_v23  ;;  %v5475_v23 = vld [vmem:[%s5830_s9 + $0x6c] ss:$16 sps:$4 sm:$0xff]  }
 0x441   :  { %v3969_v33 = vpop.eup %3968 }
 0x442   :  { %v5325_v40 = vmul.f32 %v3969_v33, %v3967_v37  ;;  %v5481_v37 = vld [vmem:[%s5830_s9 + $0x60] ss:$16 sps:$4 sm:$0xff]   ;;  %v5487_v33 = vld [vmem:[%s5830_s9 + $0x68] ss:$16 sps:$4 sm:$0xff]  }
 0x444   :  { %v2401_v49 = vmul.f32 %v5327_v22, %v5325_v40  ;;  %v5493_v22 = vld [vmem:[%s5830_s9 + $0x44] ss:$16 sps:$4 sm:$0xff]  }
 0x446   :  { %v2407_v24 = vpack.c.bf16 %v2401_v49, %v2401_v49  ;;  %v5499_v49 = vld [vmem:[%s5830_s9 + $0x4c] ss:$16 sps:$4 sm:$0xff]  }
 0x448   :  { %2441 = vmatmul.mubr.bf16.vlgmr.msra.gmra.mxu0 %v2407_v24  ;;  %2482 = vmatmul.mubr.bf16.vlgmr.msra.gmra.mxu1 %v2407_v24  ;;  %v5505_v24 = vld [vmem:[%s5830_s9 + $0x40] ss:$16 sps:$4 sm:$0xff]  }
 0x449   :  { %2532 = vmatpush1.bf16.msra.mxu0 %v5334_v11  ;;  %2573 = vmatpush1.bf16.msra.mxu1 %v5340_v56 }
 0x44a   :  { %2533 = vmatprep.subr.bf16.mxu0 %v5346_v3  ;;  %2574 = vmatprep.subr.bf16.mxu1 %v5352_v47 }
 0x44b   :  { %2563 = vmatprep.mubr.bf16.mxu0 %v5927_v7  ;;  %2604 = vmatprep.mubr.bf16.mxu1 %v5927_v7 }
 0x44d   :  { %2534 = vmatpush1.bf16.msra.mxu0 %v5360_v19  ;;  %2575 = vmatpush1.bf16.msra.mxu1 %v5366_v60 }
 0x44e   :  { %2535 = vmatprep.subr.bf16.mxu0 %v4804_v6  ;;  %2576 = vmatprep.subr.bf16.mxu1 %v4809_v8 }
 0x451   :  { %2536 = vmatpush1.bf16.msra.mxu0 %v5928_v29  ;;  %2577 = vmatpush1.bf16.msra.mxu1 %v5929_v20 }
 0x452   :  { %2537 = vmatprep.subr.bf16.mxu0 %v5930_v16  ;;  %2578 = vmatprep.subr.bf16.mxu1 %v5931_v52 }
 0x455   :  { %2538 = vmatpush1.bf16.msra.mxu0 %v5932_v63  ;;  %2579 = vmatpush1.bf16.msra.mxu1 %v5933_v13 }
 0x456   :  { %2539 = vmatprep.subr.bf16.mxu0 %v5934_v5  ;;  %2580 = vmatprep.subr.bf16.mxu1 %v5935_v14 }
 0x459   :  { %2540 = vmatpush1.bf16.msra.mxu0 %v5936_v42  ;;  %2581 = vmatpush1.bf16.msra.mxu1 %v5937_v48 }
 0x45a   :  { %2541 = vmatprep.subr.bf16.mxu0 %v5938_v57  ;;  %2582 = vmatprep.subr.bf16.mxu1 %v5939_v39 }
 0x45d   :  { %2542 = vmatpush1.bf16.msra.mxu0 %v5940_v32  ;;  %2583 = vmatpush1.bf16.msra.mxu1 %v5941_v18 }
 0x45e   :  { %2543 = vmatprep.subr.bf16.mxu0 %v5942_v10  ;;  %2584 = vmatprep.subr.bf16.mxu1 %v5943_v51 }
 0x461   :  { %2544 = vmatpush1.bf16.msra.mxu0 %v5944_v45  ;;  %2585 = vmatpush1.bf16.msra.mxu1 %v5945_v35 }
 0x462   :  { %2545 = vmatprep.subr.bf16.mxu0 %v5946_v36  ;;  %2586 = vmatprep.subr.bf16.mxu1 %v5947_v34 }
 0x465   :  { %2546 = vmatpush1.bf16.msra.mxu0 %v5948_v59  ;;  %2587 = vmatpush1.bf16.msra.mxu1 %v5949_v46 }
 0x466   :  { %2654 = vmatprep.subr.bf16.mxu0 %v5258_v2  ;;  %2695 = vmatprep.subr.bf16.mxu1 %v5264_v0 }
 0x508   :  { %v2442_v6 = vpop.f32.mrf.mxu0  ;;  %v2483_v8 = vpop.f32.mrf.mxu1 }
 0x509   :  { %v2490_v29 = vadd.f32 %v2442_v6, %v5123_v28  ;;  %v2492_v57 = vadd.f32 %v2483_v8, %v5126_v17  ;;  %v5511_v6 = vld [vmem:[%s5830_s9 + $0x48] ss:$16 sps:$4 sm:$0xff]   ;;  %v5517_v8 = vld [vmem:[%s5830_s9 + $0x24] ss:$16 sps:$4 sm:$0xff]  }
 0x50a   :  { %v2444_v20 = vpop.f32.mrf.mxu0  ;;  %v2485_v16 = vpop.f32.mrf.mxu1 }
 0x50b   :  { %v3479_v52 = vmul.f32 -1.442695, %v2490_v29  ;;  %v2491_v63 = vadd.f32 %v2444_v20, %v5131_v9  ;;  %v3481_v39 = vmul.f32 -1.442695, %v2492_v57  ;;  %v2493_v32 = vadd.f32 %v2485_v16, %v5134_v55  ;;  %v5523_v29 = vld [vmem:[%s5830_s9 + $0x2c] ss:$16 sps:$4 sm:$0xff]  }
 0x50c   :  { %v2446_v13 = vpop.f32.mrf.mxu0  ;;  %v2487_v5 = vpop.f32.mrf.mxu1  ;;  %v5529_v20 = vld [vmem:[%s5830_s9 + $0x20] ss:$16 sps:$4 sm:$0xff]   ;;  %v5535_v16 = vld [vmem:[%s5830_s9 + $0x28] ss:$16 sps:$4 sm:$0xff]  }
 0x50d   :  { %3970 = vpow2.f32 %v3479_v52  ;;  %v3480_v14 = vmul.f32 -1.442695, %v2491_v63  ;;  %v5950_v13 = vld [vmem:[#allocation26_spill] sm:$0xff]  ;;  %v5951_v57 = vld [vmem:[#allocation28_spill] sm:$0xff] }
 0x50e   :  { %v2447_v42 = vpop.f32.mrf.mxu0  ;;  %v2488_v48 = vpop.f32.mrf.mxu1 }
 0x50f   :  { %3972 = vpow2.f32 %v3480_v14 }
 0x510   :  { %3974 = vpow2.f32 %v3481_v39 }
 0x511   :  { %3976 = vtanh.f32 %v2493_v32 }
 0x51a   :  { %v3971_v18 = vpop.eup %3970 }
 0x51b   :  { %v2503_v10 = vadd.f32 1.0, %v3971_v18 }
 0x51c   :  { %v3973_v28 = vpop.eup %3972 }
 0x51d   :  { %3978 = vrcp.f32 %v2503_v10  ;;  %v2504_v51 = vadd.f32 1.0, %v3973_v28  ;;  %v3975_v9 = vpop.eup %3974 }
 0x51e   :  { %v3977_v45 = vpop.eup %3976  ;;  %v2505_v17 = vadd.f32 1.0, %v3975_v9 }
 0x51f   :  { %3980 = vrcp.f32 %v2504_v51  ;;  %v5953_v51 = vld [vmem:[#allocation29_spill] sm:$0xff] }
 0x520   :  { %3982 = vrcp.f32 %v2505_v17 }
 0x52a   :  { %v3979_v35 = vpop.eup %3978 }
 0x52b   :  { %v2514_v1 = vmul.f32 %v3979_v35, %v3977_v45 }
 0x52c   :  { %v3981_v43 = vpop.eup %3980 }
 0x52d   :  { %v2513_v41 = vmul.f32 %v3981_v43, %v2402_v53  ;;  %v3983_v55 = vpop.eup %3982 }
 0x52f   :  { %v5401_v26 = vadd.f32 %v2514_v1, %v2513_v41 }
 0x531   :  { %3984 = vtanh.f32 %v5401_v26 }
 0x53e   :  { %v3985_v61 = vpop.eup %3984 }
 0x53f   :  { %v5404_v15 = vmul.f32 %v3985_v61, %v3983_v55  ;;  %v2525_v55 = vmul.f32 %v5406_v21, %v5401_v26  ;;  %v5590_v26 = vld [vmem:[%s5830_s9 + $0x4] ss:$16 sps:$4 sm:$0xff]  }
 0x541   :  { %v2524_v50 = vmul.f32 %v5406_v21, %v5404_v15  ;;  %v5596_v21 = vld [vmem:[%s5830_s9 + $0xc] ss:$16 sps:$4 sm:$0xff]  }
 0x543   :  { %v2530_v62 = vpack.c.bf16 %v2524_v50, %v2524_v50 }
 0x545   :  { %2564 = vmatmul.mubr.bf16.vlgmr.msra.gmra.mxu0 %v2530_v62  ;;  %2605 = vmatmul.mubr.bf16.vlgmr.msra.gmra.mxu1 %v2530_v62 }
 0x546   :  { %2655 = vmatpush1.bf16.msra.mxu0 %v5334_v11  ;;  %2696 = vmatpush1.bf16.msra.mxu1 %v5340_v56 }
 0x547   :  { %2656 = vmatprep.subr.bf16.mxu0 %v5346_v3  ;;  %2697 = vmatprep.subr.bf16.mxu1 %v5352_v47 }
 0x548   :  { %2686 = vmatprep.mubr.bf16.mxu0 %v5927_v7  ;;  %2727 = vmatprep.mubr.bf16.mxu1 %v5927_v7 }
 0x54a   :  { %2657 = vmatpush1.bf16.msra.mxu0 %v5360_v19  ;;  %2698 = vmatpush1.bf16.msra.mxu1 %v5366_v60 }
 0x54b   :  { %2658 = vmatprep.subr.bf16.mxu0 %v5421_v31  ;;  %2699 = vmatprep.subr.bf16.mxu1 %v5427_v27 }
 0x54e   :  { %2659 = vmatpush1.bf16.msra.mxu0 %v5433_v38  ;;  %2700 = vmatpush1.bf16.msra.mxu1 %v5439_v54 }
 0x54f   :  { %2660 = vmatprep.subr.bf16.mxu0 %v5445_v44  ;;  %2701 = vmatprep.subr.bf16.mxu1 %v5451_v12 }
 0x552   :  { %2661 = vmatpush1.bf16.msra.mxu0 %v5457_v4  ;;  %2702 = vmatpush1.bf16.msra.mxu1 %v5463_v25 }
 0x553   :  { %2662 = vmatprep.subr.bf16.mxu0 %v5469_v30  ;;  %2703 = vmatprep.subr.bf16.mxu1 %v5475_v23 }
 0x556   :  { %2663 = vmatpush1.bf16.msra.mxu0 %v5481_v37  ;;  %2704 = vmatpush1.bf16.msra.mxu1 %v5487_v33 }
 0x557   :  { %2664 = vmatprep.subr.bf16.mxu0 %v5493_v22  ;;  %2705 = vmatprep.subr.bf16.mxu1 %v5499_v49 }
 0x55a   :  { %2665 = vmatpush1.bf16.msra.mxu0 %v5505_v24  ;;  %2706 = vmatpush1.bf16.msra.mxu1 %v5511_v6 }
 0x55b   :  { %2666 = vmatprep.subr.bf16.mxu0 %v5517_v8  ;;  %2707 = vmatprep.subr.bf16.mxu1 %v5523_v29 }
 0x55e   :  { %2667 = vmatpush1.bf16.msra.mxu0 %v5529_v20  ;;  %2708 = vmatpush1.bf16.msra.mxu1 %v5535_v16 }
 0x55f   :  { %2668 = vmatprep.subr.bf16.mxu0 %v5946_v36  ;;  %2709 = vmatprep.subr.bf16.mxu1 %v5947_v34 }
 0x562   :  { %2669 = vmatpush1.bf16.msra.mxu0 %v5948_v59  ;;  %2710 = vmatpush1.bf16.msra.mxu1 %v5949_v46  ;;  %v5952_v46 = vld [vmem:[#allocation27_spill] sm:$0xff] }
 0x563   :  { %2777 = vmatprep.subr.bf16.mxu0 %v5258_v2  ;;  %2818 = vmatprep.subr.bf16.mxu1 %v5264_v0 }
 0x605   :  { %v2565_v52 = vpop.f32.mrf.mxu0  ;;  %v2606_v63 = vpop.f32.mrf.mxu1 }
 0x606   :  { %v2613_v5 = vadd.f32 %v2565_v52, %v5950_v13  ;;  %v2615_v10 = vadd.f32 %v2606_v63, %v5952_v46 }
 0x607   :  { %v2567_v14 = vpop.f32.mrf.mxu0  ;;  %v2608_v42 = vpop.f32.mrf.mxu1 }
 0x608   :  { %v3482_v48 = vmul.f32 -1.442695, %v2613_v5  ;;  %v2614_v39 = vadd.f32 %v2567_v14, %v5951_v57  ;;  %v3484_v28 = vmul.f32 -1.442695, %v2615_v10  ;;  %v2616_v9 = vadd.f32 %v2608_v42, %v5953_v51  ;;  %v5555_v42 = vpop.permute.xlu1 %2644  ;;  %v5955_v51 = vld [vmem:[#allocation32_spill] sm:$0xff] }
 0x609   :  { %v2569_v36 = vpop.f32.mrf.mxu0  ;;  %v2610_v32 = vpop.f32.mrf.mxu1 }
 0x60a   :  { %3986 = vpow2.f32 %v3482_v48  ;;  %v3483_v34 = vmul.f32 -1.442695, %v2614_v39  ;;  %v5602_v39 = vld [vmem:[%s5830_s9] ss:$16 sps:$4 sm:$0xff]   ;;  %v5608_v36 = vld [vmem:[%s5830_s9 + $0x8] ss:$16 sps:$4 sm:$0xff]  }
 0x60b   :  { %v2570_v59 = vpop.f32.mrf.mxu0  ;;  %v2611_v18 = vpop.f32.mrf.mxu1 }
 0x60c   :  { %3988 = vpow2.f32 %v3483_v34  ;;  %v5954_v59 = vld [vmem:[#allocation30_spill] sm:$0xff] }
 0x60d   :  { %3990 = vpow2.f32 %v3484_v28 }
 0x60e   :  { %3992 = vtanh.f32 %v2616_v9 }
 0x617   :  { %v3987_v45 = vpop.eup %3986 }
 0x618   :  { %v2626_v35 = vadd.f32 1.0, %v3987_v45 }
 0x619   :  { %v3989_v53 = vpop.eup %3988 }
 0x61a   :  { %3994 = vrcp.f32 %v2626_v35  ;;  %v2627_v1 = vadd.f32 1.0, %v3989_v53  ;;  %v3991_v43 = vpop.eup %3990 }
 0x61b   :  { %v3993_v17 = vpop.eup %3992  ;;  %v2628_v62 = vadd.f32 1.0, %v3991_v43 }
 0x61c   :  { %3996 = vrcp.f32 %v2627_v1 }
 0x61d   :  { %3998 = vrcp.f32 %v2628_v62 }
 0x627   :  { %v3995_v41 = vpop.eup %3994 }
 0x628   :  { %v2637_v61 = vmul.f32 %v3995_v41, %v3993_v17  ;;  %v5956_v17 = vld [vmem:[#allocation31_spill] sm:$0xff] }
 0x629   :  { %v3997_v50 = vpop.eup %3996 }
 0x62a   :  { %v2636_v52 = vmul.f32 %v3997_v50, %v2525_v55  ;;  %v3999_v13 = vpop.eup %3998 }
 0x62c   :  { %v5550_v63 = vadd.f32 %v2637_v61, %v2636_v52 }
 0x62e   :  { %4000 = vtanh.f32 %v5550_v63 }
 0x63b   :  { %v4001_v5 = vpop.eup %4000 }
 0x63c   :  { %v5553_v14 = vmul.f32 %v4001_v5, %v3999_v13 }
 0x63e   :  { %v2647_v48 = vmul.f32 %v5555_v42, %v5553_v14 }
 0x640   :  { %v2653_v57 = vpack.c.bf16 %v2647_v48, %v2647_v48 }
 0x642   :  { %2687 = vmatmul.mubr.bf16.vlgmr.msra.gmra.mxu0 %v2653_v57  ;;  %2728 = vmatmul.mubr.bf16.vlgmr.msra.gmra.mxu1 %v2653_v57  ;;  %v2648_v57 = vmul.f32 %v5555_v42, %v5550_v63 }
 0x643   :  { %2778 = vmatpush1.bf16.msra.mxu0 %v5334_v11  ;;  %2819 = vmatpush1.bf16.msra.mxu1 %v5340_v56 }
 0x644   :  { %2779 = vmatprep.subr.bf16.mxu0 %v5346_v3  ;;  %2820 = vmatprep.subr.bf16.mxu1 %v5352_v47 }
 0x645   :  { %2809 = vmatprep.mubr.bf16.mxu0 %v5927_v7  ;;  %2850 = vmatprep.mubr.bf16.mxu1 %v5927_v7 }
 0x647   :  { %2780 = vmatpush1.bf16.msra.mxu0 %v5360_v19  ;;  %2821 = vmatpush1.bf16.msra.mxu1 %v5366_v60 }
 0x648   :  { %2781 = vmatprep.subr.bf16.mxu0 %v5421_v31  ;;  %2822 = vmatprep.subr.bf16.mxu1 %v5427_v27 }
 0x64b   :  { %2782 = vmatpush1.bf16.msra.mxu0 %v5433_v38  ;;  %2823 = vmatpush1.bf16.msra.mxu1 %v5439_v54 }
 0x64c   :  { %2783 = vmatprep.subr.bf16.mxu0 %v5445_v44  ;;  %2824 = vmatprep.subr.bf16.mxu1 %v5451_v12 }
 0x64f   :  { %2784 = vmatpush1.bf16.msra.mxu0 %v5457_v4  ;;  %2825 = vmatpush1.bf16.msra.mxu1 %v5463_v25 }
 0x650   :  { %2785 = vmatprep.subr.bf16.mxu0 %v5469_v30  ;;  %2826 = vmatprep.subr.bf16.mxu1 %v5475_v23 }
 0x653   :  { %2786 = vmatpush1.bf16.msra.mxu0 %v5481_v37  ;;  %2827 = vmatpush1.bf16.msra.mxu1 %v5487_v33 }
 0x654   :  { %2787 = vmatprep.subr.bf16.mxu0 %v5493_v22  ;;  %2828 = vmatprep.subr.bf16.mxu1 %v5499_v49 }
 0x657   :  { %2788 = vmatpush1.bf16.msra.mxu0 %v5505_v24  ;;  %2829 = vmatpush1.bf16.msra.mxu1 %v5511_v6 }
 0x658   :  { %2789 = vmatprep.subr.bf16.mxu0 %v5517_v8  ;;  %2830 = vmatprep.subr.bf16.mxu1 %v5523_v29 }
 0x65b   :  { %2790 = vmatpush1.bf16.msra.mxu0 %v5529_v20  ;;  %2831 = vmatpush1.bf16.msra.mxu1 %v5535_v16 }
 0x65c   :  { %2791 = vmatprep.subr.bf16.mxu0 %v5590_v26  ;;  %2832 = vmatprep.subr.bf16.mxu1 %v5596_v21 }
 0x65f   :  { %2792 = vmatpush1.bf16.msra.mxu0 %v5602_v39  ;;  %2833 = vmatpush1.bf16.msra.mxu1 %v5608_v36 }
 0x660   :  { %2900 = vmatprep.subr.bf16.mxu0 %v5258_v2  ;;  %2941 = vmatprep.subr.bf16.mxu1 %v5264_v0  ;;  %v5957_v0 = vld [vmem:[#allocation33_spill] sm:$0xff] }
 0x702   :  { %v2688_v32 = vpop.f32.mrf.mxu0  ;;  %v2729_v34 = vpop.f32.mrf.mxu1 }
 0x703   :  { %v2736_v18 = vadd.f32 %v2688_v32, %v5954_v59  ;;  %v2738_v2 = vadd.f32 %v2729_v34, %v5956_v17  ;;  %v5674_v17 = vpop.permute.xlu1 %2890 }
 0x704   :  { %v2690_v46 = vpop.f32.mrf.mxu0  ;;  %v2731_v10 = vpop.f32.mrf.mxu1 }
 0x705   :  { %v3485_v28 = vmul.f32 -1.442695, %v2736_v18  ;;  %v2737_v9 = vadd.f32 %v2690_v46, %v5955_v51  ;;  %v3487_v41 = vmul.f32 -1.442695, %v2738_v2  ;;  %v2739_v55 = vadd.f32 %v2731_v10, %v5957_v0  ;;  %v3915_v0 = vld [vmem:[%s5835_s11 + $0x30] sm:$0xff]  }
 0x706   :  { %v2692_v45 = vpop.f32.mrf.mxu0  ;;  %v2733_v35 = vpop.f32.mrf.mxu1 }
 0x707   :  { %4002 = vpow2.f32 %v3485_v28  ;;  %v3486_v53 = vmul.f32 -1.442695, %v2737_v9  ;;  %v5624_v9 = vpop.permute.xlu0 %2767 }
 0x708   :  { %v2693_v1 = vpop.f32.mrf.mxu0  ;;  %v2734_v43 = vpop.f32.mrf.mxu1 }
 0x709   :  { %4004 = vpow2.f32 %v3486_v53 }
 0x70a   :  { %4006 = vpow2.f32 %v3487_v41 }
 0x70b   :  { %4008 = vtanh.f32 %v2739_v55  ;;  %v5962_v55 = vld [vmem:[#allocation42_spill] sm:$0xff] }
 0x714   :  { %v4003_v61 = vpop.eup %4002 }
 0x715   :  { %v2749_v50 = vadd.f32 1.0, %v4003_v61  ;;  %v3021_v61 = vpack.c.bf16 %v5276_v58, %v5962_v55  ;;  %v3918_v58 = vld [vmem:[%s5835_s11 + $0x18] sm:$0xff]  }
 0x716   :  { %v4005_v62 = vpop.eup %4004 }
 0x717   :  { %4010 = vrcp.f32 %v2749_v50  ;;  %v2750_v52 = vadd.f32 1.0, %v4005_v62  ;;  %v4007_v13 = vpop.eup %4006  ;;  %v3916_v50 = vld [vmem:[%s5835_s11 + $0x28] sm:$0xff]   ;;  %v3917_v62 = vld [vmem:[%s5835_s11 + $0x20] sm:$0xff]  }
 0x718   :  { %v4009_v5 = vpop.eup %4008  ;;  %v2751_v34 = vadd.f32 1.0, %v4007_v13  ;;  %v3920_v13 = vld [vmem:[%s5835_s11 + $0x8] sm:$0xff]  }
 0x719   :  { %4012 = vrcp.f32 %v2750_v52  ;;  %v3919_v52 = vld [vmem:[%s5835_s11 + $0x10] sm:$0xff]  }
 0x71a   :  { %4014 = vrcp.f32 %v2751_v34  ;;  %v5963_v34 = vld [vmem:[#allocation38_spill] sm:$0xff] }
 0x724   :  { %v4011_v48 = vpop.eup %4010 }
 0x725   :  { %v2760_v32 = vmul.f32 %v4011_v48, %v4009_v5  ;;  %v3921_v5 = vld [vmem:[%s5835_s11] sm:$0xff]   ;;  %v3022_v48 = vpack.c.bf16 %v5404_v15, %v5325_v40  ;;  %v5965_v15 = vld [vmem:[#allocation39_spill] sm:$0xff] }
 0x726   :  { %v4013_v59 = vpop.eup %4012 }
 0x727   :  { %v2759_v18 = vmul.f32 %v4013_v59, %v2648_v57  ;;  %v4015_v10 = vpop.eup %4014 }
 0x729   :  { %v5619_v46 = vadd.f32 %v2760_v32, %v2759_v18 }
 0x72b   :  { %4016 = vtanh.f32 %v5619_v46  ;;  %v2771_v63 = vmul.f32 %v5624_v9, %v5619_v46 }
 0x738   :  { %v4017_v28 = vpop.eup %4016 }
 0x739   :  { %v5622_v51 = vmul.f32 %v4017_v28, %v4015_v10 }
 0x73b   :  { %v2770_v45 = vmul.f32 %v5624_v9, %v5622_v51  ;;  %v3023_v57 = vpack.c.bf16 %v5622_v51, %v5553_v14  ;;  %v5964_v9 = vld [vmem:[#allocation40_spill] sm:$0xff] }
 0x73d   :  { %v2776_v35 = vpack.c.bf16 %v2770_v45, %v2770_v45 }
 0x73f   :  { %2810 = vmatmul.mubr.bf16.vlgmr.msra.gmra.mxu0 %v2776_v35  ;;  %2851 = vmatmul.mubr.bf16.vlgmr.msra.gmra.mxu1 %v2776_v35 }
 0x740   :  { %2901 = vmatpush1.bf16.msra.mxu0 %v5334_v11  ;;  %2942 = vmatpush1.bf16.msra.mxu1 %v5340_v56 }
 0x741   :  { %2902 = vmatprep.subr.bf16.mxu0 %v5346_v3  ;;  %2943 = vmatprep.subr.bf16.mxu1 %v5352_v47  ;;  %v5958_v3 = vld [vmem:[#allocation34_spill] sm:$0xff] }
 0x742   :  { %2932 = vmatprep.mubr.bf16.mxu0 %v5927_v7  ;;  %2973 = vmatprep.mubr.bf16.mxu1 %v5927_v7  ;;  %v3914_v7 = vld [vmem:[%s5835_s11 + $0x38] sm:$0xff]  }
 0x744   :  { %2903 = vmatpush1.bf16.msra.mxu0 %v5360_v19  ;;  %2944 = vmatpush1.bf16.msra.mxu1 %v5366_v60 }
 0x745   :  { %2904 = vmatprep.subr.bf16.mxu0 %v5421_v31  ;;  %2945 = vmatprep.subr.bf16.mxu1 %v5427_v27  ;;  %v5959_v27 = vld [vmem:[#allocation36_spill] sm:$0xff] }
 0x748   :  { %2905 = vmatpush1.bf16.msra.mxu0 %v5433_v38  ;;  %2946 = vmatpush1.bf16.msra.mxu1 %v5439_v54 }
 0x749   :  { %2906 = vmatprep.subr.bf16.mxu0 %v5445_v44  ;;  %2947 = vmatprep.subr.bf16.mxu1 %v5451_v12 }
 0x74c   :  { %2907 = vmatpush1.bf16.msra.mxu0 %v5457_v4  ;;  %2948 = vmatpush1.bf16.msra.mxu1 %v5463_v25 }
 0x74d   :  { %2908 = vmatprep.subr.bf16.mxu0 %v5469_v30  ;;  %2949 = vmatprep.subr.bf16.mxu1 %v5475_v23  ;;  %v5960_v30 = vld [vmem:[#allocation35_spill] sm:$0xff] }
 0x750   :  { %2909 = vmatpush1.bf16.msra.mxu0 %v5481_v37  ;;  %2950 = vmatpush1.bf16.msra.mxu1 %v5487_v33  ;;  %v5961_v33 = vld [vmem:[#allocation37_spill] sm:$0xff] }
 0x751   :  { %2910 = vmatprep.subr.bf16.mxu0 %v5493_v22  ;;  %2951 = vmatprep.subr.bf16.mxu1 %v5499_v49 }
 0x754   :  { %2911 = vmatpush1.bf16.msra.mxu0 %v5505_v24  ;;  %2952 = vmatpush1.bf16.msra.mxu1 %v5511_v6 }
 0x755   :  { %2912 = vmatprep.subr.bf16.mxu0 %v5517_v8  ;;  %2953 = vmatprep.subr.bf16.mxu1 %v5523_v29 }
 0x758   :  { %2913 = vmatpush1.bf16.msra.mxu0 %v5529_v20  ;;  %2954 = vmatpush1.bf16.msra.mxu1 %v5535_v16 }
 0x759   :  { %2914 = vmatprep.subr.bf16.mxu0 %v5590_v26  ;;  %2955 = vmatprep.subr.bf16.mxu1 %v5596_v21 }
 0x75c   :  { %2915 = vmatpush1.bf16.msra.mxu0 %v5602_v39  ;;  %2956 = vmatpush1.bf16.msra.mxu1 %v5608_v36 }
 0x75d   :  { %3675 = vmatprep.subr.bf16.mxu0 %v3914_v7 }
 0x7ff   :  { %v2811_v11 = vpop.f32.mrf.mxu0  ;;  %v2852_v56 = vpop.f32.mrf.mxu1 }
 0x800   :  { %v2859_v47 = vadd.f32 %v2811_v11, %v5958_v3  ;;  %v2861_v23 = vadd.f32 %v2852_v56, %v5960_v30  ;;  %v5966_v3 = vld [vmem:[#allocation41_spill] sm:$0xff] }
 0x801   :  { %v2813_v19 = vpop.f32.mrf.mxu0  ;;  %v2854_v60 = vpop.f32.mrf.mxu1 }
 0x802   :  { %v3488_v31 = vmul.f32 -1.442695, %v2859_v47  ;;  %v2860_v38 = vadd.f32 %v2813_v19, %v5959_v27  ;;  %v3490_v37 = vmul.f32 -1.442695, %v2861_v23  ;;  %v2862_v22 = vadd.f32 %v2854_v60, %v5961_v33 }
 0x803   :  { %v2815_v54 = vpop.f32.mrf.mxu0  ;;  %v2856_v44 = vpop.f32.mrf.mxu1 }
 0x804   :  { %4018 = vpow2.f32 %v3488_v31  ;;  %v3489_v12 = vmul.f32 -1.442695, %v2860_v38  ;;  %v5967_v38 = vlaneseq  ;;  %v5715_v44 = vld [vmem:[%s5836_s12] ss:$0 sm:$0xff] }
 0x805   :  { %v2816_v4 = vpop.f32.mrf.mxu0  ;;  %v2857_v25 = vpop.f32.mrf.mxu1 }
 0x806   :  { %4020 = vpow2.f32 %v3489_v12  ;;  %v5710_v54 = vand.u32 127, %v5967_v38 }
 0x807   :  { %4022 = vpow2.f32 %v3490_v37 }
 0x808   :  { %4024 = vtanh.f32 %v2862_v22  ;;  %vm3163_vm0 = vcmp.lt.s32.totalorder %v5710_v54, 6  ;;  %vm3244_vm1 = vcmp.eq.s32.totalorder %v5710_v54, 6 }
 0x811   :  { %v4019_v49 = vpop.eup %4018 }
 0x812   :  { %v2872_v24 = vadd.f32 1.0, %v4019_v49 }
 0x813   :  { %v4021_v6 = vpop.eup %4020 }
 0x814   :  { %4026 = vrcp.f32 %v2872_v24  ;;  %v2873_v8 = vadd.f32 1.0, %v4021_v6  ;;  %v4023_v29 = vpop.eup %4022 }
 0x815   :  { %v4025_v20 = vpop.eup %4024  ;;  %v2874_v21 = vadd.f32 1.0, %v4023_v29 }
 0x816   :  { %4028 = vrcp.f32 %v2873_v8 }
 0x817   :  { %4030 = vrcp.f32 %v2874_v21 }
 0x821   :  { %v4027_v16 = vpop.eup %4026 }
 0x822   :  { %v2883_v42 = vmul.f32 %v4027_v16, %v4025_v20 }
 0x823   :  { %v4029_v26 = vpop.eup %4028 }
 0x824   :  { %v2882_v39 = vmul.f32 %v4029_v26, %v2771_v63  ;;  %v4031_v53 = vpop.eup %4030 }
 0x826   :  { %v5669_v36 = vadd.f32 %v2883_v42, %v2882_v39 }
 0x828   :  { %4032 = vtanh.f32 %v5669_v36  ;;  %v2894_v33 = vmul.f32 %v5674_v17, %v5669_v36 }
 0x835   :  { %v4033_v1 = vpop.eup %4032 }
 0x836   :  { %v5672_v43 = vmul.f32 %v4033_v1, %v4031_v53 }
 0x838   :  { %v2893_v2 = vmul.f32 %v5674_v17, %v5672_v43 }
 0x83a   :  { %v2899_v41 = vpack.c.bf16 %v2893_v2, %v2893_v2 }
 0x83c   :  { %2933 = vmatmul.mubr.bf16.vlgmr.msra.gmra.mxu0 %v2899_v41  ;;  %2974 = vmatmul.mubr.bf16.vlgmr.msra.gmra.mxu1 %v2899_v41 }
 0x83d   :  { %3676 = vmatpush3.bf16.msra.mxu0 %v3914_v7  ;;  %3691 = vmatprep.mubr.bf16.mxu0 %v3021_v61 }
 0x83e   :  { %3677 = vmatprep.subr.bf16.mxu0 %v3915_v0 }
 0x841   :  { %3678 = vmatpush3.bf16.msra.mxu0 %v3915_v0 }
 0x842   :  { %3679 = vmatprep.subr.bf16.mxu0 %v3916_v50 }
 0x845   :  { %3680 = vmatpush3.bf16.msra.mxu0 %v3916_v50 }
 0x846   :  { %3681 = vmatprep.subr.bf16.mxu0 %v3917_v62 }
 0x849   :  { %3682 = vmatpush3.bf16.msra.mxu0 %v3917_v62 }
 0x84a   :  { %3683 = vmatprep.subr.bf16.mxu0 %v3918_v58 }
 0x84d   :  { %3684 = vmatpush3.bf16.msra.mxu0 %v3918_v58 }
 0x84e   :  { %3685 = vmatprep.subr.bf16.mxu0 %v3919_v52 }
 0x851   :  { %3686 = vmatpush3.bf16.msra.mxu0 %v3919_v52 }
 0x852   :  { %3687 = vmatprep.subr.bf16.mxu0 %v3920_v13 }
 0x855   :  { %3688 = vmatpush3.bf16.msra.mxu0 %v3920_v13 }
 0x856   :  { %3689 = vmatprep.subr.bf16.mxu0 %v3921_v5 }
 0x859   :  { %3690 = vmatpush3.bf16.msra.mxu0 %v3921_v5 }
 0x85c   :  { %3692 = vmatmul.mubr.bf16.vlgmr.msra.gmra.mxu0 %v3022_v48 }
 0x85d   :  { %3695 = vmatprep.mubr.bf16.mxu0 %v3023_v57 }
 0x8fc   :  { %v2934_v32 = vpop.f32.mrf.mxu0  ;;  %v2975_v59 = vpop.f32.mrf.mxu1 }
 0x8fd   :  { %v2982_v18 = vadd.f32 %v2934_v32, %v5963_v34  ;;  %v2984_v14 = vadd.f32 %v2975_v59, %v5965_v15 }
 0x8fe   :  { %v2936_v46 = vpop.f32.mrf.mxu0  ;;  %v2977_v10 = vpop.f32.mrf.mxu1 }
 0x8ff   :  { %v3491_v28 = vmul.f32 -1.442695, %v2982_v18  ;;  %v2983_v45 = vadd.f32 %v2936_v46, %v5964_v9  ;;  %v3493_v51 = vmul.f32 -1.442695, %v2984_v14  ;;  %v2985_v47 = vadd.f32 %v2977_v10, %v5966_v3 }
 0x900   :  { %v2938_v35 = vpop.f32.mrf.mxu0  ;;  %v2979_v7 = vpop.f32.mrf.mxu1 }
 0x901   :  { %4034 = vpow2.f32 %v3491_v28  ;;  %v3492_v11 = vmul.f32 -1.442695, %v2983_v45 }
 0x902   :  { %v2939_v56 = vpop.f32.mrf.mxu0  ;;  %v2980_v40 = vpop.f32.mrf.mxu1 }
 0x903   :  { %4036 = vpow2.f32 %v3492_v11 }
 0x904   :  { %4038 = vpow2.f32 %v3493_v51 }
 0x905   :  { %4040 = vtanh.f32 %v2985_v47 }
 0x90e   :  { %v4035_v19 = vpop.eup %4034 }
 0x90f   :  { %v2995_v60 = vadd.f32 1.0, %v4035_v19 }
 0x910   :  { %v4037_v31 = vpop.eup %4036 }
 0x911   :  { %4042 = vrcp.f32 %v2995_v60  ;;  %v2996_v27 = vadd.f32 1.0, %v4037_v31  ;;  %v4039_v12 = vpop.eup %4038 }
 0x912   :  { %v4041_v25 = vpop.eup %4040  ;;  %v2997_v8 = vadd.f32 1.0, %v4039_v12 }
 0x913   :  { %4044 = vrcp.f32 %v2996_v27 }
 0x914   :  { %4046 = vrcp.f32 %v2997_v8 }
 0x91c   :  { %v3693_v4 = vpop.f32.mrf.mxu0 }
 0x91d   :  { %v5719_v30 = vadd.f32 %v3693_v4, %v5715_v44 }
 0x91e   :  { %v4043_v23 = vpop.eup %4042  ;;  %v3130_v37 = vpop.f32.mrf.mxu0 }
 0x91f   :  { %v3006_v22 = vmul.f32 %v4043_v23, %v4041_v25  ;;  %v5724_v49 = vadd.f32 %v5715_v44, %v3130_v37  ;;  %v3166_v24 = vsel %vm3163_vm0, %v5719_v30, -1e+30 }
 0x920   :  { %v4045_v6 = vpop.eup %4044  ;;  %3176 = vmax.xlane.f32.xlu0 %v3166_v24  ;;  %v3694_v29 = vpop.f32.mrf.mxu0 }
 0x921   :  { %v3005_v20 = vmul.f32 %v4045_v6, %v2894_v33  ;;  %v5730_v42 = vadd.f32 %v3694_v29, %v5715_v44  ;;  %v3164_v21 = vsel %vm3163_vm0, %v5724_v49, -1e+30  ;;  %v4047_v53 = vpop.eup %4046 }
 0x922   :  { %v3133_v16 = vpop.f32.mrf.mxu0 }
 0x923   :  { %v3007_v63 = vadd.f32 %v3006_v22, %v3005_v20  ;;  %v5733_v26 = vadd.f32 %v5715_v44, %v3133_v16  ;;  %v3167_v36 = vsel %vm3163_vm0, %v5730_v42, -1e+30 }
 0x924   :  { %3172 = vmax.xlane.f32.xlu0 %v3164_v21 }
 0x925   :  { %4048 = vtanh.f32 %v3007_v63  ;;  %3012 = vst [vmem:[%s5837_s15] sm:$0xff] %v3007_v63  ;;  %v3165_v39 = vsel %vm3163_vm0, %v5733_v26, -1e+30 }
 0x926   :  { %3174 = vmax.xlane.f32.xlu1 %v3165_v39 }
 0x928   :  { %3178 = vmax.xlane.f32.xlu0 %v3167_v36 }
 0x932   :  { %v4049_v1 = vpop.eup %4048 }
 0x933   :  { %v3009_v17 = vmul.f32 %v4049_v1, %v4047_v53 }
 0x935   :  { %3011 = vst [vmem:[%s5838_s14] sm:$0xff] %v3009_v17  ;;  %v3024_v2 = vpack.c.bf16 %v3009_v17, %v5672_v43 }
 0x937   :  { %3696 = vmatmul.mubr.bf16.gmra.mxu0 %v3024_v2 }
 0x9a9   :  { %v3177_v41 = vpop.xlane.xlu0 %3176 }
 0x9aa   :  { %v3190_v50 = vsub.f32 %v3166_v24, %v3177_v41 }
 0x9ac   :  { %v3200_v13 = vmul.f32 1.442695, %v3190_v50 }
 0x9ad   :  { %v3173_v0 = vpop.xlane.xlu0 %3172 }
 0x9ae   :  { %v3188_v55 = vsub.f32 %v3164_v21, %v3173_v0 }
 0x9af   :  { %v3175_v61 = vpop.xlane.xlu1 %3174 }
 0x9b0   :  { %v3196_v62 = vmul.f32 1.442695, %v3188_v55  ;;  %v3189_v58 = vsub.f32 %v3165_v39, %v3175_v61 }
 0x9b1   :  { %v3179_v52 = vpop.xlane.xlu0 %3178 }
 0x9b2   :  { %4050 = vpow2.f32 %v3196_v62  ;;  %v3198_v5 = vmul.f32 1.442695, %v3189_v58  ;;  %v3191_v48 = vsub.f32 %v3167_v36, %v3179_v52 }
 0x9b3   :  { %4052 = vpow2.f32 %v3200_v13 }
 0x9b4   :  { %4054 = vpow2.f32 %v3198_v5  ;;  %v3202_v43 = vmul.f32 1.442695, %v3191_v48 }
 0x9b6   :  { %4056 = vpow2.f32 %v3202_v43 }
 0x9bf   :  { %v4051_v7 = vpop.eup %4050 }
 0x9c0   :  { %v4053_v56 = vpop.eup %4052 }
 0x9c1   :  { %v4055_v40 = vpop.eup %4054 }
 0x9c3   :  { %v4057_v15 = vpop.eup %4056 }
 0x9f7   :  { %v3697_v57 = vpop.f32.mrf.mxu0 }
 0x9f8   :  { %v5755_v18 = vadd.f32 %v3697_v57, %v5715_v44 }
 0x9f9   :  { %v3146_v32 = vpop.f32.mrf.mxu0 }
 0x9fa   :  { %v5752_v59 = vadd.f32 %v5715_v44, %v3146_v32  ;;  %v3170_v45 = vsel %vm3163_vm0, %v5755_v18, -1e+30 }
 0x9fb   :  { %v3698_v34 = vpop.f32.mrf.mxu0 }
 0x9fc   :  { %v3168_v46 = vsel %vm3163_vm0, %v5752_v59, -1e+30  ;;  %v5764_v9 = vadd.f32 %v3698_v34, %v5715_v44 }
 0x9fd   :  { %v3149_v10 = vpop.f32.mrf.mxu0  ;;  %3180 = vmax.xlane.f32.xlu1 %v3168_v46 }
 0x9fe   :  { %v5761_v28 = vadd.f32 %v5715_v44, %v3149_v10  ;;  %v3171_v11 = vsel %vm3163_vm0, %v5764_v9, -1e+30 }
 0xa00   :  { %v3169_v35 = vsel %vm3163_vm0, %v5761_v28, -1e+30 }
 0xa01   :  { %3184 = vmax.xlane.f32.xlu1 %v3170_v45  ;;  %3182 = vmax.xlane.f32.xlu0 %v3169_v35 }
 0xa05   :  { %3186 = vmax.xlane.f32.xlu0 %v3171_v11  ;;  %3212 = vadd.xlane.f32.xlu1 %v4051_v7 }
 0xa09   :  { %3214 = vadd.xlane.f32.xlu0 %v4055_v40  ;;  %3216 = vadd.xlane.f32.xlu1 %v4053_v56 }
 0xa0d   :  { %3218 = vadd.xlane.f32.xlu0 %v4057_v15 }
 0xa86   :  { %v3181_v14 = vpop.xlane.xlu1 %3180 }
 0xa87   :  { %v3192_v51 = vsub.f32 %v3168_v46, %v3181_v14 }
 0xa89   :  { %v3204_v3 = vmul.f32 1.442695, %v3192_v51 }
 0xa8a   :  { %v3185_v47 = vpop.xlane.xlu1 %3184  ;;  %v3183_v19 = vpop.xlane.xlu0 %3182 }
 0xa8b   :  { %4058 = vpow2.f32 %v3204_v3  ;;  %v3194_v60 = vsub.f32 %v3170_v45, %v3185_v47  ;;  %v3193_v31 = vsub.f32 %v3169_v35, %v3183_v19 }
 0xa8d   :  { %v3208_v27 = vmul.f32 1.442695, %v3194_v60  ;;  %v3206_v38 = vmul.f32 1.442695, %v3193_v31 }
 0xa8e   :  { %v3213_v44 = vpop.xlane.xlu1 %3212  ;;  %v3187_v12 = vpop.xlane.xlu0 %3186 }
 0xa8f   :  { %4060 = vpow2.f32 %v3208_v27  ;;  %v3195_v4 = vsub.f32 %v3171_v11, %v3187_v12 }
 0xa90   :  { %4062 = vpow2.f32 %v3206_v38 }
 0xa91   :  { %4064 = vrcp.f32 %v3213_v44  ;;  %v3210_v25 = vmul.f32 1.442695, %v3195_v4 }
 0xa92   :  { %v3217_v23 = vpop.xlane.xlu1 %3216  ;;  %v3215_v37 = vpop.xlane.xlu0 %3214 }
 0xa93   :  { %4066 = vpow2.f32 %v3210_v25 }
 0xa94   :  { %4068 = vrcp.f32 %v3217_v23 }
 0xa95   :  { %4070 = vrcp.f32 %v3215_v37 }
 0xa96   :  { %v3219_v33 = vpop.xlane.xlu0 %3218 }
 0xa97   :  { %4072 = vrcp.f32 %v3219_v33 }
 0xa98   :  { %v4059_v22 = vpop.eup %4058 }
 0xa99   :  { %3220 = vadd.xlane.f32.xlu1 %v4059_v22 }
 0xa9c   :  { %v4061_v24 = vpop.eup %4060 }
 0xa9d   :  { %v4063_v6 = vpop.eup %4062  ;;  %3224 = vadd.xlane.f32.xlu1 %v4061_v24 }
 0xa9e   :  { %v4065_v8 = vpop.eup %4064  ;;  %3222 = vadd.xlane.f32.xlu0 %v4063_v6 }
 0xa9f   :  { %v3229_v29 = vmul.f32 %v4065_v8, %v4051_v7 }
 0xaa0   :  { %v4067_v20 = vpop.eup %4066 }
 0xaa1   :  { %v4069_v16 = vpop.eup %4068  ;;  %v3245_v63 = vsel %vm3244_vm1, %v5724_v49, %v3229_v29 }
 0xaa2   :  { %v4071_v21 = vpop.eup %4070  ;;  %3253 = vst [vmem:[%s5839_s13] sm:$0xff] %v3245_v63  ;;  %v3233_v39 = vmul.f32 %v4069_v16, %v4053_v56  ;;  %3226 = vadd.xlane.f32.xlu0 %v4067_v20 }
 0xaa3   :  { %v3231_v36 = vmul.f32 %v4071_v21, %v4055_v40 }
 0xaa4   :  { %v4073_v53 = vpop.eup %4072  ;;  %v3247_v1 = vsel %vm3244_vm1, %v5719_v30, %v3233_v39 }
 0xaa5   :  { %3255 = vst [vmem:[%s5839_s13 + $0x10] sm:$0xff] %v3247_v1  ;;  %v3246_v49 = vsel %vm3244_vm1, %v5733_v26, %v3231_v36  ;;  %v3235_v17 = vmul.f32 %v4073_v53, %v4057_v15 }
 0xaa6   :  { %3254 = vst [vmem:[%s5839_s13 + $0x8] sm:$0xff] %v3246_v49 }
 0xaa7   :  { %v3248_v2 = vsel %vm3244_vm1, %v5730_v42, %v3235_v17 }
 0xaa8   :  { %3256 = vst [vmem:[%s5839_s13 + $0x18] sm:$0xff] %v3248_v2 }
 0xb22   :  { %v3221_v30 = vpop.xlane.xlu1 %3220 }
 0xb23   :  { %4074 = vrcp.f32 %v3221_v30 }
 0xb26   :  { %v3225_v41 = vpop.xlane.xlu1 %3224 }
 0xb27   :  { %4076 = vrcp.f32 %v3225_v41  ;;  %v3223_v0 = vpop.xlane.xlu0 %3222 }
 0xb28   :  { %4078 = vrcp.f32 %v3223_v0 }
 0xb2b   :  { %v3227_v26 = vpop.xlane.xlu0 %3226 }
 0xb2c   :  { %4080 = vrcp.f32 %v3227_v26 }
 0xb30   :  { %v4075_v55 = vpop.eup %4074 }
 0xb31   :  { %v3237_v61 = vmul.f32 %v4075_v55, %v4059_v22 }
 0xb33   :  { %v3249_v50 = vsel %vm3244_vm1, %v5752_v59, %v3237_v61 }
 0xb34   :  { %v4077_v62 = vpop.eup %4076  ;;  %3257 = vst [vmem:[%s5839_s13 + $0x20] sm:$0xff] %v3249_v50 }
 0xb35   :  { %v4079_v42 = vpop.eup %4078  ;;  %v3241_v58 = vmul.f32 %v4077_v62, %v4061_v24 }
 0xb36   :  { %v3239_v52 = vmul.f32 %v4079_v42, %v4063_v6 }
 0xb37   :  { %v3251_v13 = vsel %vm3244_vm1, %v5755_v18, %v3241_v58 }
 0xb38   :  { %3259 = vst [vmem:[%s5839_s13 + $0x30] sm:$0xff] %v3251_v13  ;;  %v3250_v5 = vsel %vm3244_vm1, %v5761_v28, %v3239_v52 }
 0xb39   :  { %v4081_v48 = vpop.eup %4080  ;;  %3258 = vst [vmem:[%s5839_s13 + $0x28] sm:$0xff] %v3250_v5 }
 0xb3a   :  { %v3243_v57 = vmul.f32 %v4081_v48, %v4067_v20 }
 0xb3c   :  { %v3252_v32 = vsel %vm3244_vm1, %v5764_v9, %v3243_v57 }
 0xb3d   :  { %3260 = vst [vmem:[%s5839_s13 + $0x38] sm:$0xff] %v3252_v32 }

</bundles_post_ra>
